<compile_context>
chip_gen: v6e
topology: v6e:2x2x1
jax: 0.10.0
libtpu: 0.0.40
codegen_flags: <defaults>
</compile_context>

<pallas_src>
import functools
import math

import jax
import jax.numpy as jnp
from jax import lax
from jax.experimental import pallas as pl
from jax.experimental.pallas import tpu as pltpu

_BN_EPS = 1e-5


# ---------------------------------------------------------------------------
# Parameters (match the PyTorch module structure; BN in eval mode)
# ---------------------------------------------------------------------------
def _init_conv_bn(key, c_in, c_out, k):
    """Conv2d(c_in, c_out, k, bias=False) + BatchNorm2d(c_out) parameters."""
    kw, kg, kb, km, kv = jax.random.split(key, 5)
    fan_in = c_in * k * k
    return {
        "w": jax.random.normal(kw, (c_out, c_in, k, k), jnp.float32) / math.sqrt(fan_in),
        "gamma": 1.0 + 0.1 * jax.random.normal(kg, (c_out,), jnp.float32),
        "beta": 0.1 * jax.random.normal(kb, (c_out,), jnp.float32),
        "mean": 0.1 * jax.random.normal(km, (c_out,), jnp.float32),
        "var": 1.0 + 0.1 * jax.random.uniform(kv, (c_out,), jnp.float32),
    }


def _fold_bn(p):
    """Fold eval-mode BatchNorm into the conv weight / bias."""
    scale = p["gamma"] / jnp.sqrt(p["var"] + _BN_EPS)
    w = p["w"] * scale[:, None, None, None]
    b = p["beta"] - p["mean"] * scale
    return w, b


def init_repncsp_params(key, c1, c2, n=1, e=0.5):
    c_ = int(c2 * e)
    keys = jax.random.split(key, 3 + 3 * n)
    params = {
        "cv1": _init_conv_bn(keys[0], c1, c_, 1),
        "cv2": _init_conv_bn(keys[1], c1, c_, 1),
        "cv3": _init_conv_bn(keys[2], 2 * c_, c2, 1),
        "m": [],
    }
    for i in range(n):
        params["m"].append({
            "rep_conv3": _init_conv_bn(keys[3 + 3 * i + 0], c_, c_, 3),  # RepConvN.conv1 (3x3)
            "rep_conv1": _init_conv_bn(keys[3 + 3 * i + 1], c_, c_, 1),  # RepConvN.conv2 (1x1)
            "cv2": _init_conv_bn(keys[3 + 3 * i + 2], c_, c_, 3),        # RepNBottleneck.cv2
        })
    return params


# ---------------------------------------------------------------------------
# In-kernel helpers
# ---------------------------------------------------------------------------
def _silu(x):
    return x * (1.0 / (1.0 + jnp.exp(-x)))


def _shift_flat(a, off, hw):
    """out[:, m] = a[:, m + off] if 0 <= m + off < hw else 0  (static off)."""
    if off == 0:
        return a
    c = a.shape[0]
    if off > 0:
        return jnp.concatenate([a[:, off:], jnp.zeros((c, off), a.dtype)], axis=1)
    return jnp.concatenate([jnp.zeros((c, -off), a.dtype), a[:, : hw + off]], axis=1)


def _conv3x3_flat(a, w9, b, wmask, h, w):
    """3x3 conv (stride 1, pad 1) on a channel-major, spatially-flattened tile.

    a:     (c_in, h*w) activations
    w9:    (9, c_out, c_in) weights, tap index t = di*3 + dj
    b:     (c_out, 1) bias
    wmask: (2, h*w) column-validity masks {left, right} as f32 {0, 1}
    """
    hw = h * w
    c_out = w9.shape[1]
    acc = jnp.zeros((c_out, hw), jnp.float32)
    for t in range(9):
        di, dj = t // 3, t % 3
        off = (di - 1) * w + (dj - 1)
        sh = _shift_flat(a, off, hw)
        if dj == 0:
            sh = sh * wmask[0:1, :]
        elif dj == 2:
            sh = sh * wmask[1:2, :]
        acc = acc + jnp.dot(w9[t], sh, preferred_element_type=jnp.float32,
                            precision=lax.Precision.HIGHEST)
    return acc + b


# ---------------------------------------------------------------------------
# Fused RepNCSP kernel (one batch element per grid step)
# ---------------------------------------------------------------------------
def _repncsp_kernel(x_ref, wm_ref,
                    w_cv1_ref, b_cv1_ref,
                    w_cv2_ref, b_cv2_ref,
                    w_rep_ref, b_rep_ref,
                    w_b2_ref, b_b2_ref,
                    w_cv3a_ref, w_cv3b_ref, b_cv3_ref,
                    o_ref, *, h, w, n, shortcut):
    xf = x_ref[0].astype(jnp.float32)   # (c1, H*W) — lane-dense
    wm = wm_ref[...]                    # (2, H*W)

    dot = functools.partial(jnp.dot, preferred_element_type=jnp.float32,
                            precision=lax.Precision.HIGHEST)

    # cv1 / cv2: 1x1 conv + folded BN + SiLU
    y1 = _silu(dot(w_cv1_ref[...], xf) + b_cv1_ref[...])   # (c_, HW)
    y2 = _silu(dot(w_cv2_ref[...], xf) + b_cv2_ref[...])   # (c_, HW)

    # n x RepNBottleneck on y1 (RepConvN merged to a single 3x3, then 3x3, + residual)
    for i in range(n):
        t = _silu(_conv3x3_flat(y1, w_rep_ref[i], b_rep_ref[i], wm, h, w))
        t = _silu(_conv3x3_flat(t, w_b2_ref[i], b_b2_ref[i], wm, h, w))
        y1 = y1 + t if shortcut else t

    # cv3 on concat([y1, y2]) — concat avoided by splitting the weight
    out = _silu(dot(w_cv3a_ref[...], y1) + dot(w_cv3b_ref[...], y2) + b_cv3_ref[...])
    o_ref[0] = out.astype(o_ref.dtype)


# ---------------------------------------------------------------------------
# Wrapper
# ---------------------------------------------------------------------------
def repncsp_forward(x, params, n=1, shortcut=True):
    """RepNCSP forward (eval-mode BN) as a single fused Pallas TPU kernel."""
    N, c1, H, W = x.shape
    HW = H * W
    c_ = params["cv1"]["w"].shape[0]
    c2 = params["cv3"]["w"].shape[0]

    # ---- fold BN + pack weights into kernel layout (host side, tiny) ------
    w_cv1, b_cv1 = _fold_bn(params["cv1"])
    w_cv2, b_cv2 = _fold_bn(params["cv2"])
    w_cv3, b_cv3 = _fold_bn(params["cv3"])

    def to_tap_major(w4):   # (co, ci, 3, 3) -> (9, co, ci), tap t = di*3 + dj
        return jnp.transpose(w4, (2, 3, 0, 1)).reshape(9, w4.shape[0], w4.shape[1])

    w_rep_l, b_rep_l, w_b2_l, b_b2_l = [], [], [], []
    for blk in params["m"]:
        w3, b3 = _fold_bn(blk["rep_conv3"])
        w1, b1 = _fold_bn(blk["rep_conv1"])
        # RepConvN: conv3x3(x) + conv1x1(x) == one 3x3 with the 1x1 added at center tap
        w_eq = w3.at[:, :, 1, 1].add(w1[:, :, 0, 0])
        wb2, bb2 = _fold_bn(blk["cv2"])
        w_rep_l.append(to_tap_major(w_eq))
        b_rep_l.append((b3 + b1).reshape(-1, 1))
        w_b2_l.append(to_tap_major(wb2))
        b_b2_l.append(bb2.reshape(-1, 1))
    w_rep = jnp.stack(w_rep_l)   # (n, 9, c_, c_)
    b_rep = jnp.stack(b_rep_l)   # (n, c_, 1)
    w_b2 = jnp.stack(w_b2_l)
    b_b2 = jnp.stack(b_b2_l)

    w_cv1_m = w_cv1.reshape(c_, c1)
    w_cv2_m = w_cv2.reshape(c_, c1)
    w_cv3_m = w_cv3.reshape(c2, 2 * c_)
    w_cv3a, w_cv3b = w_cv3_m[:, :c_], w_cv3_m[:, c_:]

    # column-validity masks for the left / right 3x3 taps (f32 {0,1})
    wcol = jnp.arange(W, dtype=jnp.int32)
    left = (wcol >= 1).astype(jnp.float32)
    right = (wcol <= W - 2).astype(jnp.float32)
    wmask = jnp.stack([jnp.tile(left, H), jnp.tile(right, H)], axis=0)   # (2, HW)

    xf = x.reshape(N, c1, HW)   # free wrapper reshape; HW=256 is the lane axis

    kernel = functools.partial(_repncsp_kernel, h=H, w=W, n=n, shortcut=shortcut)

    def _const(shape):
        nd = len(shape)
        return pl.BlockSpec(shape, lambda i, nd=nd: (0,) * nd)

    macs_per_pix = 2 * c_ * c1 + n * 18 * c_ * c_ + 2 * c2 * c_
    flops = 2 * N * HW * macs_per_pix
    transcendentals = N * HW * (2 * c_ + n * 2 * c_ + c2)
    bytes_accessed = 4 * (x.size + N * c2 * HW) + 4 * sum(
        a.size for a in (w_cv1_m, w_cv2_m, w_cv3_m, w_rep, w_b2, b_rep, b_b2,
                         b_cv1, b_cv2, b_cv3, wmask))

    out = pl.pallas_call(
        kernel,
        out_shape=jax.ShapeDtypeStruct((N, c2, HW), x.dtype),
        grid=(N,),
        in_specs=[
            pl.BlockSpec((1, c1, HW), lambda i: (i, 0, 0)),   # x (per batch element)
            _const((2, HW)),                                   # column masks
            _const((c_, c1)), _const((c_, 1)),                 # cv1
            _const((c_, c1)), _const((c_, 1)),                 # cv2
            _const((n, 9, c_, c_)), _const((n, c_, 1)),        # RepConvN (merged 3x3)
            _const((n, 9, c_, c_)), _const((n, c_, 1)),        # bottleneck cv2 (3x3)
            _const((c2, c_)), _const((c2, c_)), _const((c2, 1)),   # cv3 (split)
        ],
        out_specs=pl.BlockSpec((1, c2, HW), lambda i: (i, 0, 0)),
        compiler_params=pltpu.CompilerParams(
            dimension_semantics=("parallel",),
        ),
        cost_estimate=pl.CostEstimate(
            flops=flops, transcendentals=transcendentals,
            bytes_accessed=bytes_accessed),
    )(xf, wmask,
      w_cv1_m, b_cv1.reshape(-1, 1),
      w_cv2_m, b_cv2.reshape(-1, 1),
      w_rep, b_rep, w_b2, b_b2,
      w_cv3a, w_cv3b, b_cv3.reshape(-1, 1))

    return out.reshape(N, c2, H, W)


# ---------------------------------------------------------------------------
# Pure-JAX (XLA) reference — RepConvN kept as two separate branches
# ---------------------------------------------------------------------------
def repncsp_reference(x, params, n=1, shortcut=True):
    def conv(a, w, b, pad):
        out = lax.conv_general_dilated(
            a, w, window_strides=(1, 1), padding=[(pad, pad), (pad, pad)],
            dimension_numbers=("NCHW", "OIHW", "NCHW"),
            precision=lax.Precision.HIGHEST)
        return out + b.reshape(1, -1, 1, 1)

    w_cv1, b_cv1 = _fold_bn(params["cv1"])
    w_cv2, b_cv2 = _fold_bn(params["cv2"])
    w_cv3, b_cv3 = _fold_bn(params["cv3"])

    y1 = _silu(conv(x, w_cv1, b_cv1, 0))
    y2 = _silu(conv(x, w_cv2, b_cv2, 0))
    for i in range(n):
        blk = params["m"][i]
        w3, b3 = _fold_bn(blk["rep_conv3"])
        w1, b1 = _fold_bn(blk["rep_conv1"])
        wb2, bb2 = _fold_bn(blk["cv2"])
        # RepConvN.forward: act(conv1(x) + conv2(x))  (bn branch is None)
        t = _silu(conv(y1, w3, b3, 1) + conv(y1, w1, b1, 0))
        t = _silu(conv(t, wb2, bb2, 1))
        y1 = y1 + t if shortcut else t
    return _silu(conv(jnp.concatenate([y1, y2], axis=1), w_cv3, b_cv3, 0))


if __name__ == "__main__":
    key = jax.random.PRNGKey(0)
    kx, kp = jax.random.split(key)

    N, C1, H, W = 2, 4, 16, 16
    C2, n, shortcut, e = 8, 1, True, 0.5

    x = jax.random.normal(kx, (N, C1, H, W), dtype=jnp.float32)
    params = init_repncsp_params(kp, C1, C2, n=n, e=e)

    y = repncsp_forward(x, params, n=n, shortcut=shortcut)
    y = jax.block_until_ready(y)

    y_ref = repncsp_reference(x, params, n=n, shortcut=shortcut)
    assert y.shape == y_ref.shape == (N, C2, H, W), (y.shape, y_ref.shape)
    assert jnp.allclose(y, y_ref, atol=2e-3, rtol=2e-3), \
        float(jnp.max(jnp.abs(y - y_ref)))

    print("KERNEL_OK")
</pallas_src>

<mosaic_0001>
module attributes {stable_mosaic.version = 11 : i64} {
  func.func @_repncsp_kernel(%arg0: i32, %arg1: memref<1x4x256xf32, #tpu.memory_space<vmem>>, %arg2: memref<2x256xf32, #tpu.memory_space<vmem>>, %arg3: memref<4x4xf32, #tpu.memory_space<vmem>>, %arg4: memref<4x1xf32, #tpu.memory_space<vmem>>, %arg5: memref<4x4xf32, #tpu.memory_space<vmem>>, %arg6: memref<4x1xf32, #tpu.memory_space<vmem>>, %arg7: memref<1x9x4x4xf32, #tpu.memory_space<vmem>>, %arg8: memref<1x4x1xf32, #tpu.memory_space<vmem>>, %arg9: memref<1x9x4x4xf32, #tpu.memory_space<vmem>>, %arg10: memref<1x4x1xf32, #tpu.memory_space<vmem>>, %arg11: memref<8x4xf32, #tpu.memory_space<vmem>>, %arg12: memref<8x4xf32, #tpu.memory_space<vmem>>, %arg13: memref<8x1xf32, #tpu.memory_space<vmem>>, %arg14: memref<1x8x256xf32, #tpu.memory_space<vmem>>) attributes {dimension_semantics = [#tpu.dimension_semantics<parallel>], iteration_bounds = array<i64: 2>, scalar_prefetch = 0 : i64, scratch_operands = 0 : i64, tpu.core_type = #tpu.core_type<tc>, window_params = [{transform_indices = @transform_0, window_bounds = array<i64: 1, 4, 256>}, {pipeline_mode = #tpu.pipeline_mode<synchronous>, transform_indices = @transform_1, window_bounds = array<i64: 2, 256>}, {pipeline_mode = #tpu.pipeline_mode<synchronous>, transform_indices = @transform_2, window_bounds = array<i64: 4, 4>}, {pipeline_mode = #tpu.pipeline_mode<synchronous>, transform_indices = @transform_3, window_bounds = array<i64: 4, 1>}, {pipeline_mode = #tpu.pipeline_mode<synchronous>, transform_indices = @transform_4, window_bounds = array<i64: 4, 4>}, {pipeline_mode = #tpu.pipeline_mode<synchronous>, transform_indices = @transform_5, window_bounds = array<i64: 4, 1>}, {pipeline_mode = #tpu.pipeline_mode<synchronous>, transform_indices = @transform_6, window_bounds = array<i64: 1, 9, 4, 4>}, {pipeline_mode = #tpu.pipeline_mode<synchronous>, transform_indices = @transform_7, window_bounds = array<i64: 1, 4, 1>}, {pipeline_mode = #tpu.pipeline_mode<synchronous>, transform_indices = @transform_8, window_bounds = array<i64: 1, 9, 4, 4>}, {pipeline_mode = #tpu.pipeline_mode<synchronous>, transform_indices = @transform_9, window_bounds = array<i64: 1, 4, 1>}, {pipeline_mode = #tpu.pipeline_mode<synchronous>, transform_indices = @transform_10, window_bounds = array<i64: 8, 4>}, {pipeline_mode = #tpu.pipeline_mode<synchronous>, transform_indices = @transform_11, window_bounds = array<i64: 8, 4>}, {pipeline_mode = #tpu.pipeline_mode<synchronous>, transform_indices = @transform_12, window_bounds = array<i64: 8, 1>}, {transform_indices = @transform_13, window_bounds = array<i64: 1, 8, 256>}]} {
    %c0 = arith.constant 0 : index
    %c0_0 = arith.constant 0 : index
    %c0_1 = arith.constant 0 : index
    %0 = vector.load %arg1[%c0, %c0_0, %c0_1] : memref<1x4x256xf32, #tpu.memory_space<vmem>>, vector<1x4x256xf32>
    %1 = vector.shape_cast %0 : vector<1x4x256xf32> to vector<4x256xf32>
    %c0_2 = arith.constant 0 : index
    %c0_3 = arith.constant 0 : index
    %2 = vector.load %arg2[%c0_2, %c0_3] : memref<2x256xf32, #tpu.memory_space<vmem>>, vector<2x256xf32>
    %c0_4 = arith.constant 0 : index
    %c0_5 = arith.constant 0 : index
    %3 = vector.load %arg3[%c0_4, %c0_5] : memref<4x4xf32, #tpu.memory_space<vmem>>, vector<4x4xf32>
    %cst = arith.constant dense<0.000000e+00> : vector<4x256xf32>
    %4 = tpu.matmul %3, %1, %cst {dimension_numbers = #tpu.dot_dimension_numbers<[1], [0], [0], [1], [0, 0, 1, 1], [], []>, precision = #tpu.contract_precision<fp32>} : vector<4x4xf32>, vector<4x256xf32>, vector<4x256xf32> -> vector<4x256xf32>
    %c0_6 = arith.constant 0 : index
    %c0_7 = arith.constant 0 : index
    %5 = vector.load %arg4[%c0_6, %c0_7] : memref<4x1xf32, #tpu.memory_space<vmem>>, vector<4x1xf32>
    %6 = vector.broadcast %5 : vector<4x1xf32> to vector<4x256xf32>
    %7 = arith.addf %4, %6 : vector<4x256xf32>
    %cst_8 = arith.constant 0.000000e+00 : f32
    %8 = vector.broadcast %cst_8 : f32 to vector<4x256xf32>
    %9 = arith.subf %8, %7 : vector<4x256xf32>
    %10 = math.exp %9 : vector<4x256xf32>
    %cst_9 = arith.constant 1.000000e+00 : f32
    %11 = vector.broadcast %cst_9 : f32 to vector<4x256xf32>
    %12 = arith.addf %11, %10 : vector<4x256xf32>
    %cst_10 = arith.constant 1.000000e+00 : f32
    %13 = vector.broadcast %cst_10 : f32 to vector<4x256xf32>
    %14 = arith.divf %13, %12 : vector<4x256xf32>
    %15 = arith.mulf %7, %14 : vector<4x256xf32>
    %c0_11 = arith.constant 0 : index
    %c0_12 = arith.constant 0 : index
    %16 = vector.load %arg5[%c0_11, %c0_12] : memref<4x4xf32, #tpu.memory_space<vmem>>, vector<4x4xf32>
    %cst_13 = arith.constant dense<0.000000e+00> : vector<4x256xf32>
    %17 = tpu.matmul %16, %1, %cst_13 {dimension_numbers = #tpu.dot_dimension_numbers<[1], [0], [0], [1], [0, 0, 1, 1], [], []>, precision = #tpu.contract_precision<fp32>} : vector<4x4xf32>, vector<4x256xf32>, vector<4x256xf32> -> vector<4x256xf32>
    %c0_14 = arith.constant 0 : index
    %c0_15 = arith.constant 0 : index
    %18 = vector.load %arg6[%c0_14, %c0_15] : memref<4x1xf32, #tpu.memory_space<vmem>>, vector<4x1xf32>
    %19 = vector.broadcast %18 : vector<4x1xf32> to vector<4x256xf32>
    %20 = arith.addf %17, %19 : vector<4x256xf32>
    %cst_16 = arith.constant 0.000000e+00 : f32
    %21 = vector.broadcast %cst_16 : f32 to vector<4x256xf32>
    %22 = arith.subf %21, %20 : vector<4x256xf32>
    %23 = math.exp %22 : vector<4x256xf32>
    %cst_17 = arith.constant 1.000000e+00 : f32
    %24 = vector.broadcast %cst_17 : f32 to vector<4x256xf32>
    %25 = arith.addf %24, %23 : vector<4x256xf32>
    %cst_18 = arith.constant 1.000000e+00 : f32
    %26 = vector.broadcast %cst_18 : f32 to vector<4x256xf32>
    %27 = arith.divf %26, %25 : vector<4x256xf32>
    %28 = arith.mulf %20, %27 : vector<4x256xf32>
    %c0_19 = arith.constant 0 : index
    %c0_20 = arith.constant 0 : index
    %c0_21 = arith.constant 0 : index
    %c0_22 = arith.constant 0 : index
    %29 = vector.load %arg7[%c0_19, %c0_20, %c0_21, %c0_22] : memref<1x9x4x4xf32, #tpu.memory_space<vmem>>, vector<1x9x4x4xf32>
    %30 = vector.shape_cast %29 : vector<1x9x4x4xf32> to vector<9x4x4xf32>
    %c0_23 = arith.constant 0 : index
    %c0_24 = arith.constant 0 : index
    %c0_25 = arith.constant 0 : index
    %31 = vector.load %arg8[%c0_23, %c0_24, %c0_25] : memref<1x4x1xf32, #tpu.memory_space<vmem>>, vector<1x4x1xf32>
    %32 = vector.shape_cast %31 : vector<1x4x1xf32> to vector<4x1xf32>
    %cst_26 = arith.constant 0.000000e+00 : f32
    %33 = vector.broadcast %cst_26 : f32 to vector<4x256xf32>
    %cst_27 = arith.constant 0.000000e+00 : f32
    %34 = vector.broadcast %cst_27 : f32 to vector<4x17xf32>
    %35 = vector.extract_strided_slice %15 {offsets = [0, 0], sizes = [4, 239], strides = [1, 1]} : vector<4x256xf32> to vector<4x239xf32>
    %36 = tpu.concatenate %34, %35 in 1 : vector<4x17xf32>, vector<4x239xf32> -> vector<4x256xf32>
    %37 = vector.extract_strided_slice %2 {offsets = [0, 0], sizes = [1, 256], strides = [1, 1]} : vector<2x256xf32> to vector<1x256xf32>
    %38 = vector.broadcast %37 : vector<1x256xf32> to vector<4x256xf32>
    %39 = arith.mulf %36, %38 : vector<4x256xf32>
    %40 = vector.extract_strided_slice %30 {offsets = [0, 0, 0], sizes = [1, 4, 4], strides = [1, 1, 1]} : vector<9x4x4xf32> to vector<1x4x4xf32>
    %41 = vector.shape_cast %40 : vector<1x4x4xf32> to vector<4x4xf32>
    %cst_28 = arith.constant dense<0.000000e+00> : vector<4x256xf32>
    %42 = tpu.matmul %41, %39, %cst_28 {dimension_numbers = #tpu.dot_dimension_numbers<[1], [0], [0], [1], [0, 0, 1, 1], [], []>, precision = #tpu.contract_precision<fp32>} : vector<4x4xf32>, vector<4x256xf32>, vector<4x256xf32> -> vector<4x256xf32>
    %43 = arith.addf %33, %42 : vector<4x256xf32>
    %cst_29 = arith.constant 0.000000e+00 : f32
    %44 = vector.broadcast %cst_29 : f32 to vector<4x16xf32>
    %45 = vector.extract_strided_slice %15 {offsets = [0, 0], sizes = [4, 240], strides = [1, 1]} : vector<4x256xf32> to vector<4x240xf32>
    %46 = tpu.concatenate %44, %45 in 1 : vector<4x16xf32>, vector<4x240xf32> -> vector<4x256xf32>
    %47 = vector.extract_strided_slice %30 {offsets = [1, 0, 0], sizes = [1, 4, 4], strides = [1, 1, 1]} : vector<9x4x4xf32> to vector<1x4x4xf32>
    %48 = vector.shape_cast %47 : vector<1x4x4xf32> to vector<4x4xf32>
    %cst_30 = arith.constant dense<0.000000e+00> : vector<4x256xf32>
    %49 = tpu.matmul %48, %46, %cst_30 {dimension_numbers = #tpu.dot_dimension_numbers<[1], [0], [0], [1], [0, 0, 1, 1], [], []>, precision = #tpu.contract_precision<fp32>} : vector<4x4xf32>, vector<4x256xf32>, vector<4x256xf32> -> vector<4x256xf32>
    %50 = arith.addf %43, %49 : vector<4x256xf32>
    %cst_31 = arith.constant 0.000000e+00 : f32
    %51 = vector.broadcast %cst_31 : f32 to vector<4x15xf32>
    %52 = vector.extract_strided_slice %15 {offsets = [0, 0], sizes = [4, 241], strides = [1, 1]} : vector<4x256xf32> to vector<4x241xf32>
    %53 = tpu.concatenate %51, %52 in 1 : vector<4x15xf32>, vector<4x241xf32> -> vector<4x256xf32>
    %54 = vector.extract_strided_slice %2 {offsets = [1, 0], sizes = [1, 256], strides = [1, 1]} : vector<2x256xf32> to vector<1x256xf32>
    %55 = vector.broadcast %54 : vector<1x256xf32> to vector<4x256xf32>
    %56 = arith.mulf %53, %55 : vector<4x256xf32>
    %57 = vector.extract_strided_slice %30 {offsets = [2, 0, 0], sizes = [1, 4, 4], strides = [1, 1, 1]} : vector<9x4x4xf32> to vector<1x4x4xf32>
    %58 = vector.shape_cast %57 : vector<1x4x4xf32> to vector<4x4xf32>
    %cst_32 = arith.constant dense<0.000000e+00> : vector<4x256xf32>
    %59 = tpu.matmul %58, %56, %cst_32 {dimension_numbers = #tpu.dot_dimension_numbers<[1], [0], [0], [1], [0, 0, 1, 1], [], []>, precision = #tpu.contract_precision<fp32>} : vector<4x4xf32>, vector<4x256xf32>, vector<4x256xf32> -> vector<4x256xf32>
    %60 = arith.addf %50, %59 : vector<4x256xf32>
    %cst_33 = arith.constant 0.000000e+00 : f32
    %61 = vector.broadcast %cst_33 : f32 to vector<4x1xf32>
    %62 = vector.extract_strided_slice %15 {offsets = [0, 0], sizes = [4, 255], strides = [1, 1]} : vector<4x256xf32> to vector<4x255xf32>
    %63 = tpu.concatenate %61, %62 in 1 : vector<4x1xf32>, vector<4x255xf32> -> vector<4x256xf32>
    %64 = vector.extract_strided_slice %2 {offsets = [0, 0], sizes = [1, 256], strides = [1, 1]} : vector<2x256xf32> to vector<1x256xf32>
    %65 = vector.broadcast %64 : vector<1x256xf32> to vector<4x256xf32>
    %66 = arith.mulf %63, %65 : vector<4x256xf32>
    %67 = vector.extract_strided_slice %30 {offsets = [3, 0, 0], sizes = [1, 4, 4], strides = [1, 1, 1]} : vector<9x4x4xf32> to vector<1x4x4xf32>
    %68 = vector.shape_cast %67 : vector<1x4x4xf32> to vector<4x4xf32>
    %cst_34 = arith.constant dense<0.000000e+00> : vector<4x256xf32>
    %69 = tpu.matmul %68, %66, %cst_34 {dimension_numbers = #tpu.dot_dimension_numbers<[1], [0], [0], [1], [0, 0, 1, 1], [], []>, precision = #tpu.contract_precision<fp32>} : vector<4x4xf32>, vector<4x256xf32>, vector<4x256xf32> -> vector<4x256xf32>
    %70 = arith.addf %60, %69 : vector<4x256xf32>
    %71 = vector.extract_strided_slice %30 {offsets = [4, 0, 0], sizes = [1, 4, 4], strides = [1, 1, 1]} : vector<9x4x4xf32> to vector<1x4x4xf32>
    %72 = vector.shape_cast %71 : vector<1x4x4xf32> to vector<4x4xf32>
    %cst_35 = arith.constant dense<0.000000e+00> : vector<4x256xf32>
    %73 = tpu.matmul %72, %15, %cst_35 {dimension_numbers = #tpu.dot_dimension_numbers<[1], [0], [0], [1], [0, 0, 1, 1], [], []>, precision = #tpu.contract_precision<fp32>} : vector<4x4xf32>, vector<4x256xf32>, vector<4x256xf32> -> vector<4x256xf32>
    %74 = arith.addf %70, %73 : vector<4x256xf32>
    %75 = vector.extract_strided_slice %15 {offsets = [0, 1], sizes = [4, 255], strides = [1, 1]} : vector<4x256xf32> to vector<4x255xf32>
    %cst_36 = arith.constant 0.000000e+00 : f32
    %76 = vector.broadcast %cst_36 : f32 to vector<4x1xf32>
    %77 = tpu.concatenate %75, %76 in 1 : vector<4x255xf32>, vector<4x1xf32> -> vector<4x256xf32>
    %78 = vector.extract_strided_slice %2 {offsets = [1, 0], sizes = [1, 256], strides = [1, 1]} : vector<2x256xf32> to vector<1x256xf32>
    %79 = vector.broadcast %78 : vector<1x256xf32> to vector<4x256xf32>
    %80 = arith.mulf %77, %79 : vector<4x256xf32>
    %81 = vector.extract_strided_slice %30 {offsets = [5, 0, 0], sizes = [1, 4, 4], strides = [1, 1, 1]} : vector<9x4x4xf32> to vector<1x4x4xf32>
    %82 = vector.shape_cast %81 : vector<1x4x4xf32> to vector<4x4xf32>
    %cst_37 = arith.constant dense<0.000000e+00> : vector<4x256xf32>
    %83 = tpu.matmul %82, %80, %cst_37 {dimension_numbers = #tpu.dot_dimension_numbers<[1], [0], [0], [1], [0, 0, 1, 1], [], []>, precision = #tpu.contract_precision<fp32>} : vector<4x4xf32>, vector<4x256xf32>, vector<4x256xf32> -> vector<4x256xf32>
    %84 = arith.addf %74, %83 : vector<4x256xf32>
    %85 = vector.extract_strided_slice %15 {offsets = [0, 15], sizes = [4, 241], strides = [1, 1]} : vector<4x256xf32> to vector<4x241xf32>
    %cst_38 = arith.constant 0.000000e+00 : f32
    %86 = vector.broadcast %cst_38 : f32 to vector<4x15xf32>
    %87 = tpu.concatenate %85, %86 in 1 : vector<4x241xf32>, vector<4x15xf32> -> vector<4x256xf32>
    %88 = vector.extract_strided_slice %2 {offsets = [0, 0], sizes = [1, 256], strides = [1, 1]} : vector<2x256xf32> to vector<1x256xf32>
    %89 = vector.broadcast %88 : vector<1x256xf32> to vector<4x256xf32>
    %90 = arith.mulf %87, %89 : vector<4x256xf32>
    %91 = vector.extract_strided_slice %30 {offsets = [6, 0, 0], sizes = [1, 4, 4], strides = [1, 1, 1]} : vector<9x4x4xf32> to vector<1x4x4xf32>
    %92 = vector.shape_cast %91 : vector<1x4x4xf32> to vector<4x4xf32>
    %cst_39 = arith.constant dense<0.000000e+00> : vector<4x256xf32>
    %93 = tpu.matmul %92, %90, %cst_39 {dimension_numbers = #tpu.dot_dimension_numbers<[1], [0], [0], [1], [0, 0, 1, 1], [], []>, precision = #tpu.contract_precision<fp32>} : vector<4x4xf32>, vector<4x256xf32>, vector<4x256xf32> -> vector<4x256xf32>
    %94 = arith.addf %84, %93 : vector<4x256xf32>
    %95 = vector.extract_strided_slice %15 {offsets = [0, 16], sizes = [4, 240], strides = [1, 1]} : vector<4x256xf32> to vector<4x240xf32>
    %cst_40 = arith.constant 0.000000e+00 : f32
    %96 = vector.broadcast %cst_40 : f32 to vector<4x16xf32>
    %97 = tpu.concatenate %95, %96 in 1 : vector<4x240xf32>, vector<4x16xf32> -> vector<4x256xf32>
    %98 = vector.extract_strided_slice %30 {offsets = [7, 0, 0], sizes = [1, 4, 4], strides = [1, 1, 1]} : vector<9x4x4xf32> to vector<1x4x4xf32>
    %99 = vector.shape_cast %98 : vector<1x4x4xf32> to vector<4x4xf32>
    %cst_41 = arith.constant dense<0.000000e+00> : vector<4x256xf32>
    %100 = tpu.matmul %99, %97, %cst_41 {dimension_numbers = #tpu.dot_dimension_numbers<[1], [0], [0], [1], [0, 0, 1, 1], [], []>, precision = #tpu.contract_precision<fp32>} : vector<4x4xf32>, vector<4x256xf32>, vector<4x256xf32> -> vector<4x256xf32>
    %101 = arith.addf %94, %100 : vector<4x256xf32>
    %102 = vector.extract_strided_slice %15 {offsets = [0, 17], sizes = [4, 239], strides = [1, 1]} : vector<4x256xf32> to vector<4x239xf32>
    %cst_42 = arith.constant 0.000000e+00 : f32
    %103 = vector.broadcast %cst_42 : f32 to vector<4x17xf32>
    %104 = tpu.concatenate %102, %103 in 1 : vector<4x239xf32>, vector<4x17xf32> -> vector<4x256xf32>
    %105 = vector.extract_strided_slice %2 {offsets = [1, 0], sizes = [1, 256], strides = [1, 1]} : vector<2x256xf32> to vector<1x256xf32>
    %106 = vector.broadcast %105 : vector<1x256xf32> to vector<4x256xf32>
    %107 = arith.mulf %104, %106 : vector<4x256xf32>
    %108 = vector.extract_strided_slice %30 {offsets = [8, 0, 0], sizes = [1, 4, 4], strides = [1, 1, 1]} : vector<9x4x4xf32> to vector<1x4x4xf32>
    %109 = vector.shape_cast %108 : vector<1x4x4xf32> to vector<4x4xf32>
    %cst_43 = arith.constant dense<0.000000e+00> : vector<4x256xf32>
    %110 = tpu.matmul %109, %107, %cst_43 {dimension_numbers = #tpu.dot_dimension_numbers<[1], [0], [0], [1], [0, 0, 1, 1], [], []>, precision = #tpu.contract_precision<fp32>} : vector<4x4xf32>, vector<4x256xf32>, vector<4x256xf32> -> vector<4x256xf32>
    %111 = arith.addf %101, %110 : vector<4x256xf32>
    %112 = vector.broadcast %32 : vector<4x1xf32> to vector<4x256xf32>
    %113 = arith.addf %111, %112 : vector<4x256xf32>
    %cst_44 = arith.constant 0.000000e+00 : f32
    %114 = vector.broadcast %cst_44 : f32 to vector<4x256xf32>
    %115 = arith.subf %114, %113 : vector<4x256xf32>
    %116 = math.exp %115 : vector<4x256xf32>
    %cst_45 = arith.constant 1.000000e+00 : f32
    %117 = vector.broadcast %cst_45 : f32 to vector<4x256xf32>
    %118 = arith.addf %117, %116 : vector<4x256xf32>
    %cst_46 = arith.constant 1.000000e+00 : f32
    %119 = vector.broadcast %cst_46 : f32 to vector<4x256xf32>
    %120 = arith.divf %119, %118 : vector<4x256xf32>
    %121 = arith.mulf %113, %120 : vector<4x256xf32>
    %c0_47 = arith.constant 0 : index
    %c0_48 = arith.constant 0 : index
    %c0_49 = arith.constant 0 : index
    %c0_50 = arith.constant 0 : index
    %122 = vector.load %arg9[%c0_47, %c0_48, %c0_49, %c0_50] : memref<1x9x4x4xf32, #tpu.memory_space<vmem>>, vector<1x9x4x4xf32>
    %123 = vector.shape_cast %122 : vector<1x9x4x4xf32> to vector<9x4x4xf32>
    %c0_51 = arith.constant 0 : index
    %c0_52 = arith.constant 0 : index
    %c0_53 = arith.constant 0 : index
    %124 = vector.load %arg10[%c0_51, %c0_52, %c0_53] : memref<1x4x1xf32, #tpu.memory_space<vmem>>, vector<1x4x1xf32>
    %125 = vector.shape_cast %124 : vector<1x4x1xf32> to vector<4x1xf32>
    %cst_54 = arith.constant 0.000000e+00 : f32
    %126 = vector.broadcast %cst_54 : f32 to vector<4x256xf32>
    %cst_55 = arith.constant 0.000000e+00 : f32
    %127 = vector.broadcast %cst_55 : f32 to vector<4x17xf32>
    %128 = vector.extract_strided_slice %121 {offsets = [0, 0], sizes = [4, 239], strides = [1, 1]} : vector<4x256xf32> to vector<4x239xf32>
    %129 = tpu.concatenate %127, %128 in 1 : vector<4x17xf32>, vector<4x239xf32> -> vector<4x256xf32>
    %130 = vector.extract_strided_slice %2 {offsets = [0, 0], sizes = [1, 256], strides = [1, 1]} : vector<2x256xf32> to vector<1x256xf32>
    %131 = vector.broadcast %130 : vector<1x256xf32> to vector<4x256xf32>
    %132 = arith.mulf %129, %131 : vector<4x256xf32>
    %133 = vector.extract_strided_slice %123 {offsets = [0, 0, 0], sizes = [1, 4, 4], strides = [1, 1, 1]} : vector<9x4x4xf32> to vector<1x4x4xf32>
    %134 = vector.shape_cast %133 : vector<1x4x4xf32> to vector<4x4xf32>
    %cst_56 = arith.constant dense<0.000000e+00> : vector<4x256xf32>
    %135 = tpu.matmul %134, %132, %cst_56 {dimension_numbers = #tpu.dot_dimension_numbers<[1], [0], [0], [1], [0, 0, 1, 1], [], []>, precision = #tpu.contract_precision<fp32>} : vector<4x4xf32>, vector<4x256xf32>, vector<4x256xf32> -> vector<4x256xf32>
    %136 = arith.addf %126, %135 : vector<4x256xf32>
    %cst_57 = arith.constant 0.000000e+00 : f32
    %137 = vector.broadcast %cst_57 : f32 to vector<4x16xf32>
    %138 = vector.extract_strided_slice %121 {offsets = [0, 0], sizes = [4, 240], strides = [1, 1]} : vector<4x256xf32> to vector<4x240xf32>
    %139 = tpu.concatenate %137, %138 in 1 : vector<4x16xf32>, vector<4x240xf32> -> vector<4x256xf32>
    %140 = vector.extract_strided_slice %123 {offsets = [1, 0, 0], sizes = [1, 4, 4], strides = [1, 1, 1]} : vector<9x4x4xf32> to vector<1x4x4xf32>
    %141 = vector.shape_cast %140 : vector<1x4x4xf32> to vector<4x4xf32>
    %cst_58 = arith.constant dense<0.000000e+00> : vector<4x256xf32>
    %142 = tpu.matmul %141, %139, %cst_58 {dimension_numbers = #tpu.dot_dimension_numbers<[1], [0], [0], [1], [0, 0, 1, 1], [], []>, precision = #tpu.contract_precision<fp32>} : vector<4x4xf32>, vector<4x256xf32>, vector<4x256xf32> -> vector<4x256xf32>
    %143 = arith.addf %136, %142 : vector<4x256xf32>
    %cst_59 = arith.constant 0.000000e+00 : f32
    %144 = vector.broadcast %cst_59 : f32 to vector<4x15xf32>
    %145 = vector.extract_strided_slice %121 {offsets = [0, 0], sizes = [4, 241], strides = [1, 1]} : vector<4x256xf32> to vector<4x241xf32>
    %146 = tpu.concatenate %144, %145 in 1 : vector<4x15xf32>, vector<4x241xf32> -> vector<4x256xf32>
    %147 = vector.extract_strided_slice %2 {offsets = [1, 0], sizes = [1, 256], strides = [1, 1]} : vector<2x256xf32> to vector<1x256xf32>
    %148 = vector.broadcast %147 : vector<1x256xf32> to vector<4x256xf32>
    %149 = arith.mulf %146, %148 : vector<4x256xf32>
    %150 = vector.extract_strided_slice %123 {offsets = [2, 0, 0], sizes = [1, 4, 4], strides = [1, 1, 1]} : vector<9x4x4xf32> to vector<1x4x4xf32>
    %151 = vector.shape_cast %150 : vector<1x4x4xf32> to vector<4x4xf32>
    %cst_60 = arith.constant dense<0.000000e+00> : vector<4x256xf32>
    %152 = tpu.matmul %151, %149, %cst_60 {dimension_numbers = #tpu.dot_dimension_numbers<[1], [0], [0], [1], [0, 0, 1, 1], [], []>, precision = #tpu.contract_precision<fp32>} : vector<4x4xf32>, vector<4x256xf32>, vector<4x256xf32> -> vector<4x256xf32>
    %153 = arith.addf %143, %152 : vector<4x256xf32>
    %cst_61 = arith.constant 0.000000e+00 : f32
    %154 = vector.broadcast %cst_61 : f32 to vector<4x1xf32>
    %155 = vector.extract_strided_slice %121 {offsets = [0, 0], sizes = [4, 255], strides = [1, 1]} : vector<4x256xf32> to vector<4x255xf32>
    %156 = tpu.concatenate %154, %155 in 1 : vector<4x1xf32>, vector<4x255xf32> -> vector<4x256xf32>
    %157 = vector.extract_strided_slice %2 {offsets = [0, 0], sizes = [1, 256], strides = [1, 1]} : vector<2x256xf32> to vector<1x256xf32>
    %158 = vector.broadcast %157 : vector<1x256xf32> to vector<4x256xf32>
    %159 = arith.mulf %156, %158 : vector<4x256xf32>
    %160 = vector.extract_strided_slice %123 {offsets = [3, 0, 0], sizes = [1, 4, 4], strides = [1, 1, 1]} : vector<9x4x4xf32> to vector<1x4x4xf32>
    %161 = vector.shape_cast %160 : vector<1x4x4xf32> to vector<4x4xf32>
    %cst_62 = arith.constant dense<0.000000e+00> : vector<4x256xf32>
    %162 = tpu.matmul %161, %159, %cst_62 {dimension_numbers = #tpu.dot_dimension_numbers<[1], [0], [0], [1], [0, 0, 1, 1], [], []>, precision = #tpu.contract_precision<fp32>} : vector<4x4xf32>, vector<4x256xf32>, vector<4x256xf32> -> vector<4x256xf32>
    %163 = arith.addf %153, %162 : vector<4x256xf32>
    %164 = vector.extract_strided_slice %123 {offsets = [4, 0, 0], sizes = [1, 4, 4], strides = [1, 1, 1]} : vector<9x4x4xf32> to vector<1x4x4xf32>
    %165 = vector.shape_cast %164 : vector<1x4x4xf32> to vector<4x4xf32>
    %cst_63 = arith.constant dense<0.000000e+00> : vector<4x256xf32>
    %166 = tpu.matmul %165, %121, %cst_63 {dimension_numbers = #tpu.dot_dimension_numbers<[1], [0], [0], [1], [0, 0, 1, 1], [], []>, precision = #tpu.contract_precision<fp32>} : vector<4x4xf32>, vector<4x256xf32>, vector<4x256xf32> -> vector<4x256xf32>
    %167 = arith.addf %163, %166 : vector<4x256xf32>
    %168 = vector.extract_strided_slice %121 {offsets = [0, 1], sizes = [4, 255], strides = [1, 1]} : vector<4x256xf32> to vector<4x255xf32>
    %cst_64 = arith.constant 0.000000e+00 : f32
    %169 = vector.broadcast %cst_64 : f32 to vector<4x1xf32>
    %170 = tpu.concatenate %168, %169 in 1 : vector<4x255xf32>, vector<4x1xf32> -> vector<4x256xf32>
    %171 = vector.extract_strided_slice %2 {offsets = [1, 0], sizes = [1, 256], strides = [1, 1]} : vector<2x256xf32> to vector<1x256xf32>
    %172 = vector.broadcast %171 : vector<1x256xf32> to vector<4x256xf32>
    %173 = arith.mulf %170, %172 : vector<4x256xf32>
    %174 = vector.extract_strided_slice %123 {offsets = [5, 0, 0], sizes = [1, 4, 4], strides = [1, 1, 1]} : vector<9x4x4xf32> to vector<1x4x4xf32>
    %175 = vector.shape_cast %174 : vector<1x4x4xf32> to vector<4x4xf32>
    %cst_65 = arith.constant dense<0.000000e+00> : vector<4x256xf32>
    %176 = tpu.matmul %175, %173, %cst_65 {dimension_numbers = #tpu.dot_dimension_numbers<[1], [0], [0], [1], [0, 0, 1, 1], [], []>, precision = #tpu.contract_precision<fp32>} : vector<4x4xf32>, vector<4x256xf32>, vector<4x256xf32> -> vector<4x256xf32>
    %177 = arith.addf %167, %176 : vector<4x256xf32>
    %178 = vector.extract_strided_slice %121 {offsets = [0, 15], sizes = [4, 241], strides = [1, 1]} : vector<4x256xf32> to vector<4x241xf32>
    %cst_66 = arith.constant 0.000000e+00 : f32
    %179 = vector.broadcast %cst_66 : f32 to vector<4x15xf32>
    %180 = tpu.concatenate %178, %179 in 1 : vector<4x241xf32>, vector<4x15xf32> -> vector<4x256xf32>
    %181 = vector.extract_strided_slice %2 {offsets = [0, 0], sizes = [1, 256], strides = [1, 1]} : vector<2x256xf32> to vector<1x256xf32>
    %182 = vector.broadcast %181 : vector<1x256xf32> to vector<4x256xf32>
    %183 = arith.mulf %180, %182 : vector<4x256xf32>
    %184 = vector.extract_strided_slice %123 {offsets = [6, 0, 0], sizes = [1, 4, 4], strides = [1, 1, 1]} : vector<9x4x4xf32> to vector<1x4x4xf32>
    %185 = vector.shape_cast %184 : vector<1x4x4xf32> to vector<4x4xf32>
    %cst_67 = arith.constant dense<0.000000e+00> : vector<4x256xf32>
    %186 = tpu.matmul %185, %183, %cst_67 {dimension_numbers = #tpu.dot_dimension_numbers<[1], [0], [0], [1], [0, 0, 1, 1], [], []>, precision = #tpu.contract_precision<fp32>} : vector<4x4xf32>, vector<4x256xf32>, vector<4x256xf32> -> vector<4x256xf32>
    %187 = arith.addf %177, %186 : vector<4x256xf32>
    %188 = vector.extract_strided_slice %121 {offsets = [0, 16], sizes = [4, 240], strides = [1, 1]} : vector<4x256xf32> to vector<4x240xf32>
    %cst_68 = arith.constant 0.000000e+00 : f32
    %189 = vector.broadcast %cst_68 : f32 to vector<4x16xf32>
    %190 = tpu.concatenate %188, %189 in 1 : vector<4x240xf32>, vector<4x16xf32> -> vector<4x256xf32>
    %191 = vector.extract_strided_slice %123 {offsets = [7, 0, 0], sizes = [1, 4, 4], strides = [1, 1, 1]} : vector<9x4x4xf32> to vector<1x4x4xf32>
    %192 = vector.shape_cast %191 : vector<1x4x4xf32> to vector<4x4xf32>
    %cst_69 = arith.constant dense<0.000000e+00> : vector<4x256xf32>
    %193 = tpu.matmul %192, %190, %cst_69 {dimension_numbers = #tpu.dot_dimension_numbers<[1], [0], [0], [1], [0, 0, 1, 1], [], []>, precision = #tpu.contract_precision<fp32>} : vector<4x4xf32>, vector<4x256xf32>, vector<4x256xf32> -> vector<4x256xf32>
    %194 = arith.addf %187, %193 : vector<4x256xf32>
    %195 = vector.extract_strided_slice %121 {offsets = [0, 17], sizes = [4, 239], strides = [1, 1]} : vector<4x256xf32> to vector<4x239xf32>
    %cst_70 = arith.constant 0.000000e+00 : f32
    %196 = vector.broadcast %cst_70 : f32 to vector<4x17xf32>
    %197 = tpu.concatenate %195, %196 in 1 : vector<4x239xf32>, vector<4x17xf32> -> vector<4x256xf32>
    %198 = vector.extract_strided_slice %2 {offsets = [1, 0], sizes = [1, 256], strides = [1, 1]} : vector<2x256xf32> to vector<1x256xf32>
    %199 = vector.broadcast %198 : vector<1x256xf32> to vector<4x256xf32>
    %200 = arith.mulf %197, %199 : vector<4x256xf32>
    %201 = vector.extract_strided_slice %123 {offsets = [8, 0, 0], sizes = [1, 4, 4], strides = [1, 1, 1]} : vector<9x4x4xf32> to vector<1x4x4xf32>
    %202 = vector.shape_cast %201 : vector<1x4x4xf32> to vector<4x4xf32>
    %cst_71 = arith.constant dense<0.000000e+00> : vector<4x256xf32>
    %203 = tpu.matmul %202, %200, %cst_71 {dimension_numbers = #tpu.dot_dimension_numbers<[1], [0], [0], [1], [0, 0, 1, 1], [], []>, precision = #tpu.contract_precision<fp32>} : vector<4x4xf32>, vector<4x256xf32>, vector<4x256xf32> -> vector<4x256xf32>
    %204 = arith.addf %194, %203 : vector<4x256xf32>
    %205 = vector.broadcast %125 : vector<4x1xf32> to vector<4x256xf32>
    %206 = arith.addf %204, %205 : vector<4x256xf32>
    %cst_72 = arith.constant 0.000000e+00 : f32
    %207 = vector.broadcast %cst_72 : f32 to vector<4x256xf32>
    %208 = arith.subf %207, %206 : vector<4x256xf32>
    %209 = math.exp %208 : vector<4x256xf32>
    %cst_73 = arith.constant 1.000000e+00 : f32
    %210 = vector.broadcast %cst_73 : f32 to vector<4x256xf32>
    %211 = arith.addf %210, %209 : vector<4x256xf32>
    %cst_74 = arith.constant 1.000000e+00 : f32
    %212 = vector.broadcast %cst_74 : f32 to vector<4x256xf32>
    %213 = arith.divf %212, %211 : vector<4x256xf32>
    %214 = arith.mulf %206, %213 : vector<4x256xf32>
    %215 = arith.addf %15, %214 : vector<4x256xf32>
    %c0_75 = arith.constant 0 : index
    %c0_76 = arith.constant 0 : index
    %216 = vector.load %arg11[%c0_75, %c0_76] : memref<8x4xf32, #tpu.memory_space<vmem>>, vector<8x4xf32>
    %cst_77 = arith.constant dense<0.000000e+00> : vector<8x256xf32>
    %217 = tpu.matmul %216, %215, %cst_77 {dimension_numbers = #tpu.dot_dimension_numbers<[1], [0], [0], [1], [0, 0, 1, 1], [], []>, precision = #tpu.contract_precision<fp32>} : vector<8x4xf32>, vector<4x256xf32>, vector<8x256xf32> -> vector<8x256xf32>
    %c0_78 = arith.constant 0 : index
    %c0_79 = arith.constant 0 : index
    %218 = vector.load %arg12[%c0_78, %c0_79] : memref<8x4xf32, #tpu.memory_space<vmem>>, vector<8x4xf32>
    %cst_80 = arith.constant dense<0.000000e+00> : vector<8x256xf32>
    %219 = tpu.matmul %218, %28, %cst_80 {dimension_numbers = #tpu.dot_dimension_numbers<[1], [0], [0], [1], [0, 0, 1, 1], [], []>, precision = #tpu.contract_precision<fp32>} : vector<8x4xf32>, vector<4x256xf32>, vector<8x256xf32> -> vector<8x256xf32>
    %220 = arith.addf %217, %219 : vector<8x256xf32>
    %c0_81 = arith.constant 0 : index
    %c0_82 = arith.constant 0 : index
    %221 = vector.load %arg13[%c0_81, %c0_82] : memref<8x1xf32, #tpu.memory_space<vmem>>, vector<8x1xf32>
    %222 = vector.broadcast %221 : vector<8x1xf32> to vector<8x256xf32>
    %223 = arith.addf %220, %222 : vector<8x256xf32>
    %cst_83 = arith.constant 0.000000e+00 : f32
    %224 = vector.broadcast %cst_83 : f32 to vector<8x256xf32>
    %225 = arith.subf %224, %223 : vector<8x256xf32>
    %226 = math.exp %225 : vector<8x256xf32>
    %cst_84 = arith.constant 1.000000e+00 : f32
    %227 = vector.broadcast %cst_84 : f32 to vector<8x256xf32>
    %228 = arith.addf %227, %226 : vector<8x256xf32>
    %cst_85 = arith.constant 1.000000e+00 : f32
    %229 = vector.broadcast %cst_85 : f32 to vector<8x256xf32>
    %230 = arith.divf %229, %228 : vector<8x256xf32>
    %231 = arith.mulf %223, %230 : vector<8x256xf32>
    %c0_86 = arith.constant 0 : index
    %c0_87 = arith.constant 0 : index
    %c0_88 = arith.constant 0 : index
    %232 = vector.load %arg14[%c0_86, %c0_87, %c0_88] : memref<1x8x256xf32, #tpu.memory_space<vmem>>, vector<1x8x256xf32>
    %233 = vector.shape_cast %232 : vector<1x8x256xf32> to vector<8x256xf32>
    %234 = vector.shape_cast %231 : vector<8x256xf32> to vector<1x8x256xf32>
    tpu.vector_store %arg14[%c0_86, %c0_87, %c0_88], %234 {strides = array<i32>} : memref<1x8x256xf32, #tpu.memory_space<vmem>>, vector<1x8x256xf32>,
    return
  }
  func.func @transform_0(%arg0: i32) -> (i32, i32, i32) {
    %c0_i32 = arith.constant 0 : i32
    %c0_i32_0 = arith.constant 0 : i32
    %c0_i32_1 = arith.constant 0 : i32
    return %arg0, %c0_i32, %c0_i32_0 : i32, i32, i32
  }
  func.func @transform_1(%arg0: i32) -> (i32, i32) {
    %c0_i32 = arith.constant 0 : i32
    %c0_i32_0 = arith.constant 0 : i32
    %c0_i32_1 = arith.constant 0 : i32
    return %c0_i32, %c0_i32_0 : i32, i32
  }
  func.func @transform_2(%arg0: i32) -> (i32, i32) {
    %c0_i32 = arith.constant 0 : i32
    %c0_i32_0 = arith.constant 0 : i32
    %c0_i32_1 = arith.constant 0 : i32
    return %c0_i32, %c0_i32_0 : i32, i32
  }
  func.func @transform_3(%arg0: i32) -> (i32, i32) {
    %c0_i32 = arith.constant 0 : i32
    %c0_i32_0 = arith.constant 0 : i32
    %c0_i32_1 = arith.constant 0 : i32
    return %c0_i32, %c0_i32_0 : i32, i32
  }
  func.func @transform_4(%arg0: i32) -> (i32, i32) {
    %c0_i32 = arith.constant 0 : i32
    %c0_i32_0 = arith.constant 0 : i32
    %c0_i32_1 = arith.constant 0 : i32
    return %c0_i32, %c0_i32_0 : i32, i32
  }
  func.func @transform_5(%arg0: i32) -> (i32, i32) {
    %c0_i32 = arith.constant 0 : i32
    %c0_i32_0 = arith.constant 0 : i32
    %c0_i32_1 = arith.constant 0 : i32
    return %c0_i32, %c0_i32_0 : i32, i32
  }
  func.func @transform_6(%arg0: i32) -> (i32, i32, i32, i32) {
    %c0_i32 = arith.constant 0 : i32
    %c0_i32_0 = arith.constant 0 : i32
    %c0_i32_1 = arith.constant 0 : i32
    %c0_i32_2 = arith.constant 0 : i32
    %c0_i32_3 = arith.constant 0 : i32
    return %c0_i32, %c0_i32_0, %c0_i32_1, %c0_i32_2 : i32, i32, i32, i32
  }
  func.func @transform_7(%arg0: i32) -> (i32, i32, i32) {
    %c0_i32 = arith.constant 0 : i32
    %c0_i32_0 = arith.constant 0 : i32
    %c0_i32_1 = arith.constant 0 : i32
    %c0_i32_2 = arith.constant 0 : i32
    return %c0_i32, %c0_i32_0, %c0_i32_1 : i32, i32, i32
  }
  func.func @transform_8(%arg0: i32) -> (i32, i32, i32, i32) {
    %c0_i32 = arith.constant 0 : i32
    %c0_i32_0 = arith.constant 0 : i32
    %c0_i32_1 = arith.constant 0 : i32
    %c0_i32_2 = arith.constant 0 : i32
    %c0_i32_3 = arith.constant 0 : i32
    return %c0_i32, %c0_i32_0, %c0_i32_1, %c0_i32_2 : i32, i32, i32, i32
  }
  func.func @transform_9(%arg0: i32) -> (i32, i32, i32) {
    %c0_i32 = arith.constant 0 : i32
    %c0_i32_0 = arith.constant 0 : i32
    %c0_i32_1 = arith.constant 0 : i32
    %c0_i32_2 = arith.constant 0 : i32
    return %c0_i32, %c0_i32_0, %c0_i32_1 : i32, i32, i32
  }
  func.func @transform_10(%arg0: i32) -> (i32, i32) {
    %c0_i32 = arith.constant 0 : i32
    %c0_i32_0 = arith.constant 0 : i32
    %c0_i32_1 = arith.constant 0 : i32
    return %c0_i32, %c0_i32_0 : i32, i32
  }
  func.func @transform_11(%arg0: i32) -> (i32, i32) {
    %c0_i32 = arith.constant 0 : i32
    %c0_i32_0 = arith.constant 0 : i32
    %c0_i32_1 = arith.constant 0 : i32
    return %c0_i32, %c0_i32_0 : i32, i32
  }
  func.func @transform_12(%arg0: i32) -> (i32, i32) {
    %c0_i32 = arith.constant 0 : i32
    %c0_i32_0 = arith.constant 0 : i32
    %c0_i32_1 = arith.constant 0 : i32
    return %c0_i32, %c0_i32_0 : i32, i32
  }
  func.func @transform_13(%arg0: i32) -> (i32, i32, i32) {
    %c0_i32 = arith.constant 0 : i32
    %c0_i32_0 = arith.constant 0 : i32
    %c0_i32_1 = arith.constant 0 : i32
    return %arg0, %c0_i32, %c0_i32_0 : i32, i32, i32
  }
}

</mosaic_0001>

<bundles_post_ra>
// kernel: tpu_custom_call.1
= control target key start
LH: loop header
LB: loop body
LE: loop exit
PB: predicated region body
PF: predicated region fallthrough
CT: control target
= control target key end

     0   :  { %s12797_s0 = inlined_call_operand.vmem [shape: f32[2,4,256], index: 0, kind: input, shape index: {}]   ;;  %s12798_s1 = inlined_call_operand.vmem [shape: f32[2,256], index: 1, kind: input, shape index: {}]   ;;  %s12799_s2 = inlined_call_operand.vmem [shape: f32[4,4], index: 2, kind: input, shape index: {}]   ;;  %s12800_s3 = inlined_call_operand.vmem [shape: f32[4,1], index: 3, kind: input, shape index: {}]   ;;  %s12801_s4 = inlined_call_operand.vmem [shape: f32[4,4], index: 4, kind: input, shape index: {}]   ;;  %s12802_s5 = inlined_call_operand.vmem [shape: f32[4,1], index: 5, kind: input, shape index: {}]   ;;  %s12803_s6 = inlined_call_operand.vmem [shape: f32[1,9,4,4], index: 6, kind: input, shape index: {}]   ;;  %s12804_s7 = inlined_call_operand.vmem [shape: f32[1,4,1], index: 7, kind: input, shape index: {}]   ;;  %s12805_s8 = inlined_call_operand.vmem [shape: f32[1,9,4,4], index: 8, kind: input, shape index: {}]   ;;  %s12806_s9 = inlined_call_operand.vmem [shape: f32[1,4,1], index: 9, kind: input, shape index: {}]   ;;  %s12807_s10 = inlined_call_operand.vmem [shape: f32[8,4], index: 10, kind: input, shape index: {}]   ;;  %s12808_s11 = inlined_call_operand.vmem [shape: f32[8,4], index: 11, kind: input, shape index: {}]   ;;  %s12809_s12 = inlined_call_operand.vmem [shape: f32[8,1], index: 12, kind: input, shape index: {}]   ;;  %s12810_s13 = inlined_call_operand.hbm [shape: f32[2,8,256], index: 13, kind: output, shape index: {}]  }
   0x1   :  { %12836 = sst [smem:[#allocation32_spill]] %s12797_s0 }
   0x2   :  { %12837 = sst [smem:[#allocation33_spill]] %s12798_s1 }
   0x3   :  { %12838 = sst [smem:[#allocation34_spill]] %s12799_s2 }
   0x4   :  { %12839 = sst [smem:[#allocation35_spill]] %s12800_s3 }
   0x5   :  { %18 = vsyncpa [#allocation3], 0 }
   0x6   :  { %20 = vsyncpa [#allocation3 + $0x1], 0  ;;  %s11537_s25 = smov 0   ;;  %s11539_s26 = smov 0  }
   0x7   :  { %s11541_s27 = smov 0   ;;  %s11543_s28 = smov 0  }
   0x8 LB: > { %s11558_s29 = sadd.s32 4294967295, %s11454_s28   ;;  %s11288_s30 = sadd.s32 4294967294, %s11454_s28   ;;  %s11454_s28 = sphi %s11543_s28, %s12923_s28   ;;  %s11450_s27 = sphi %s11541_s27, %s12922_s27   ;;  %s11446_s26 = sphi %s11539_s26, %s12921_s26   ;;  %s11442_s25 = sphi %s11537_s25, %s12920_s25  }
   0x9   : > { %s11562_s14 = sadd.s32 1, %s11454_s28   ;;  %s311_s15 = sadd.s32 1, %s11450_s27 }
   0xa   : > { %s308_s16 = ssub.s32 %s11454_s28, %s11562_s14  ;;  %p321_p0 = scmp.ne.s32.totalorder %s11450_s27, %s11446_s26 }
   0xb   : > { %p309_p1 = scmp.eq.s32.totalorder %s308_s16, 0  ;;  %p322_p2 = scmp.eq.s32.totalorder %s11558_s29, 1 }
   0xc   : > { %p327_p3 = scmp.ne.s32.totalorder %s11446_s26, %s11442_s25  ;;  %p328_p4 = scmp.eq.s32.totalorder %s11288_s30, 1 }
   0xd   : > { %s11573_s17 = scalar_select %p309_p1, %s11450_s27, %s311_s15  }
   0xe   : > { %p11575_p5 = por %p322_p2, %p321_p0  ;;  %p11579_p6 = por %p328_p4, %p327_p3 }
   0xf   : > { %p11291_p7 = scmp.ge.s32.totalorder %s11454_s28, 1  ;;  %p390_p8 = scmp.lt.s32.totalorder %s11454_s28, 3 }
  0x11   : > { %p391_p9 = pnand %p11291_p7, %p390_p8 }
  0x13   : > { %394 = sbr.rel (%p391_p9) target bundleno = 1503 (0x5df), region = 72 }
  0x18   : > { %p434_p10 = scmp.lt.s32.totalorder %s11558_s29, 1  ;;  %s12842_s2 = sld [smem:[#allocation34_spill]]  ;;  %vm450_vm0 = vcmask 31744   ;;  %v12823_v1 = vmov 0.0   ;;  %v11457_v5 = vmov 0   ;;  %vm454_vm1 = vcmask 1043456  }
  0x19   : > { %525 = vmatprep.mubr.f32.mxu0 %v12823_v1  ;;  %611 = vmatprep.mubr.f32.mxu1 %v12823_v1  ;;  %s12843_s3 = sld [smem:[#allocation35_spill]]  ;;  %v938_v24 = vld [vmem:[%s12801_s4] sm:$0xf]  ;;  %s11458_s23 = smov 16   ;;  %vm1473_vm2 = vcmask 130048   ;;  %vm1443_vm3 = vcmask 138240  }
  0x1a   : > { %s435_s24 = scalar_select %p434_p10, %s11558_s29, 1  ;;  %11351 = vset.pattern.permute.xlu0 %v11457_v5  ;;  %11352 = vset.pattern.permute.xlu1 %v11457_v5  ;;  %v946_v25 = vsel %vm450_vm0, %v938_v24, 0  ;;  %v1428_v5 = vld [vmem:[%s12803_s6 + $0x4] sm:$0xf]  ;;  %vm2428_vm4 = vcmask 121856   ;;  %vm2933_vm5 = vcmask 7168  }
  0x1b   : > { %s12844_s0 = sld [smem:[#allocation32_spill]]  ;;  %v1015_v26 = vand.u32 4294901760, %v946_v25  ;;  %s12813_s15 = smov 1   ;;  %vm3894_vm6 = vcmask 1039360   ;;  %vm4381_vm7 = vcmask 924672   ;;  %vm4868_vm8 = vcmask 916480  }
  0x1c   : > { %s11300_s30 = sshll.u32 %s435_s24, 3  ;;  %s11459_s24 = smov 17   ;;  %vm5351_vm9 = vcmask 908288  }
  0x1d   : > { %v1016_v27 = vsub.f32 %v946_v25, %v1015_v26  ;;  %s12811_s16 = smov 127   ;;  %s12815_s21 = smov 112  }
  0x1e   : > { %v441_v0 = vld [vmem:[%s12842_s2] sm:$0xf]  ;;  %s12821_s22 = smov 111   ;;  %s12847_s1 = sld [smem:[#allocation33_spill]] }
  0x1f   : > { %v452_v2 = vsel %vm450_vm0, %v441_v0, 0  ;;  %v442_v3 = vld [vmem:[%s12843_s3] sm:$0xf]  ;;  %v1017_v28 = vand.u32 4294901760, %v1016_v27  ;;  %s11466_s2 = smov [#allocation2]  }
  0x20   : > { %v526_v4 = vand.u32 4294901760, %v452_v2  ;;  %445 = vperm.xlu0 %11351, %v442_v3  }
  0x21   : > { %s438_s20 = scalar_lea.vmem %s12844_s0, %s11300_s30  ;;  %v1018_v29 = vsub.f32 %v1016_v27, %v1017_v28  ;;  %s12819_s30 = smov 15  }
  0x22   : > { %v527_v6 = vsub.f32 %v452_v2, %v526_v4  ;;  %v439_v7 = vld [vmem:[%s438_s20] sm:$0xff]  ;;  %s12817_s20 = smov 113   ;;  %s431_s0 = sand.u32 1, %s11446_s26  }
  0x23   : > { %v449_v9 = vcombine.high %v439_v7, %v439_v7  ;;  %v455_v10 = vsel %vm454_vm1, %v439_v7, 0  ;;  %v1019_v30 = vand.u32 4294901760, %v1018_v29  ;;  %v1449_v7 = vlaneseq }
  0x24   : > { %v528_v8 = vand.u32 4294901760, %v527_v6  ;;  %v491_v11 = vand.u32 4294901760, %v455_v10 }
  0x25   : > { %v457_v13 = vsel %vm454_vm1, %v449_v9, 0  ;;  %v1450_v9 = vshrl.u32 %v1449_v7, 7 }
  0x26   : > { %v529_v12 = vsub.f32 %v527_v6, %v528_v8  ;;  %v489_v14 = vand.u32 4294901760, %v457_v13  ;;  %v574_v16 = vsub.f32 %v455_v10, %v491_v11 }
  0x27   : > { %v2435_v24 = vsub.s32 1, %v1450_v9 }
  0x28   : > { %v530_v15 = vand.u32 4294901760, %v529_v12  ;;  %490 = vmatprep.subr.mxu0 %v489_v14  ;;  %v568_v17 = vsub.f32 %v457_v13, %v489_v14  ;;  %v575_v18 = vand.u32 4294901760, %v574_v16  ;;  %v1451_v12 = vsub.s32 0, %v1450_v9  ;;  %v1427_v13 = vld [vmem:[%s12803_s6] sm:$0xf] }
  0x29   : > { %492 = vmatpush1.msra.mxu0 %v491_v11 }
  0x2a   : > { %531 = vmatmul.mubr.f32.vlgmr.msra.gmra.mxu0 %v530_v15  ;;  %v569_v19 = vand.u32 4294901760, %v568_v17  ;;  %651 = vmatprep.subr.mxu0 %v568_v17  ;;  %v576_v20 = vsub.f32 %v574_v16, %v575_v18  ;;  %v1455_v15 = vsub.s32 2, %v1450_v9 }
  0x2b   : > { %654 = vmatpush1.msra.mxu0 %v574_v16  ;;  %687 = vmatprep.mubr.f32.mxu0 %v12823_v1 }
  0x2c   : > { %v570_v21 = vsub.f32 %v568_v17, %v569_v19  ;;  %805 = vmatprep.subr.mxu0 %v569_v19  ;;  %v577_v22 = vand.u32 4294901760, %v576_v20 }
  0x2e   : > { %v571_v23 = vand.u32 4294901760, %v570_v21  ;;  %690 = vmatmul.mubr.f32.vlgmr.msra.gmra.mxu0 %v527_v6  ;;  %v1478_v6 = vsel %vm450_vm0, %v1428_v5, 0 }
  0x2f   : > { %809 = vmatpush1.msra.mxu0 %v575_v18  ;;  %842 = vmatprep.mubr.f32.mxu0 %v12823_v1 }
  0x30   : > { %572 = vmatprep.subr.mxu1 %v571_v23  ;;  %979 = vmatprep.subr.mxu0 %v489_v14 }
  0x31   : > { %578 = vmatpush1.msra.mxu1 %v577_v22 }
  0x32   : > { %613 = vmatmul.mubr.f32.vlgmr.msra.gmra.mxu1 %v526_v4  ;;  %727 = vmatprep.subr.mxu1 %v489_v14 }
  0x33   : > { %729 = vmatpush1.msra.mxu1 %v491_v11  ;;  %762 = vmatprep.mubr.f32.mxu1 %v12823_v1 }
  0x34   : > { %844 = vmatmul.mubr.f32.vlgmr.msra.gmra.mxu0 %v526_v4  ;;  %881 = vmatprep.subr.mxu1 %v489_v14 }
  0x35   : > { %981 = vmatpush1.msra.mxu0 %v491_v11  ;;  %1014 = vmatprep.mubr.f32.mxu0 %v12823_v1 }
  0x36   : > { %766 = vmatmul.mubr.f32.vlgmr.msra.gmra.mxu1 %v528_v8  ;;  %1140 = vmatprep.subr.mxu0 %v568_v17  ;;  %v11657_v8 = vand.u32 4294901760, %v1478_v6  ;;  %v1951_v17 = vsel %vm450_vm0, %v1427_v13, 0 }
  0x37   : > { %883 = vmatpush1.msra.mxu1 %v491_v11  ;;  %916 = vmatprep.mubr.f32.mxu1 %v12823_v1  ;;  %v11677_v25 = vand.u32 4294901760, %v1951_v17 }
  0x38   : > { %1061 = vmatprep.subr.mxu1 %v571_v23  ;;  %1020 = vmatmul.mubr.f32.vlgmr.msra.gmra.mxu0 %v1019_v30  ;;  %v11660_v10 = vsub.f32 %v1478_v6, %v11657_v8 }
  0x39   : > { %1143 = vmatpush1.msra.mxu0 %v574_v16  ;;  %1176 = vmatprep.mubr.f32.mxu0 %v12823_v1 }
  0x3a   : > { %918 = vmatmul.mubr.f32.vlgmr.msra.gmra.mxu1 %v526_v4  ;;  %1294 = vmatprep.subr.mxu0 %v569_v19  ;;  %v1554_v16 = vand.u32 4294901760, %v11660_v10 }
  0x3b   : > { %1067 = vmatpush1.msra.mxu1 %v577_v22  ;;  %1100 = vmatprep.mubr.f32.mxu1 %v12823_v1  ;;  %v2439_v22 = vsub.s32 3, %v1450_v9 }
  0x3c   : > { %1216 = vmatprep.subr.mxu1 %v489_v14  ;;  %1179 = vmatmul.mubr.f32.vlgmr.msra.gmra.mxu0 %v1016_v27  ;;  %v1555_v21 = vsub.f32 %v11660_v10, %v1554_v16 }
  0x3d   : > { %1298 = vmatpush1.msra.mxu0 %v575_v18  ;;  %1331 = vmatprep.mubr.f32.mxu0 %v12823_v1 }
  0x3e   : > { %1102 = vmatmul.mubr.f32.vlgmr.msra.gmra.mxu1 %v1015_v26 }
  0x3f   : > { %1218 = vmatpush1.msra.mxu1 %v491_v11  ;;  %1251 = vmatprep.mubr.f32.mxu1 %v12823_v1 }
  0x40   : > { %1370 = vmatprep.subr.mxu1 %v489_v14  ;;  %1333 = vmatmul.mubr.f32.vlgmr.msra.gmra.mxu0 %v1015_v26  ;;  %v440_v14 = vld [vmem:[%s12847_s1] sm:$0xf] }
  0x41   : > { %1551 = vmatprep.mubr.f32.mxu0 %v12823_v1  ;;  %v1452_v18 = vrot.slane %v440_v14, %v1451_v12  ;;  %v1456_v20 = vrot.slane %v440_v14, %v1455_v15 }
  0x42   : > { %1255 = vmatmul.mubr.f32.vlgmr.msra.gmra.mxu1 %v1017_v28 }
  0x43   : > { %1372 = vmatpush1.msra.mxu1 %v491_v11  ;;  %1405 = vmatprep.mubr.f32.mxu1 %v12823_v1  ;;  %v1436_v11 = vld [vmem:[%s12804_s7] sm:$0xf]  ;;  %v11683_v30 = vrot.slane %v1452_v18, %v1451_v12 }
  0x45   : > { %12848 = vst [vmem:[#allocation7_spill] sm:$0xff] %v11683_v30 }
  0x46   : > { %1407 = vmatmul.mubr.f32.vlgmr.msra.gmra.mxu1 %v1015_v26 }
  0x47   : > { %1637 = vmatprep.mubr.f32.mxu1 %v12823_v1 }
  0x9b   : > { %v446_v32 = vpop.permute.xlu0 %445 }
  0xea   : > { %v532_v31 = vpop.f32.mrf.mxu0 }
  0xeb   : > { %v533_v35 = vadd.f32 %v532_v31, %v446_v32 }
  0xec   : > { %v534_v33 = vpop.f32.mrf.mxu0 }
  0xed   : > { %v535_v38 = vadd.f32 %v534_v33, %v446_v32  ;;  %v11686_v33 = vrot.slane %v1456_v20, %v1451_v12 }
  0xee   : > { %v691_v34 = vpop.f32.mrf.mxu0 }
  0xef   : > { %12849 = vst [vmem:[#allocation8_spill] sm:$0xff] %v11686_v33 }
  0xf0   : > { %v693_v37 = vpop.f32.mrf.mxu0 }
  0xf2   : > { %v614_v36 = vpop.f32.mrf.mxu1 }
  0xf3   : > { %v615_v39 = vadd.f32 %v614_v36, %v533_v35  ;;  %v2440_v35 = vrot.slane %v440_v14, %v2439_v22 }
  0xf4   : > { %v616_v40 = vpop.f32.mrf.mxu1  ;;  %v845_v44 = vpop.f32.mrf.mxu0 }
  0xf5   : > { %v692_v41 = vadd.f32 %v691_v34, %v615_v39  ;;  %v617_v42 = vadd.f32 %v616_v40, %v535_v38  ;;  %v1556_v34 = vand.u32 4294901760, %v1555_v21  ;;  %v2436_v38 = vrot.slane %v440_v14, %v2435_v24 }
  0xf6   : > { %v767_v43 = vpop.f32.mrf.mxu1  ;;  %v847_v50 = vpop.f32.mrf.mxu0  ;;  %v11692_v39 = vsub.f32 %v1951_v17, %v11677_v25 }
  0xf7   : > { %v694_v45 = vadd.f32 %v693_v37, %v617_v42  ;;  %v768_v46 = vadd.f32 %v767_v43, %v692_v41 }
  0xf8   : > { %v769_v47 = vpop.f32.mrf.mxu1 }
  0xf9   : > { %v846_v48 = vadd.f32 %v845_v44, %v768_v46  ;;  %v770_v49 = vadd.f32 %v769_v47, %v694_v45  ;;  %v1429_v45 = vld [vmem:[%s12803_s6 + $0x8] sm:$0xf] }
  0xfa   : > { %v919_v51 = vpop.f32.mrf.mxu1 }
  0xfb   : > { %v848_v52 = vadd.f32 %v847_v50, %v770_v49  ;;  %v920_v53 = vadd.f32 %v919_v51, %v846_v48  ;;  %v11704_v48 = vrot.slane %v2440_v35, %v2435_v24  ;;  %v11706_v49 = vrot.slane %v2436_v38, %v2435_v24 }
  0xfc   : > { %v921_v54 = vpop.f32.mrf.mxu1  ;;  %v2028_v51 = vand.u32 4294901760, %v11692_v39 }
  0xfd   : > { %v924_v55 = vsub.f32 0.0, %v920_v53  ;;  %v922_v56 = vadd.f32 %v921_v54, %v848_v52  ;;  %12850 = vst [vmem:[#allocation9_spill] sm:$0xff] %v11704_v48  ;;  %12851 = vst [vmem:[#allocation10_spill] sm:$0xff] %v11706_v49 }
  0xfe   : > { %v2029_v9 = vsub.f32 %v11692_v39, %v2028_v51 }
  0xff   : > { %v926_v57 = vmul.f32 1.442695, %v924_v55  ;;  %v925_v58 = vsub.f32 0.0, %v922_v56 }
 0x100   : > { %v2030_v20 = vand.u32 4294901760, %v2029_v9 }
 0x101   : > { %11354 = vpow2.f32 %v926_v57  ;;  %v928_v59 = vmul.f32 1.442695, %v925_v58  ;;  %v2454_v57 = vsel %vm450_vm0, %v1429_v45, 0 }
 0x102   : > { %v11723_v5 = vand.u32 4294901760, %v2454_v57 }
 0x103   : > { %11356 = vpow2.f32 %v928_v59 }
 0x104   : > { %v11734_v17 = vsub.f32 %v2454_v57, %v11723_v5 }
 0x10e   : > { %v11355_v60 = vpop.eup %11354 }
 0x10f   : > { %v930_v61 = vadd.f32 1.0, %v11355_v60 }
 0x110   : > { %v11357_v62 = vpop.eup %11356 }
 0x111   : > { %11358 = vrcp.f32 %v930_v61  ;;  %v931_v63 = vadd.f32 1.0, %v11357_v62 }
 0x113   : > { %11360 = vrcp.f32 %v931_v63 }
 0x11e   : > { %v11359_v0 = vpop.eup %11358 }
 0x11f   : > { %v11617_v2 = vmul.f32 %v11359_v0, %v920_v53 }
 0x120   : > { %v11361_v3 = vpop.eup %11360 }
 0x121   : > { %12845 = vst [vmem:[#allocation5_spill] sm:$0xff] %v11617_v2  ;;  %v11619_v4 = vmul.f32 %v11361_v3, %v922_v56  ;;  %1469 = vrot.lane.b32.xlu0 %v11617_v2, %s11458_s23 }
 0x123   : > { %12846 = vst [vmem:[#allocation6_spill] sm:$0xff] %v11619_v4  ;;  %1471 = vrot.lane.b32.xlu1 %v11619_v4, %s11458_s23 }
 0x125   : > { %1441 = vrot.lane.b32.xlu0 %v11619_v4, %s11459_s24 }
 0x127   : > { %1439 = vrot.lane.b32.xlu1 %v11617_v2, %s11459_s24 }
 0x129   : > { %2426 = vrot.lane.b32.xlu0 %v11619_v4, %s12819_s30 }
 0x12b   : > { %2424 = vrot.lane.b32.xlu1 %v11617_v2, %s12819_s30  ;;  %s11215_s30 = scalar_lea.sflag [#allocation3], %s431_s0 }
 0x12d   : > { %2931 = vrot.lane.b32.xlu0 %v11619_v4, %s12813_s15 }
 0x12f   : > { %2929 = vrot.lane.b32.xlu1 %v11617_v2, %s12813_s15  ;;  %s12884_s15 = smov 127  }
 0x131   : > { %3890 = vrot.lane.b32.xlu0 %v11617_v2, %s12811_s16 }
 0x133   : > { %3892 = vrot.lane.b32.xlu1 %v11619_v4, %s12811_s16  ;;  %s12887_s16 = smov 111  }
 0x135   : > { %4377 = vrot.lane.b32.xlu0 %v11617_v2, %s12817_s20 }
 0x137   : > { %4379 = vrot.lane.b32.xlu1 %v11619_v4, %s12817_s20  ;;  %s11292_s20 = sshll.u32 %s431_s0, 4 }
 0x139   : > { %4864 = vrot.lane.b32.xlu0 %v11617_v2, %s12815_s21 }
 0x13b   : > { %4866 = vrot.lane.b32.xlu1 %v11619_v4, %s12815_s21  ;;  %s12882_s21 = smov 15  }
 0x13d   : > { %5347 = vrot.lane.b32.xlu0 %v11617_v2, %s12821_s22 }
 0x13f   : > { %5349 = vrot.lane.b32.xlu1 %v11619_v4, %s12821_s22  ;;  %s12883_s22 = smov 1  }
 0x143   : > { %5836 = vperm.xlu1 %11352, %v1436_v11  }
 0x193   : > { %v1470_v19 = vpop.permute.xlu0 %1469 }
 0x194   : > { %v1476_v23 = vsel %vm1473_vm2, 0.0, %v1470_v19 }
 0x195   : > { %v1481_v26 = vsel %vm454_vm1, %v1476_v23, 0  ;;  %v1472_v27 = vpop.permute.xlu1 %1471 }
 0x196   : > { %v11680_v28 = vand.u32 4294901760, %v1481_v26  ;;  %v1474_v29 = vsel %vm1473_vm2, %v1470_v19, %v1472_v27 }
 0x197   : > { %v1483_v31 = vsel %vm454_vm1, %v1474_v29, 0  ;;  %v1442_v32 = vpop.permute.xlu0 %1441 }
 0x198   : > { %v1600_v36 = vsub.f32 %v1481_v26, %v11680_v28  ;;  %v11689_v37 = vand.u32 4294901760, %v1483_v31  ;;  %v1430_v26 = vld [vmem:[%s12803_s6 + $0xc] sm:$0xf] }
 0x199   : > { %v1440_v40 = vpop.permute.xlu1 %1439 }
 0x19a   : > { %v1594_v41 = vsub.f32 %v1483_v31, %v11689_v37  ;;  %v1444_v42 = vsel %vm1443_vm3, %v1440_v40, %v1442_v32  ;;  %v1447_v43 = vsel %vm1443_vm3, 0.0, %v1440_v40  ;;  %1516 = vmatprep.subr.mxu0 %v11689_v37  ;;  %v1601_v44 = vand.u32 4294901760, %v1600_v36 }
 0x19b   : > { %v1467_v46 = vmul.f32 %v11683_v30, %v1447_v43  ;;  %v1468_v47 = vmul.f32 %v11686_v33, %v1444_v42  ;;  %1518 = vmatpush1.msra.mxu0 %v11680_v28  ;;  %v2427_v54 = vpop.permute.xlu0 %2426  ;;  %v2531_v31 = vand.u32 4294901760, %v11734_v17 }
 0x19c   : > { %1557 = vmatmul.mubr.f32.vlgmr.msra.gmra.mxu0 %v1556_v34  ;;  %1677 = vmatprep.subr.mxu0 %v1594_v41  ;;  %v1595_v50 = vand.u32 4294901760, %v1594_v41  ;;  %v1602_v56 = vsub.f32 %v1600_v36, %v1601_v44 }
 0x19d   : > { %v1954_v52 = vsel %vm454_vm1, %v1467_v46, 0  ;;  %v1957_v53 = vsel %vm454_vm1, %v1468_v47, 0  ;;  %v2425_v55 = vpop.permute.xlu1 %2424  ;;  %1680 = vmatpush1.msra.mxu0 %v1600_v36  ;;  %1713 = vmatprep.mubr.f32.mxu0 %v12823_v1  ;;  %v2941_v36 = vsel %vm450_vm0, %v1430_v26, 0  ;;  %v1431_v47 = vld [vmem:[%s12803_s6 + $0x10] sm:$0xf] }
 0x19e   : > { %v11713_v58 = vand.u32 4294901760, %v1957_v53  ;;  %v11715_v59 = vand.u32 4294901760, %v1954_v52  ;;  %v2429_v60 = vsel %vm2428_vm4, %v2425_v55, %v2427_v54  ;;  %v2432_v61 = vsel %vm2428_vm4, 0.0, %v2425_v55  ;;  %1831 = vmatprep.subr.mxu0 %v1595_v50 }
 0x19f   : > { %v2452_v62 = vmul.f32 %v11704_v48, %v2429_v60  ;;  %v1596_v63 = vsub.f32 %v1594_v41, %v1595_v50  ;;  %v2451_v6 = vmul.f32 %v11706_v49, %v2432_v61  ;;  %v1603_v12 = vand.u32 4294901760, %v1602_v56  ;;  %v2932_v22 = vpop.permute.xlu0 %2931 }
 0x1a0   : > { %v2074_v0 = vsub.f32 %v1954_v52, %v11715_v59  ;;  %1716 = vmatmul.mubr.f32.vlgmr.msra.gmra.mxu0 %v11660_v10  ;;  %v2068_v3 = vsub.f32 %v1957_v53, %v11713_v58  ;;  %v11769_v40 = vand.u32 4294901760, %v2941_v36  ;;  %v3417_v56 = vsel %vm450_vm0, %v1431_v47, 0 }
 0x1a1   : > { %1835 = vmatpush1.msra.mxu0 %v1601_v44  ;;  %v1597_v7 = vand.u32 4294901760, %v1596_v63  ;;  %1868 = vmatprep.mubr.f32.mxu0 %v12823_v1  ;;  %v2460_v11 = vsel %vm454_vm1, %v2452_v62, 0  ;;  %v2930_v14 = vpop.permute.xlu1 %2929  ;;  %v2457_v18 = vsel %vm454_vm1, %v2451_v6, 0  ;;  %v3421_v60 = vsel %vm454_vm1, %v11619_v4, 0 }
 0x1a2   : > { %1990 = vmatprep.subr.mxu0 %v11713_v58  ;;  %v2069_v13 = vand.u32 4294901760, %v2068_v3  ;;  %v2075_v15 = vand.u32 4294901760, %v2074_v0  ;;  %v11737_v19 = vand.u32 4294901760, %v2460_v11  ;;  %v2934_v23 = vsel %vm2933_vm5, %v2930_v14, %v2932_v22 }
 0x1a3   : > { %1598 = vmatprep.subr.mxu1 %v1597_v7  ;;  %v11748_v27 = vand.u32 4294901760, %v2457_v18  ;;  %v2937_v34 = vsel %vm2933_vm5, 0.0, %v2930_v14  ;;  %v2939_v35 = vmul.f32 %v2934_v23, %v11686_v33  ;;  %v11782_v46 = vsub.f32 %v2941_v36, %v11769_v40  ;;  %v1432_v7 = vld [vmem:[%s12803_s6 + $0x14] sm:$0xf] }
 0x1a4   : > { %1604 = vmatpush1.msra.mxu1 %v1603_v12  ;;  %1870 = vmatmul.mubr.f32.vlgmr.msra.gmra.mxu0 %v11657_v8  ;;  %v2070_v21 = vsub.f32 %v2068_v3, %v2069_v13  ;;  %v2076_v29 = vsub.f32 %v2074_v0, %v2075_v15  ;;  %v2571_v32 = vsub.f32 %v2460_v11, %v11737_v19  ;;  %v3419_v62 = vsel %vm454_vm1, %v11617_v2, 0 }
 0x1a5   : > { %1639 = vmatmul.mubr.f32.vlgmr.msra.gmra.mxu1 %v11657_v8  ;;  %1753 = vmatprep.subr.mxu1 %v11689_v37  ;;  %v2938_v38 = vmul.f32 %v2937_v34, %v11683_v30  ;;  %v2947_v41 = vsel %vm454_vm1, %v2939_v35, 0  ;;  %v3018_v55 = vand.u32 4294901760, %v11782_v46  ;;  %v11834_v12 = vand.u32 4294901760, %v3419_v62 }
 0x1a6   : > { %1992 = vmatpush1.msra.mxu0 %v11715_v59  ;;  %1755 = vmatpush1.msra.mxu1 %v11680_v28  ;;  %v2071_v24 = vand.u32 4294901760, %v2070_v21  ;;  %v2077_v10 = vand.u32 4294901760, %v2076_v29  ;;  %v11777_v44 = vand.u32 4294901760, %v2947_v41 }
 0x1a7   : > { %2151 = vmatprep.subr.mxu0 %v2068_v3  ;;  %1907 = vmatprep.subr.mxu1 %v11689_v37  ;;  %v2577_v37 = vsub.f32 %v2457_v18, %v11748_v27  ;;  %v11820_v3 = vand.u32 4294901760, %v3421_v60  ;;  %v3538_v22 = vsub.f32 %v3419_v62, %v11834_v12 }
 0x1a8   : > { %1788 = vmatprep.mubr.f32.mxu1 %v12823_v1  ;;  %2025 = vmatprep.mubr.f32.mxu0 %v12823_v1  ;;  %v3058_v54 = vsub.f32 %v2947_v41, %v11777_v44 }
 0x1a9   : > { %1792 = vmatmul.mubr.f32.vlgmr.msra.gmra.mxu1 %v1554_v16  ;;  %2031 = vmatmul.mubr.f32.vlgmr.msra.gmra.mxu0 %v2030_v20  ;;  %v2532_v16 = vsub.f32 %v11734_v17, %v2531_v31  ;;  %v2578_v43 = vand.u32 4294901760, %v2577_v37 }
 0x1aa   : > { %1909 = vmatpush1.msra.mxu1 %v11680_v28  ;;  %2154 = vmatpush1.msra.mxu0 %v2074_v0  ;;  %v2572_v28 = vand.u32 4294901760, %v2571_v32 }
 0x1ab   : > { %2072 = vmatprep.subr.mxu1 %v2071_v24  ;;  %2305 = vmatprep.subr.mxu0 %v2069_v13  ;;  %v2533_v42 = vand.u32 4294901760, %v2532_v16  ;;  %v2579_v52 = vsub.f32 %v2577_v37, %v2578_v43  ;;  %v3891_v13 = vpop.permute.xlu0 %3890  ;;  %v1433_v16 = vld [vmem:[%s12803_s6 + $0x18] sm:$0xf] }
 0x1ac   : > { %1942 = vmatprep.mubr.f32.mxu1 %v12823_v1  ;;  %2187 = vmatprep.mubr.f32.mxu0 %v12823_v1  ;;  %v2573_v45 = vsub.f32 %v2571_v32, %v2572_v28  ;;  %v4389_v47 = vsel %vm450_vm0, %v1433_v16, 0 }
 0x1ad   : > { %1944 = vmatmul.mubr.f32.vlgmr.msra.gmra.mxu1 %v11657_v8  ;;  %2190 = vmatmul.mubr.f32.vlgmr.msra.gmra.mxu0 %v11692_v39  ;;  %v2944_v8 = vsel %vm454_vm1, %v2938_v38, 0  ;;  %v2580_v39 = vand.u32 4294901760, %v2579_v52 }
 0x1ae   : > { %2078 = vmatpush1.msra.mxu1 %v2077_v10  ;;  %2309 = vmatpush1.msra.mxu0 %v2075_v15  ;;  %v11790_v50 = vand.u32 4294901760, %v2944_v8  ;;  %v2574_v53 = vand.u32 4294901760, %v2573_v45  ;;  %v3532_v15 = vsub.f32 %v3421_v60, %v11820_v3 }
 0x1af   : > { %2227 = vmatprep.subr.mxu1 %v11713_v58  ;;  %2493 = vmatprep.subr.mxu0 %v11737_v19 }
 0x1b0   : > { %2111 = vmatprep.mubr.f32.mxu1 %v12823_v1  ;;  %2342 = vmatprep.mubr.f32.mxu0 %v12823_v1  ;;  %v3064_v57 = vsub.f32 %v2944_v8, %v11790_v50 }
 0x1b1   : > { %2113 = vmatmul.mubr.f32.vlgmr.msra.gmra.mxu1 %v11677_v25  ;;  %2344 = vmatmul.mubr.f32.vlgmr.msra.gmra.mxu0 %v11677_v25 }
 0x1b2   : > { %2229 = vmatpush1.msra.mxu1 %v11715_v59  ;;  %2495 = vmatpush1.msra.mxu0 %v11748_v27  ;;  %v3065_v61 = vand.u32 4294901760, %v3064_v57 }
 0x1b3   : > { %2381 = vmatprep.subr.mxu1 %v11713_v58  ;;  %2654 = vmatprep.subr.mxu0 %v2571_v32  ;;  %v3059_v58 = vand.u32 4294901760, %v3058_v54 }
 0x1b4   : > { %2262 = vmatprep.mubr.f32.mxu1 %v12823_v1  ;;  %2528 = vmatprep.mubr.f32.mxu0 %v12823_v1  ;;  %v3066_v11 = vsub.f32 %v3064_v57, %v3065_v61 }
 0x1b5   : > { %2266 = vmatmul.mubr.f32.vlgmr.msra.gmra.mxu1 %v2028_v51  ;;  %2534 = vmatmul.mubr.f32.vlgmr.msra.gmra.mxu0 %v2533_v42  ;;  %v3019_v51 = vsub.f32 %v11782_v46, %v3018_v55  ;;  %v3060_v0 = vsub.f32 %v3058_v54, %v3059_v58  ;;  %v4378_v42 = vpop.permute.xlu0 %4377 }
 0x1b6   : > { %2383 = vmatpush1.msra.mxu1 %v11715_v59  ;;  %2657 = vmatpush1.msra.mxu0 %v2577_v37  ;;  %v11808_v59 = vand.u32 4294901760, %v3417_v56 }
 0x1b7   : > { %2575 = vmatprep.subr.mxu1 %v2574_v53  ;;  %2808 = vmatprep.subr.mxu0 %v2572_v28  ;;  %v3020_v63 = vand.u32 4294901760, %v3019_v51  ;;  %v3061_v14 = vand.u32 4294901760, %v3060_v0 }
 0x1b8   : > { %2416 = vmatprep.mubr.f32.mxu1 %v12823_v1  ;;  %2690 = vmatprep.mubr.f32.mxu0 %v12823_v1  ;;  %v11823_v6 = vsub.f32 %v3417_v56, %v11808_v59 }
 0x1b9   : > { %2418 = vmatmul.mubr.f32.vlgmr.msra.gmra.mxu1 %v11677_v25  ;;  %2693 = vmatmul.mubr.f32.vlgmr.msra.gmra.mxu0 %v11734_v17  ;;  %v3893_v25 = vpop.permute.xlu1 %3892  ;;  %v3067_v17 = vand.u32 4294901760, %v3066_v11 }
 0x1ba   : > { %2581 = vmatpush1.msra.mxu1 %v2580_v39  ;;  %2812 = vmatpush1.msra.mxu0 %v2578_v43  ;;  %v3898_v9 = vsel %vm3894_vm6, %v3893_v25, 0.0  ;;  %v3492_v18 = vand.u32 4294901760, %v11823_v6  ;;  %v3895_v20 = vsel %vm3894_vm6, %v3891_v13, %v3893_v25  ;;  %v1434_v25 = vld [vmem:[%s12803_s6 + $0x1c] sm:$0xf] }
 0x1bb   : > { %2730 = vmatprep.subr.mxu1 %v11737_v19  ;;  %2980 = vmatprep.subr.mxu0 %v11777_v44  ;;  %v3900_v21 = vmul.f32 %v3898_v9, %v11704_v48  ;;  %v3899_v24 = vmul.f32 %v3895_v20, %v11706_v49 }
 0x1bc   : > { %2614 = vmatprep.mubr.f32.mxu1 %v12823_v1  ;;  %2845 = vmatprep.mubr.f32.mxu0 %v12823_v1  ;;  %v3493_v26 = vsub.f32 %v11823_v6, %v3492_v18 }
 0x1bd   : > { %2616 = vmatmul.mubr.f32.vlgmr.msra.gmra.mxu1 %v11723_v5  ;;  %2847 = vmatmul.mubr.f32.vlgmr.msra.gmra.mxu0 %v11723_v5  ;;  %v3908_v29 = vsel %vm454_vm1, %v3900_v21, 0  ;;  %v3905_v34 = vsel %vm454_vm1, %v3899_v24, 0 }
 0x1be   : > { %2732 = vmatpush1.msra.mxu1 %v11748_v27  ;;  %2982 = vmatpush1.msra.mxu0 %v11790_v50  ;;  %v11864_v35 = vand.u32 4294901760, %v3908_v29  ;;  %v3494_v36 = vand.u32 4294901760, %v3493_v26  ;;  %v11875_v38 = vand.u32 4294901760, %v3905_v34 }
 0x1bf   : > { %2884 = vmatprep.subr.mxu1 %v11737_v19  ;;  %3141 = vmatprep.subr.mxu0 %v3058_v54  ;;  %v3902_v19 = vsel %vm450_vm0, %v1432_v7, 0 }
 0x1c0   : > { %2765 = vmatprep.mubr.f32.mxu1 %v12823_v1  ;;  %3015 = vmatprep.mubr.f32.mxu0 %v12823_v1  ;;  %v11847_v23 = vand.u32 4294901760, %v3902_v19  ;;  %v4019_v8 = vsub.f32 %v3908_v29, %v11864_v35  ;;  %v4025_v52 = vsub.f32 %v3905_v34, %v11875_v38 }
 0x1c1   : > { %2769 = vmatmul.mubr.f32.vlgmr.msra.gmra.mxu1 %v2531_v31  ;;  %3021 = vmatmul.mubr.f32.vlgmr.msra.gmra.mxu0 %v3020_v63  ;;  %v4380_v31 = vpop.permute.xlu1 %4379 }
 0x1c2   : > { %2886 = vmatpush1.msra.mxu1 %v11748_v27  ;;  %3144 = vmatpush1.msra.mxu0 %v3064_v57  ;;  %v3533_v27 = vand.u32 4294901760, %v3532_v15  ;;  %v11861_v32 = vsub.f32 %v3902_v19, %v11847_v23  ;;  %v4385_v10 = vsel %vm4381_vm7, %v4380_v31, 0.0  ;;  %v4026_v39 = vand.u32 4294901760, %v4025_v52 }
 0x1c3   : > { %3062 = vmatprep.subr.mxu1 %v3061_v14  ;;  %3295 = vmatprep.subr.mxu0 %v3059_v58  ;;  %v4387_v45 = vmul.f32 %v4385_v10, %v11686_v33 }
 0x1c4   : > { %2919 = vmatprep.mubr.f32.mxu1 %v12823_v1  ;;  %3177 = vmatprep.mubr.f32.mxu0 %v12823_v1  ;;  %v3534_v37 = vsub.f32 %v3532_v15, %v3533_v27  ;;  %v3979_v41 = vand.u32 4294901760, %v11861_v32  ;;  %v4027_v63 = vsub.f32 %v4025_v52, %v4026_v39 }
 0x1c5   : > { %2921 = vmatmul.mubr.f32.vlgmr.msra.gmra.mxu1 %v11723_v5  ;;  %3180 = vmatmul.mubr.f32.vlgmr.msra.gmra.mxu0 %v11782_v46  ;;  %v3539_v5 = vand.u32 4294901760, %v3538_v22  ;;  %v4395_v56 = vsel %vm454_vm1, %v4387_v45, 0  ;;  %v4867_v62 = vpop.permute.xlu1 %4866 }
 0x1c6   : > { %3068 = vmatpush1.msra.mxu1 %v3067_v17  ;;  %3299 = vmatpush1.msra.mxu0 %v3065_v61  ;;  %v3535_v43 = vand.u32 4294901760, %v3534_v37  ;;  %v3980_v53 = vsub.f32 %v11861_v32, %v3979_v41  ;;  %v11904_v51 = vand.u32 4294901760, %v4395_v56  ;;  %v4871_v11 = vsel %vm4868_vm8, %v4867_v62, 0.0 }
 0x1c7   : > { %3217 = vmatprep.subr.mxu1 %v11777_v44  ;;  %3454 = vmatprep.subr.mxu0 %v11820_v3  ;;  %v3540_v28 = vsub.f32 %v3538_v22, %v3539_v5  ;;  %v4878_v20 = vsel %vm454_vm1, %v4871_v11, 0 }
 0x1c8   : > { %3101 = vmatprep.mubr.f32.mxu1 %v12823_v1  ;;  %3332 = vmatprep.mubr.f32.mxu0 %v12823_v1  ;;  %v3981_v57 = vand.u32 4294901760, %v3980_v53  ;;  %v4506_v7 = vsub.f32 %v4395_v56, %v11904_v51  ;;  %v11951_v24 = vand.u32 4294901760, %v4878_v20 }
 0x1c9   : > { %3103 = vmatmul.mubr.f32.vlgmr.msra.gmra.mxu1 %v11769_v40  ;;  %3334 = vmatmul.mubr.f32.vlgmr.msra.gmra.mxu0 %v11769_v40  ;;  %v3541_v46 = vand.u32 4294901760, %v3540_v28  ;;  %v5350_v21 = vpop.permute.xlu1 %5349 }
 0x1ca   : > { %3219 = vmatpush1.msra.mxu1 %v11790_v50  ;;  %3456 = vmatpush1.msra.mxu0 %v11834_v12  ;;  %v5355_v29 = vsel %vm5351_vm9, %v5350_v21, 0.0  ;;  %v4989_v37 = vsub.f32 %v4878_v20, %v11951_v24 }
 0x1cb   : > { %3371 = vmatprep.subr.mxu1 %v11777_v44  ;;  %3615 = vmatprep.subr.mxu0 %v3532_v15  ;;  %v4382_v44 = vsel %vm4381_vm7, %v4378_v42, %v4380_v31  ;;  %v4865_v15 = vpop.permute.xlu0 %4864  ;;  %v1435_v31 = vld [vmem:[%s12803_s6 + $0x20] sm:$0xf]  ;;  %v5357_v28 = vmul.f32 %v5355_v29, %v11704_v48 }
 0x1cc   : > { %3252 = vmatprep.mubr.f32.mxu1 %v12823_v1  ;;  %3489 = vmatprep.mubr.f32.mxu0 %v12823_v1  ;;  %v4386_v54 = vmul.f32 %v4382_v44, %v11683_v30  ;;  %v4869_v19 = vsel %vm4868_vm8, %v4865_v15, %v4867_v62  ;;  %v5359_v42 = vsel %vm450_vm0, %v1435_v31, 0 }
 0x1cd   : > { %3256 = vmatmul.mubr.f32.vlgmr.msra.gmra.mxu1 %v3018_v55  ;;  %3495 = vmatmul.mubr.f32.vlgmr.msra.gmra.mxu0 %v3494_v36  ;;  %v11896_v55 = vand.u32 4294901760, %v4389_v47  ;;  %v11985_v44 = vand.u32 4294901760, %v5359_v42  ;;  %v5365_v45 = vsel %vm454_vm1, %v5357_v28, 0 }
 0x1ce   : > { %3373 = vmatpush1.msra.mxu1 %v11790_v50  ;;  %3618 = vmatpush1.msra.mxu0 %v3538_v22  ;;  %v4020_v50 = vand.u32 4294901760, %v4019_v8  ;;  %v4875_v22 = vsel %vm454_vm1, %v4869_v19, 0 }
 0x1cf   : > { %3536 = vmatprep.subr.mxu1 %v3535_v43  ;;  %3769 = vmatprep.subr.mxu0 %v3533_v27  ;;  %v11909_v60 = vsub.f32 %v4389_v47, %v11896_v55  ;;  %v5348_v10 = vpop.permute.xlu0 %5347 }
 0x1d0   : > { %3406 = vmatprep.mubr.f32.mxu1 %v12823_v1  ;;  %3651 = vmatprep.mubr.f32.mxu0 %v12823_v1  ;;  %v4021_v58 = vsub.f32 %v4019_v8, %v4020_v50  ;;  %v5352_v16 = vsel %vm5351_vm9, %v5348_v10, %v5350_v21 }
 0x1d1   : > { %3408 = vmatmul.mubr.f32.vlgmr.msra.gmra.mxu1 %v11769_v40  ;;  %3654 = vmatmul.mubr.f32.vlgmr.msra.gmra.mxu0 %v11823_v6  ;;  %v4392_v40 = vsel %vm454_vm1, %v4386_v54, 0  ;;  %v4466_v9 = vand.u32 4294901760, %v11909_v60  ;;  %v4028_v6 = vand.u32 4294901760, %v4027_v63  ;;  %v11998_v54 = vsub.f32 %v5359_v42, %v11985_v44 }
 0x1d2   : > { %3542 = vmatpush1.msra.mxu1 %v3541_v46  ;;  %3773 = vmatpush1.msra.mxu0 %v3539_v5  ;;  %v11917_v61 = vand.u32 4294901760, %v4392_v40  ;;  %v4022_v0 = vand.u32 4294901760, %v4021_v58  ;;  %v11962_v5 = vand.u32 4294901760, %v4875_v22  ;;  %v11993_v46 = vand.u32 4294901760, %v5365_v45 }
 0x1d3   : > { %3691 = vmatprep.subr.mxu1 %v11820_v3  ;;  %3941 = vmatprep.subr.mxu0 %v11864_v35 }
 0x1d4   : > { %3575 = vmatprep.mubr.f32.mxu1 %v12823_v1  ;;  %3806 = vmatprep.mubr.f32.mxu0 %v12823_v1  ;;  %v11929_v13 = vsub.f32 %v4392_v40, %v11917_v61  ;;  %v4995_v43 = vsub.f32 %v4875_v22, %v11962_v5  ;;  %v5436_v40 = vand.u32 4294901760, %v11998_v54 }
 0x1d5   : > { %3577 = vmatmul.mubr.f32.vlgmr.msra.gmra.mxu1 %v11808_v59  ;;  %3808 = vmatmul.mubr.f32.vlgmr.msra.gmra.mxu0 %v11808_v59 }
 0x1d6   : > { %3693 = vmatpush1.msra.mxu1 %v11834_v12  ;;  %3943 = vmatpush1.msra.mxu0 %v11875_v38  ;;  %v4996_v47 = vand.u32 4294901760, %v4995_v43 }
 0x1d7   : > { %3845 = vmatprep.subr.mxu1 %v11820_v3  ;;  %4102 = vmatprep.subr.mxu0 %v4019_v8  ;;  %v4873_v3 = vsel %vm450_vm0, %v1434_v25, 0  ;;  %v5356_v8 = vmul.f32 %v5352_v16, %v11706_v49 }
 0x1d8   : > { %3726 = vmatprep.mubr.f32.mxu1 %v12823_v1  ;;  %3976 = vmatprep.mubr.f32.mxu0 %v12823_v1  ;;  %v11933_v14 = vand.u32 4294901760, %v4873_v3  ;;  %v4997_v56 = vsub.f32 %v4995_v43, %v4996_v47 }
 0x1d9   : > { %3730 = vmatmul.mubr.f32.vlgmr.msra.gmra.mxu1 %v3492_v18  ;;  %3982 = vmatmul.mubr.f32.vlgmr.msra.gmra.mxu0 %v3981_v57  ;;  %v4507_v18 = vand.u32 4294901760, %v4506_v7 }
 0x1da   : > { %3847 = vmatpush1.msra.mxu1 %v11834_v12  ;;  %4105 = vmatpush1.msra.mxu0 %v4025_v52  ;;  %v4467_v12 = vsub.f32 %v11909_v60, %v4466_v9  ;;  %v11948_v17 = vsub.f32 %v4873_v3, %v11933_v14  ;;  %v4998_v58 = vand.u32 4294901760, %v4997_v56 }
 0x1db   : > { %4023 = vmatprep.subr.mxu1 %v4022_v0  ;;  %4256 = vmatprep.subr.mxu0 %v4020_v50  ;;  %v4508_v27 = vsub.f32 %v4506_v7, %v4507_v18 }
 0x1dc   : > { %3880 = vmatprep.mubr.f32.mxu1 %v12823_v1  ;;  %4138 = vmatprep.mubr.f32.mxu0 %v12823_v1  ;;  %v4468_v26 = vand.u32 4294901760, %v4467_v12  ;;  %v4949_v36 = vand.u32 4294901760, %v11948_v17 }
 0x1dd   : > { %3882 = vmatmul.mubr.f32.vlgmr.msra.gmra.mxu1 %v11808_v59  ;;  %4141 = vmatmul.mubr.f32.vlgmr.msra.gmra.mxu0 %v11861_v32  ;;  %v4513_v59 = vand.u32 4294901760, %v11929_v13 }
 0x1de   : > { %4029 = vmatpush1.msra.mxu1 %v4028_v6  ;;  %4260 = vmatpush1.msra.mxu0 %v4026_v39  ;;  %v5476_v39 = vsub.f32 %v5365_v45, %v11993_v46 }
 0x1df   : > { %4178 = vmatprep.subr.mxu1 %v11864_v35  ;;  %4428 = vmatprep.subr.mxu0 %v11904_v51  ;;  %v4514_v34 = vsub.f32 %v11929_v13, %v4513_v59 }
 0x1e0   : > { %4062 = vmatprep.mubr.f32.mxu1 %v12823_v1  ;;  %4293 = vmatprep.mubr.f32.mxu0 %v12823_v1  ;;  %v5477_v25 = vand.u32 4294901760, %v5476_v39 }
 0x1e1   : > { %4064 = vmatmul.mubr.f32.vlgmr.msra.gmra.mxu1 %v11847_v23  ;;  %4295 = vmatmul.mubr.f32.vlgmr.msra.gmra.mxu0 %v11847_v23  ;;  %v4515_v32 = vand.u32 4294901760, %v4514_v34 }
 0x1e2   : > { %4180 = vmatpush1.msra.mxu1 %v11875_v38  ;;  %4430 = vmatpush1.msra.mxu0 %v11917_v61  ;;  %v5478_v62 = vsub.f32 %v5476_v39, %v5477_v25 }
 0x1e3   : > { %4332 = vmatprep.subr.mxu1 %v11864_v35  ;;  %4589 = vmatprep.subr.mxu0 %v4506_v7  ;;  %v4509_v35 = vand.u32 4294901760, %v4508_v27 }
 0x1e4   : > { %4213 = vmatprep.mubr.f32.mxu1 %v12823_v1  ;;  %4463 = vmatprep.mubr.f32.mxu0 %v12823_v1  ;;  %v5479_v0 = vand.u32 4294901760, %v5478_v62 }
 0x1e5   : > { %4217 = vmatmul.mubr.f32.vlgmr.msra.gmra.mxu1 %v3979_v41  ;;  %4469 = vmatmul.mubr.f32.vlgmr.msra.gmra.mxu0 %v4468_v26  ;;  %v4950_v41 = vsub.f32 %v11948_v17, %v4949_v36 }
 0x1e6   : > { %4334 = vmatpush1.msra.mxu1 %v11875_v38  ;;  %4592 = vmatpush1.msra.mxu0 %v11929_v13  ;;  %v4990_v38 = vand.u32 4294901760, %v4989_v37  ;;  %v12049_v13 = vpop.f32.mrf.mxu1 }
 0x1e7   : > { %4510 = vmatprep.subr.mxu1 %v4509_v35  ;;  %4743 = vmatprep.subr.mxu0 %v4507_v18  ;;  %v4951_v52 = vand.u32 4294901760, %v4950_v41  ;;  %12855 = vst [vmem:[#allocation14_spill] sm:$0xff] %v12049_v13 }
 0x1e8   : > { %4367 = vmatprep.mubr.f32.mxu1 %v12823_v1  ;;  %4625 = vmatprep.mubr.f32.mxu0 %v12823_v1  ;;  %v4991_v53 = vsub.f32 %v4989_v37, %v4990_v38 }
 0x1e9   : > { %4369 = vmatmul.mubr.f32.vlgmr.msra.gmra.mxu1 %v11847_v23  ;;  %4628 = vmatmul.mubr.f32.vlgmr.msra.gmra.mxu0 %v11909_v60  ;;  %v5362_v23 = vsel %vm454_vm1, %v5356_v8, 0  ;;  %v5437_v60 = vsub.f32 %v11998_v54, %v5436_v40 }
 0x1ea   : > { %4516 = vmatpush1.msra.mxu1 %v4515_v32  ;;  %4747 = vmatpush1.msra.mxu0 %v4513_v59  ;;  %v5399_v50 = vand.u32 4294901760, %v5362_v23  ;;  %v4992_v57 = vand.u32 4294901760, %v4991_v53 }
 0x1eb   : > { %4665 = vmatprep.subr.mxu1 %v11904_v51  ;;  %4911 = vmatprep.subr.mxu0 %v11951_v24 }
 0x1ec   : > { %4549 = vmatprep.mubr.f32.mxu1 %v12823_v1  ;;  %4780 = vmatprep.mubr.f32.mxu0 %v12823_v1 }
 0x1ed   : > { %4551 = vmatmul.mubr.f32.vlgmr.msra.gmra.mxu1 %v11896_v55  ;;  %4782 = vmatmul.mubr.f32.vlgmr.msra.gmra.mxu0 %v11896_v55 }
 0x1ee   : > { %4667 = vmatpush1.msra.mxu1 %v11917_v61  ;;  %4913 = vmatpush1.msra.mxu0 %v11962_v5 }
 0x1ef   : > { %4819 = vmatprep.subr.mxu1 %v11904_v51  ;;  %5072 = vmatprep.subr.mxu0 %v4989_v37  ;;  %v5482_v51 = vsub.f32 %v5362_v23, %v5399_v50 }
 0x1f0   : > { %4700 = vmatprep.mubr.f32.mxu1 %v12823_v1  ;;  %4946 = vmatprep.mubr.f32.mxu0 %v12823_v1 }
 0x1f1   : > { %4704 = vmatmul.mubr.f32.vlgmr.msra.gmra.mxu1 %v4466_v9  ;;  %4952 = vmatmul.mubr.f32.vlgmr.msra.gmra.mxu0 %v4951_v52  ;;  %v12043_v9 = vpop.f32.mrf.mxu0 }
 0x1f2   : > { %4821 = vmatpush1.msra.mxu1 %v11917_v61  ;;  %5075 = vmatpush1.msra.mxu0 %v4995_v43  ;;  %v5483_v61 = vand.u32 4294901760, %v5482_v51  ;;  %12852 = vst [vmem:[#allocation11_spill] sm:$0xff] %v12043_v9 }
 0x1f3   : > { %4993 = vmatprep.subr.mxu1 %v4992_v57  ;;  %5226 = vmatprep.subr.mxu0 %v4990_v38  ;;  %v12045_v3 = vpop.f32.mrf.mxu0 }
 0x1f4   : > { %4854 = vmatprep.mubr.f32.mxu1 %v12823_v1  ;;  %5108 = vmatprep.mubr.f32.mxu0 %v12823_v1  ;;  %v5484_v63 = vsub.f32 %v5482_v51, %v5483_v61  ;;  %12853 = vst [vmem:[#allocation12_spill] sm:$0xff] %v12045_v3 }
 0x1f5   : > { %4856 = vmatmul.mubr.f32.vlgmr.msra.gmra.mxu1 %v11896_v55  ;;  %5111 = vmatmul.mubr.f32.vlgmr.msra.gmra.mxu0 %v11948_v17  ;;  %v5438_v55 = vand.u32 4294901760, %v5437_v60  ;;  %v12047_v11 = vpop.f32.mrf.mxu0 }
 0x1f6   : > { %4999 = vmatpush1.msra.mxu1 %v4998_v58  ;;  %5230 = vmatpush1.msra.mxu0 %v4996_v47  ;;  %v5485_v7 = vand.u32 4294901760, %v5484_v63  ;;  %12854 = vst [vmem:[#allocation13_spill] sm:$0xff] %v12047_v11 }
 0x1f7   : > { %5148 = vmatprep.subr.mxu1 %v11951_v24  ;;  %5398 = vmatprep.subr.mxu0 %v11993_v46  ;;  %v12051_v6 = vpop.f32.mrf.mxu0 }
 0x1f8   : > { %5032 = vmatprep.mubr.f32.mxu1 %v12823_v1  ;;  %5263 = vmatprep.mubr.f32.mxu0 %v12823_v1  ;;  %12856 = vst [vmem:[#allocation15_spill] sm:$0xff] %v12051_v6 }
 0x1f9   : > { %5034 = vmatmul.mubr.f32.vlgmr.msra.gmra.mxu1 %v11933_v14  ;;  %5265 = vmatmul.mubr.f32.vlgmr.msra.gmra.mxu0 %v11933_v14  ;;  %v12055_v15 = vpop.f32.mrf.mxu0 }
 0x1fa   : > { %5150 = vmatpush1.msra.mxu1 %v11962_v5  ;;  %5400 = vmatpush1.msra.mxu0 %v5399_v50  ;;  %12858 = vst [vmem:[#allocation17_spill] sm:$0xff] %v12055_v15 }
 0x1fb   : > { %5302 = vmatprep.subr.mxu1 %v11951_v24  ;;  %5559 = vmatprep.subr.mxu0 %v5476_v39  ;;  %v12059_v18 = vpop.f32.mrf.mxu0 }
 0x1fc   : > { %5183 = vmatprep.mubr.f32.mxu1 %v12823_v1  ;;  %5433 = vmatprep.mubr.f32.mxu0 %v12823_v1  ;;  %12860 = vst [vmem:[#allocation19_spill] sm:$0xff] %v12059_v18 }
 0x1fd   : > { %5187 = vmatmul.mubr.f32.vlgmr.msra.gmra.mxu1 %v4949_v36  ;;  %5439 = vmatmul.mubr.f32.vlgmr.msra.gmra.mxu0 %v5438_v55 }
 0x1fe   : > { %5304 = vmatpush1.msra.mxu1 %v11962_v5  ;;  %5562 = vmatpush1.msra.mxu0 %v5482_v51 }
 0x1ff   : > { %5480 = vmatprep.subr.mxu1 %v5479_v0  ;;  %5713 = vmatprep.subr.mxu0 %v5477_v25 }
 0x200   : > { %5337 = vmatprep.mubr.f32.mxu1 %v12823_v1  ;;  %5595 = vmatprep.mubr.f32.mxu0 %v12823_v1 }
 0x201   : > { %5339 = vmatmul.mubr.f32.vlgmr.msra.gmra.mxu1 %v11933_v14  ;;  %5598 = vmatmul.mubr.f32.vlgmr.msra.gmra.mxu0 %v11998_v54  ;;  %v12053_v14 = vpop.f32.mrf.mxu1 }
 0x202   : > { %5486 = vmatpush1.msra.mxu1 %v5485_v7  ;;  %5717 = vmatpush1.msra.mxu0 %v5483_v61  ;;  %12857 = vst [vmem:[#allocation16_spill] sm:$0xff] %v12053_v14 }
 0x203   : > { %5635 = vmatprep.subr.mxu1 %v11993_v46  ;;  %5519 = vmatprep.mubr.f32.mxu1 %v12823_v1  ;;  %v12057_v12 = vpop.f32.mrf.mxu1 }
 0x204   : > { %5750 = vmatprep.mubr.f32.mxu0 %v12823_v1  ;;  %12859 = vst [vmem:[#allocation18_spill] sm:$0xff] %v12057_v12 }
 0x205   : > { %5521 = vmatmul.mubr.f32.vlgmr.msra.gmra.mxu1 %v11985_v44  ;;  %5752 = vmatmul.mubr.f32.vlgmr.msra.gmra.mxu0 %v11985_v44  ;;  %v12061_v19 = vpop.f32.mrf.mxu1 }
 0x206   : > { %5637 = vmatpush1.msra.mxu1 %v5399_v50  ;;  %5670 = vmatprep.mubr.f32.mxu1 %v12823_v1  ;;  %12861 = vst [vmem:[#allocation20_spill] sm:$0xff] %v12061_v19 }
 0x207   : > { %5789 = vmatprep.subr.mxu1 %v11993_v46  ;;  %5958 = vmatprep.mubr.f32.mxu0 %v12823_v1  ;;  %v12063_v59 = vpop.f32.mrf.mxu1 }
 0x208   : > { %12862 = vst [vmem:[#allocation21_spill] sm:$0xff] %v12063_v59 }
 0x209   : > { %5674 = vmatmul.mubr.f32.vlgmr.msra.gmra.mxu1 %v5436_v40  ;;  %v12065_v24 = vpop.f32.mrf.mxu1 }
 0x20a   : > { %5791 = vmatpush1.msra.mxu1 %v5399_v50  ;;  %5824 = vmatprep.mubr.f32.mxu1 %v12823_v1  ;;  %12863 = vst [vmem:[#allocation22_spill] sm:$0xff] %v12065_v24 }
 0x20d   : > { %5826 = vmatmul.mubr.f32.vlgmr.msra.gmra.mxu1 %v11985_v44 }
 0x20e   : > { %6044 = vmatprep.mubr.f32.mxu1 %v12823_v1 }
 0x25c   : > { %v1558_v20 = vpop.f32.mrf.mxu0 }
 0x25e   : > { %v1560_v21 = vpop.f32.mrf.mxu0 }
 0x260   : > { %v1717_v17 = vpop.f32.mrf.mxu0 }
 0x262   : > { %v1719_v22 = vpop.f32.mrf.mxu0 }
 0x264   : > { %v1871_v26 = vpop.f32.mrf.mxu0 }
 0x265   : > { %v1640_v27 = vpop.f32.mrf.mxu1 }
 0x266   : > { %v1641_v29 = vadd.f32 %v1640_v27, %v1558_v20  ;;  %v1873_v31 = vpop.f32.mrf.mxu0 }
 0x267   : > { %v1642_v5 = vpop.f32.mrf.mxu1 }
 0x268   : > { %v1718_v34 = vadd.f32 %v1717_v17, %v1641_v29  ;;  %v1643_v36 = vadd.f32 %v1642_v5, %v1560_v21 }
 0x269   : > { %v1793_v37 = vpop.f32.mrf.mxu1  ;;  %v2032_v10 = vpop.f32.mrf.mxu0 }
 0x26a   : > { %v1720_v35 = vadd.f32 %v1719_v22, %v1643_v36  ;;  %v1794_v16 = vadd.f32 %v1793_v37, %v1718_v34 }
 0x26b   : > { %v1795_v28 = vpop.f32.mrf.mxu1  ;;  %v2034_v42 = vpop.f32.mrf.mxu0 }
 0x26c   : > { %v1872_v43 = vadd.f32 %v1871_v26, %v1794_v16  ;;  %v1796_v32 = vadd.f32 %v1795_v28, %v1720_v35 }
 0x26d   : > { %v1945_v41 = vpop.f32.mrf.mxu1  ;;  %v2191_v8 = vpop.f32.mrf.mxu0 }
 0x26e   : > { %v1874_v38 = vadd.f32 %v1873_v31, %v1796_v32  ;;  %v1946_v44 = vadd.f32 %v1945_v41, %v1872_v43 }
 0x26f   : > { %v1947_v45 = vpop.f32.mrf.mxu1  ;;  %v2193_v47 = vpop.f32.mrf.mxu0 }
 0x270   : > { %v2033_v52 = vadd.f32 %v2032_v10, %v1946_v44  ;;  %v1948_v23 = vadd.f32 %v1947_v45, %v1874_v38 }
 0x271   : > { %v2114_v46 = vpop.f32.mrf.mxu1  ;;  %v2345_v53 = vpop.f32.mrf.mxu0 }
 0x272   : > { %v2035_v54 = vadd.f32 %v2034_v42, %v1948_v23  ;;  %v2115_v50 = vadd.f32 %v2114_v46, %v2033_v52 }
 0x273   : > { %v2116_v56 = vpop.f32.mrf.mxu1  ;;  %v2347_v57 = vpop.f32.mrf.mxu0 }
 0x274   : > { %v2192_v39 = vadd.f32 %v2191_v8, %v2115_v50  ;;  %v2117_v40 = vadd.f32 %v2116_v56, %v2035_v54 }
 0x275   : > { %v2267_v51 = vpop.f32.mrf.mxu1  ;;  %v12067_v58 = vpop.f32.mrf.mxu0 }
 0x276   : > { %v2194_v60 = vadd.f32 %v2193_v47, %v2117_v40  ;;  %v2268_v25 = vadd.f32 %v2267_v51, %v2192_v39 }
 0x277   : > { %v2269_v61 = vpop.f32.mrf.mxu1  ;;  %v12069_v55 = vpop.f32.mrf.mxu0 }
 0x278   : > { %v2346_v62 = vadd.f32 %v2345_v53, %v2268_v25  ;;  %v2270_v63 = vadd.f32 %v2269_v61, %v2194_v60 }
 0x279   : > { %v2419_v0 = vpop.f32.mrf.mxu1  ;;  %v12071_v7 = vpop.f32.mrf.mxu0 }
 0x27a   : > { %v2348_v20 = vadd.f32 %v2347_v57, %v2270_v63  ;;  %v12073_v21 = vadd.f32 %v2419_v0, %v2346_v62 }
 0x27b   : > { %v2421_v17 = vpop.f32.mrf.mxu1  ;;  %v12075_v22 = vpop.f32.mrf.mxu0 }
 0x27c   : > { %v12077_v26 = vadd.f32 %v2421_v17, %v2348_v20 }
 0x27d   : > { %v2617_v27 = vpop.f32.mrf.mxu1  ;;  %v12079_v29 = vpop.f32.mrf.mxu0 }
 0x27e   : > { %12864 = vst [vmem:[#allocation23_spill] sm:$0xff] %v12077_v26  ;;  %v2618_v14 = vadd.f32 %v2617_v27, %v12067_v58 }
 0x27f   : > { %v2619_v31 = vpop.f32.mrf.mxu1  ;;  %v12081_v5 = vpop.f32.mrf.mxu0 }
 0x280   : > { %v2620_v9 = vadd.f32 %v2619_v31, %v12069_v55  ;;  %v2695_v30 = vadd.f32 %v12071_v7, %v2618_v14 }
 0x281   : > { %v12083_v34 = vpop.f32.mrf.mxu1  ;;  %v3022_v36 = vpop.f32.mrf.mxu0 }
 0x283   : > { %v12085_v37 = vpop.f32.mrf.mxu1  ;;  %v3024_v10 = vpop.f32.mrf.mxu0 }
 0x285   : > { %v12087_v35 = vpop.f32.mrf.mxu1  ;;  %v3181_v16 = vpop.f32.mrf.mxu0 }
 0x287   : > { %v12089_v28 = vpop.f32.mrf.mxu1  ;;  %v3183_v42 = vpop.f32.mrf.mxu0 }
 0x289   : > { %v3104_v43 = vpop.f32.mrf.mxu1  ;;  %v12091_v32 = vpop.f32.mrf.mxu0 }
 0x28a   : > { %v3105_v49 = vadd.f32 %v3104_v43, %v3022_v36 }
 0x28b   : > { %v3106_v41 = vpop.f32.mrf.mxu1  ;;  %v12093_v8 = vpop.f32.mrf.mxu0 }
 0x28d   : > { %v3257_v38 = vpop.f32.mrf.mxu1  ;;  %v3496_v44 = vpop.f32.mrf.mxu0 }
 0x28f   : > { %v12095_v45 = vpop.f32.mrf.mxu1  ;;  %v3498_v47 = vpop.f32.mrf.mxu0 }
 0x291   : > { %v12097_v52 = vpop.f32.mrf.mxu1  ;;  %v3655_v23 = vpop.f32.mrf.mxu0 }
 0x293   : > { %v12099_v46 = vpop.f32.mrf.mxu1  ;;  %v3657_v53 = vpop.f32.mrf.mxu0 }
 0x294   : > { %12865 = vst [vmem:[#allocation24_spill] sm:$0xff] %v12099_v46 }
 0x295   : > { %v3578_v54 = vpop.f32.mrf.mxu1  ;;  %v12101_v50 = vpop.f32.mrf.mxu0 }
 0x297   : > { %v3580_v56 = vpop.f32.mrf.mxu1  ;;  %v12103_v57 = vpop.f32.mrf.mxu0 }
 0x299   : > { %v3731_v39 = vpop.f32.mrf.mxu1  ;;  %v3983_v40 = vpop.f32.mrf.mxu0 }
 0x29b   : > { %v12105_v51 = vpop.f32.mrf.mxu1  ;;  %v3985_v60 = vpop.f32.mrf.mxu0 }
 0x29d   : > { %v12107_v25 = vpop.f32.mrf.mxu1  ;;  %v4142_v61 = vpop.f32.mrf.mxu0 }
 0x29e   : > { %12866 = vst [vmem:[#allocation25_spill] sm:$0xff] %v12107_v25  ;;  %v3182_v25 = vadd.f32 %v3181_v16, %v3105_v49 }
 0x29f   : > { %v12109_v62 = vpop.f32.mrf.mxu1  ;;  %v4144_v63 = vpop.f32.mrf.mxu0 }
 0x2a0   : > { %12867 = vst [vmem:[#allocation26_spill] sm:$0xff] %v12109_v62  ;;  %v3579_v62 = vadd.f32 %v3578_v54, %v3496_v44 }
 0x2a1   : > { %v4065_v0 = vpop.f32.mrf.mxu1  ;;  %v12111_v20 = vpop.f32.mrf.mxu0 }
 0x2a2   : > { %v4066_v46 = vadd.f32 %v4065_v0, %v3983_v40  ;;  %v3656_v31 = vadd.f32 %v3655_v23, %v3579_v62 }
 0x2a3   : > { %v4067_v17 = vpop.f32.mrf.mxu1  ;;  %v12113_v1 = vpop.f32.mrf.mxu0 }
 0x2a4   : > { %12868 = vst [vmem:[#allocation27_spill] sm:$0xff] %v12113_v1  ;;  %v2697_v1 = vadd.f32 %v12075_v22, %v2620_v9  ;;  %v4068_v36 = vadd.f32 %v4067_v17, %v3985_v60  ;;  %v4143_v9 = vadd.f32 %v4142_v61, %v4066_v46  ;;  %v12877_v17 = vld [vmem:[#allocation23_spill] sm:$0xff] }
 0x2a5   : > { %v4218_v4 = vpop.f32.mrf.mxu1  ;;  %v4470_v2 = vpop.f32.mrf.mxu0 }
 0x2a7   : > { %v4220_v24 = vpop.f32.mrf.mxu1  ;;  %v4472_v59 = vpop.f32.mrf.mxu0 }
 0x2a9   : > { %v12115_v18 = vpop.f32.mrf.mxu1  ;;  %v4629_v15 = vpop.f32.mrf.mxu0 }
 0x2aa   : > { %12869 = vst [vmem:[#allocation28_spill] sm:$0xff] %v12115_v18  ;;  %v3107_v18 = vadd.f32 %v3106_v41, %v3024_v10  ;;  %v2773_v10 = vadd.f32 %v12085_v37, %v2697_v1  ;;  %v3258_v41 = vadd.f32 %v3257_v38, %v3182_v25  ;;  %v12874_v25 = vld [vmem:[#allocation25_spill] sm:$0xff] }
 0x2ab   : > { %v12117_v19 = vpop.f32.mrf.mxu1  ;;  %v4631_v12 = vpop.f32.mrf.mxu0 }
 0x2ac   : > { %12870 = vst [vmem:[#allocation29_spill] sm:$0xff] %v12117_v19  ;;  %v3184_v55 = vadd.f32 %v3183_v42, %v3107_v18  ;;  %v3732_v18 = vadd.f32 %v3731_v39, %v3656_v31  ;;  %v3336_v1 = vadd.f32 %v12091_v32, %v3258_v41 }
 0x2ad   : > { %v4552_v6 = vpop.f32.mrf.mxu1  ;;  %v12119_v11 = vpop.f32.mrf.mxu0 }
 0x2ae   : > { %12871 = vst [vmem:[#allocation30_spill] sm:$0xff] %v12119_v11  ;;  %v3581_v11 = vadd.f32 %v3580_v56, %v3498_v47  ;;  %v4553_v7 = vadd.f32 %v4552_v6, %v4470_v2  ;;  %v2851_v2 = vadd.f32 %v12081_v5, %v2773_v10  ;;  %v4219_v6 = vadd.f32 %v4218_v4, %v4143_v9 }
 0x2af   : > { %v4554_v13 = vpop.f32.mrf.mxu1  ;;  %v12122_v3 = vpop.f32.mrf.mxu0  ;;  %v3810_v38 = vadd.f32 %v12101_v50, %v3732_v18  ;;  %v12873_v50 = vld [vmem:[#allocation24_spill] sm:$0xff] }
 0x2b0   : > { %12872 = vst [vmem:[#allocation31_spill] sm:$0xff] %v12122_v3  ;;  %v2771_v3 = vadd.f32 %v12083_v34, %v2695_v30  ;;  %v3658_v44 = vadd.f32 %v3657_v53, %v3581_v11  ;;  %v4555_v16 = vadd.f32 %v4554_v13, %v4472_v59  ;;  %v3260_v30 = vadd.f32 %v12095_v45, %v3184_v55 }
 0x2b1   : > { %v4705_v48 = vpop.f32.mrf.mxu1  ;;  %v4953_v33 = vpop.f32.mrf.mxu0  ;;  %v4145_v34 = vadd.f32 %v4144_v63, %v4068_v36  ;;  %v4630_v56 = vadd.f32 %v4629_v15, %v4553_v7  ;;  %v2925_v32 = vadd.f32 %v12089_v28, %v2851_v2  ;;  %v3410_v53 = vadd.f32 %v12097_v52, %v3336_v1  ;;  %v12879_v31 = vld [vmem:[#allocation28_spill] sm:$0xff] }
 0x2b2   : > { %v2849_v54 = vadd.f32 %v12079_v29, %v2771_v3  ;;  %v3734_v11 = vadd.f32 %v12105_v51, %v3658_v44  ;;  %v3338_v29 = vadd.f32 %v12093_v8, %v3260_v30  ;;  %v3884_v61 = vadd.f32 %v12874_v25, %v3810_v38 }
 0x2b3   : > { %v4707_v26 = vpop.f32.mrf.mxu1  ;;  %v4955_v19 = vpop.f32.mrf.mxu0  ;;  %v4221_v45 = vadd.f32 %v4220_v24, %v4145_v34  ;;  %v4706_v46 = vadd.f32 %v4705_v48, %v4630_v56  ;;  %v12875_v48 = vld [vmem:[#allocation27_spill] sm:$0xff] }
 0x2b4   : > { %v2923_v3 = vadd.f32 %v12087_v35, %v2849_v54  ;;  %v3812_v4 = vadd.f32 %v12103_v57, %v3734_v11  ;;  %v3412_v24 = vadd.f32 %v12873_v50, %v3338_v29  ;;  %v2928_v57 = vadd.f32 %v2925_v32, %v12877_v17  ;;  %v11190_v17 = vld [vmem:[%s12809_s12] sm:$0xff] }
 0x2b5   : > { %v12127_v58 = vpop.f32.mrf.mxu1  ;;  %v5112_v27 = vpop.f32.mrf.mxu0  ;;  %v4299_v62 = vadd.f32 %v12875_v48, %v4221_v45  ;;  %v12876_v28 = vld [vmem:[#allocation30_spill] sm:$0xff] }
 0x2b6   : > { %v2927_v8 = vadd.f32 %v2923_v3, %v12073_v21  ;;  %v4784_v0 = vadd.f32 %v12876_v28, %v4706_v46  ;;  %v3415_v44 = vadd.f32 %v3412_v24, %v2928_v57  ;;  %v5856_v57 = vld [vmem:[%s12805_s8 + $0x4] sm:$0xf] }
 0x2b7   : > { %v12130_v43 = vpop.f32.mrf.mxu1  ;;  %v5114_v14 = vpop.f32.mrf.mxu0  ;;  %v12880_v21 = vld [vmem:[#allocation31_spill] sm:$0xff] }
 0x2b8   : > { %v4858_v54 = vadd.f32 %v12127_v58, %v4784_v0  ;;  %v939_v0 = vld [vmem:[%s12802_s5] sm:$0xf] }
 0x2b9   : > { %v5035_v49 = vpop.f32.mrf.mxu1  ;;  %v5266_v22 = vpop.f32.mrf.mxu0 }
 0x2ba   : > { %v5036_v47 = vadd.f32 %v5035_v49, %v4953_v33  ;;  %v4632_v33 = vadd.f32 %v4631_v12, %v4555_v16  ;;  %v4297_v12 = vadd.f32 %v12111_v20, %v4219_v6  ;;  %v12878_v20 = vld [vmem:[#allocation26_spill] sm:$0xff]  ;;  %v12881_v49 = vld [vmem:[#allocation29_spill] sm:$0xff] }
 0x2bb   : > { %v5037_v42 = vpop.f32.mrf.mxu1  ;;  %v5268_v23 = vpop.f32.mrf.mxu0  ;;  %v3886_v55 = vadd.f32 %v12878_v20, %v3812_v4  ;;  %v4373_v16 = vadd.f32 %v12881_v49, %v4299_v62 }
 0x2bc   : > { %v5038_v40 = vadd.f32 %v5037_v42, %v4955_v19  ;;  %v5113_v59 = vadd.f32 %v5112_v27, %v5036_v47  ;;  %v4708_v35 = vadd.f32 %v4707_v26, %v4632_v33  ;;  %v3414_v27 = vadd.f32 %v3410_v53, %v2927_v8 }
 0x2bd   : > { %v5188_v37 = vpop.f32.mrf.mxu1  ;;  %v5440_v13 = vpop.f32.mrf.mxu0  ;;  %v4371_v26 = vadd.f32 %v12879_v31, %v4297_v12  ;;  %v3889_v42 = vadd.f32 %v3886_v55, %v3415_v44  ;;  %v5855_v31 = vld [vmem:[%s12805_s8] sm:$0xf] }
 0x2be   : > { %v5115_v5 = vadd.f32 %v5114_v14, %v5038_v40  ;;  %v5189_v60 = vadd.f32 %v5188_v37, %v5113_v59  ;;  %v4786_v7 = vadd.f32 %v12880_v21, %v4708_v35  ;;  %v3888_v9 = vadd.f32 %v3884_v61, %v3414_v27 }
 0x2bf   : > { %v5190_v15 = vpop.f32.mrf.mxu1  ;;  %v5442_v19 = vpop.f32.mrf.mxu0  ;;  %v4376_v37 = vadd.f32 %v4373_v16, %v3889_v42  ;;  %v5885_v27 = vsel %vm450_vm0, %v5856_v57, 0  ;;  %v12888_v42 = vld [vmem:[#allocation7_spill] sm:$0xff] }
 0x2c0   : > { %v5191_v52 = vadd.f32 %v5190_v15, %v5115_v5  ;;  %v5267_v10 = vadd.f32 %v5266_v22, %v5189_v60  ;;  %v4375_v56 = vadd.f32 %v4371_v26, %v3888_v9  ;;  %v4860_v1 = vadd.f32 %v12130_v43, %v4786_v7  ;;  %v5837_v5 = vpop.permute.xlu1 %5836 }
 0x2c1   : > { %v5340_v39 = vpop.f32.mrf.mxu1  ;;  %v5599_v51 = vpop.f32.mrf.mxu0  ;;  %v12206_v20 = vand.u32 4294901760, %v5885_v27 }
 0x2c2   : > { %v5269_v30 = vadd.f32 %v5268_v23, %v5191_v52  ;;  %v5341_v11 = vadd.f32 %v5340_v39, %v5267_v10  ;;  %v4862_v33 = vadd.f32 %v4858_v54, %v4375_v56  ;;  %v4863_v23 = vadd.f32 %v4860_v1, %v4376_v37  ;;  %v5864_v52 = vld [vmem:[%s12806_s9] sm:$0xf]  ;;  %v12889_v37 = vld [vmem:[#allocation8_spill] sm:$0xff] }
 0x2c3   : > { %v5342_v63 = vpop.f32.mrf.mxu1  ;;  %v5601_v14 = vpop.f32.mrf.mxu0  ;;  %v12209_v55 = vsub.f32 %v5885_v27, %v12206_v20 }
 0x2c4   : > { %v5343_v59 = vadd.f32 %v5342_v63, %v5269_v30  ;;  %v5345_v45 = vadd.f32 %v5341_v11, %v4862_v33 }
 0x2c5   : > { %v5522_v36 = vpop.f32.mrf.mxu1  ;;  %v5753_v2 = vpop.f32.mrf.mxu0  ;;  %v5961_v26 = vand.u32 4294901760, %v12209_v55 }
 0x2c6   : > { %v5523_v41 = vadd.f32 %v5522_v36, %v5440_v13  ;;  %v5346_v32 = vadd.f32 %v5343_v59, %v4863_v23  ;;  %v6358_v36 = vsel %vm450_vm0, %v5855_v31, 0  ;;  %v5857_v59 = vld [vmem:[%s12805_s8 + $0x8] sm:$0xf] }
 0x2c7   : > { %v5524_v47 = vpop.f32.mrf.mxu1  ;;  %v5755_v38 = vpop.f32.mrf.mxu0  ;;  %v5962_v7 = vsub.f32 %v12209_v55, %v5961_v26  ;;  %v12221_v44 = vand.u32 4294901760, %v6358_v36 }
 0x2c8   : > { %v5600_v18 = vadd.f32 %v5599_v51, %v5523_v41  ;;  %v5525_v34 = vadd.f32 %v5524_v47, %v5442_v19 }
 0x2c9   : > { %v5675_v40 = vpop.f32.mrf.mxu1 }
 0x2ca   : > { %v5602_v6 = vadd.f32 %v5601_v14, %v5525_v34  ;;  %v5676_v22 = vadd.f32 %v5675_v40, %v5600_v18  ;;  %v5963_v34 = vand.u32 4294901760, %v5962_v7 }
 0x2cb   : > { %v5677_v13 = vpop.f32.mrf.mxu1 }
 0x2cc   : > { %v5754_v3 = vadd.f32 %v5753_v2, %v5676_v22  ;;  %v5678_v29 = vadd.f32 %v5677_v13, %v5602_v6  ;;  %v12231_v2 = vsub.f32 %v6358_v36, %v12221_v44 }
 0x2cd   : > { %v5827_v58 = vpop.f32.mrf.mxu1 }
 0x2ce   : > { %v5756_v15 = vadd.f32 %v5755_v38, %v5678_v29  ;;  %v5828_v19 = vadd.f32 %v5827_v58, %v5754_v3 }
 0x2cf   : > { %v5829_v46 = vpop.f32.mrf.mxu1 }
 0x2d0   : > { %v5832_v53 = vadd.f32 %v5828_v19, %v5345_v45  ;;  %v5830_v43 = vadd.f32 %v5829_v46, %v5756_v15  ;;  %v12890_v45 = vmov 0.0   ;;  %v6435_v19 = vand.u32 4294901760, %v12231_v2 }
 0x2d2   : > { %v5833_v4 = vadd.f32 %v5830_v43, %v5346_v32  ;;  %v5839_v12 = vadd.f32 %v5837_v5, %v5832_v53  ;;  %v6842_v53 = vsel %vm450_vm0, %v5857_v59, 0 }
 0x2d4   : > { %v5840_v39 = vadd.f32 %v5837_v5, %v5833_v4  ;;  %v5841_v51 = vsub.f32 0.0, %v5839_v12  ;;  %v12891_v4 = vld [vmem:[#allocation9_spill] sm:$0xff] }
 0x2d6   : > { %v5842_v35 = vsub.f32 0.0, %v5840_v39  ;;  %v5843_v60 = vmul.f32 1.442695, %v5841_v51 }
 0x2d8   : > { %11362 = vpow2.f32 %v5843_v60  ;;  %v5845_v8 = vmul.f32 1.442695, %v5842_v35 }
 0x2da   : > { %11364 = vpow2.f32 %v5845_v8 }
 0x2e5   : > { %v11363_v50 = vpop.eup %11362 }
 0x2e6   : > { %v5847_v24 = vadd.f32 1.0, %v11363_v50 }
 0x2e7   : > { %v11365_v25 = vpop.eup %11364 }
 0x2e8   : > { %v5848_v61 = vadd.f32 1.0, %v11365_v25  ;;  %11366 = vrcp.f32 %v5847_v24  ;;  %v6436_v25 = vsub.f32 %v12231_v2, %v6435_v19 }
 0x2ea   : > { %11368 = vrcp.f32 %v5848_v61  ;;  %v12262_v61 = vand.u32 4294901760, %v6842_v53  ;;  %v6437_v27 = vand.u32 4294901760, %v6436_v25 }
 0x2ec   : > { %v12273_v31 = vsub.f32 %v6842_v53, %v12262_v61 }
 0x2f5   : > { %v11367_v48 = vpop.eup %11366 }
 0x2f6   : > { %v12157_v62 = vmul.f32 %v11367_v48, %v5839_v12 }
 0x2f7   : > { %v11369_v63 = vpop.eup %11368 }
 0x2f8   : > { %v12159_v28 = vmul.f32 %v11369_v63, %v5840_v39  ;;  %5877 = vrot.lane.b32.xlu0 %v12157_v62, %s11458_s23  ;;  %v12892_v39 = vld [vmem:[#allocation10_spill] sm:$0xff] }
 0x2fa   : > { %5879 = vrot.lane.b32.xlu1 %v12159_v28, %s11458_s23  ;;  %s12885_s23 = smov 113  }
 0x2fc   : > { %5867 = vrot.lane.b32.xlu0 %v12157_v62, %s11459_s24 }
 0x2fe   : > { %5869 = vrot.lane.b32.xlu1 %v12159_v28, %s11459_s24  ;;  %s12886_s24 = smov 112  }
 0x300   : > { %6831 = vrot.lane.b32.xlu0 %v12157_v62, %s12882_s21 }
 0x302   : > { %6833 = vrot.lane.b32.xlu1 %v12159_v28, %s12882_s21  ;;  %s11301_s21 = sshll.u32 %s11558_s29, 8  ;;  %s11398_s29 = sshll.u32 %s11466_s2, 4  ;;  %s11399_s29 = int_to_ptr.vmem [resolvable:$false] %s11398_s29 }
 0x304   : > { %7317 = vrot.lane.b32.xlu0 %v12157_v62, %s12883_s22 }
 0x306   : > { %7319 = vrot.lane.b32.xlu1 %v12159_v28, %s12883_s22  ;;  %s433_s22 = scalar_lea.vmem [#allocation2], %s11292_s20  ;;  %s11400_s20 = scalar_lea.vmem %s11399_s29, 512 }
 0x308   : > { %8279 = vrot.lane.b32.xlu0 %v12159_v28, %s12884_s15 }
 0x30a   : > { %8277 = vrot.lane.b32.xlu1 %v12157_v62, %s12884_s15  ;;  %s11229_s15 = sshll.u32 %s433_s22, 4  ;;  %s11230_s15 = int_to_ptr.vmem [resolvable:$true] %s11229_s15 }
 0x30b   : > { %s11394_s1 = scalar_lea.vmem %s11230_s15, 256  ;;  %p11401_p0 = scmp.lt.s32.totalorder %s11230_s15, %s11399_s29 }
 0x30c   : > { %8765 = vrot.lane.b32.xlu0 %v12159_v28, %s12885_s23  ;;  %p11395_p11 = scmp.ne.s32.totalorder %s11230_s15, %s11394_s1  ;;  %p11402_p1 = scmp.lt.s32.totalorder %s11400_s20, %s11394_s1 }
 0x30e   : > { %8763 = vrot.lane.b32.xlu1 %v12157_v62, %s12885_s23  ;;  %p11396_p12 = pnand %p11395_p11, %p11575_p5  ;;  %p11403_p2 = por %p11402_p1, %p11401_p0 }
 0x310   : > { %9251 = vrot.lane.b32.xlu0 %v12159_v28, %s12886_s24  ;;  %p11397_p13 = pneg %p11396_p12 }
 0x312   : > { %9249 = vrot.lane.b32.xlu1 %v12157_v62, %s12886_s24  ;;  %p11404_p3 = pnand %p11403_p2, %p11397_p13 }
 0x314   : > { %9733 = vrot.lane.b32.xlu0 %v12159_v28, %s12887_s16 }
 0x316   : > { %9731 = vrot.lane.b32.xlu1 %v12157_v62, %s12887_s16  ;;  %s11227_s16 = scalar_lea.hbm %s12810_s13, %s11301_s21 }
 0x318   : > { %942 = vperm.xlu0 %11351, %v939_v0  }
 0x31a   : > { %10219 = vperm.xlu1 %11352, %v5864_v52  }
 0x31c   : > { %11193 = vperm.xlu0 %11351, %v11190_v17  }
 0x36a   : > { %v5878_v14 = vpop.permute.xlu0 %5877 }
 0x36b   : > { %v5883_v21 = vsel %vm1473_vm2, 0.0, %v5878_v14 }
 0x36c   : > { %v5888_v10 = vsel %vm454_vm1, %v5883_v21, 0  ;;  %v5880_v41 = vpop.permute.xlu1 %5879 }
 0x36d   : > { %v12223_v9 = vand.u32 4294901760, %v5888_v10  ;;  %v5881_v49 = vsel %vm1473_vm2, %v5878_v14, %v5880_v41  ;;  %v5858_v41 = vld [vmem:[%s12805_s8 + $0xc] sm:$0xf] }
 0x36e   : > { %v5890_v16 = vsel %vm454_vm1, %v5881_v49, 0  ;;  %v5868_v47 = vpop.permute.xlu0 %5867 }
 0x36f   : > { %v6007_v54 = vsub.f32 %v5888_v10, %v12223_v9  ;;  %v5922_v30 = vand.u32 4294901760, %v5890_v16  ;;  %v5874_v18 = vsel %vm1443_vm3, 0.0, %v5868_v47 }
 0x370   : > { %v5875_v56 = vmul.f32 %v5874_v18, %v12888_v42  ;;  %v5870_v40 = vpop.permute.xlu1 %5869 }
 0x371   : > { %v6001_v1 = vsub.f32 %v5890_v16, %v5922_v30  ;;  %v5871_v11 = vsel %vm1443_vm3, %v5868_v47, %v5870_v40  ;;  %5923 = vmatprep.subr.mxu0 %v5922_v30  ;;  %v6008_v6 = vand.u32 4294901760, %v6007_v54 }
 0x372   : > { %v6361_v22 = vsel %vm454_vm1, %v5875_v56, 0  ;;  %v5876_v13 = vmul.f32 %v5871_v11, %v12889_v37  ;;  %v6832_v33 = vpop.permute.xlu0 %6831  ;;  %5925 = vmatpush1.msra.mxu0 %v12223_v9 }
 0x373   : > { %v12240_v3 = vand.u32 4294901760, %v6361_v22  ;;  %5964 = vmatmul.mubr.f32.vlgmr.msra.gmra.mxu0 %v5963_v34  ;;  %6084 = vmatprep.subr.mxu0 %v6001_v1  ;;  %v6002_v29 = vand.u32 4294901760, %v6001_v1  ;;  %v6838_v58 = vsel %vm2428_vm4, 0.0, %v6832_v33  ;;  %v6009_v15 = vsub.f32 %v6007_v54, %v6008_v6 }
 0x374   : > { %v6364_v38 = vsel %vm454_vm1, %v5876_v13, 0  ;;  %6087 = vmatpush1.msra.mxu0 %v6007_v54  ;;  %v6834_v23 = vpop.permute.xlu1 %6833  ;;  %6120 = vmatprep.mubr.f32.mxu0 %v12890_v45  ;;  %v6839_v51 = vmul.f32 %v6838_v58, %v12892_v39  ;;  %v6919_v54 = vand.u32 4294901760, %v12273_v31 }
 0x375   : > { %v12246_v46 = vand.u32 4294901760, %v6364_v38  ;;  %v6835_v5 = vsel %vm2428_vm4, %v6832_v33, %v6834_v23  ;;  %6238 = vmatprep.subr.mxu0 %v6002_v29  ;;  %v6003_v32 = vsub.f32 %v6001_v1, %v6002_v29  ;;  %v12251_v43 = vsub.f32 %v6361_v22, %v12240_v3  ;;  %v5859_v29 = vld [vmem:[%s12805_s8 + $0x10] sm:$0xf] }
 0x376   : > { %v6840_v12 = vmul.f32 %v6835_v5, %v12891_v4  ;;  %v7318_v35 = vpop.permute.xlu0 %7317  ;;  %v6010_v24 = vand.u32 4294901760, %v6009_v15  ;;  %v6845_v52 = vsel %vm454_vm1, %v6839_v51, 0  ;;  %v6920_v40 = vsub.f32 %v12273_v31, %v6919_v54 }
 0x377   : > { %6123 = vmatmul.mubr.f32.vlgmr.msra.gmra.mxu0 %v12209_v55  ;;  %v6004_v60 = vand.u32 4294901760, %v6003_v32  ;;  %v6475_v8 = vsub.f32 %v6364_v38, %v12246_v46  ;;  %v6482_v0 = vand.u32 4294901760, %v12251_v43  ;;  %v12279_v7 = vand.u32 4294901760, %v6845_v52 }
 0x378   : > { %v6848_v50 = vsel %vm454_vm1, %v6840_v12, 0  ;;  %6242 = vmatpush1.msra.mxu0 %v6008_v6  ;;  %6275 = vmatprep.mubr.f32.mxu0 %v12890_v45  ;;  %v7320_v63 = vpop.permute.xlu1 %7319  ;;  %v7324_v16 = vsel %vm2933_vm5, 0.0, %v7318_v35  ;;  %v6921_v13 = vand.u32 4294901760, %v6920_v40  ;;  %v7804_v5 = vsel %vm450_vm0, %v5859_v29, 0  ;;  %v12900_v40 = vld [vmem:[#allocation20_spill] sm:$0xff] }
 0x379   : > { %6397 = vmatprep.subr.mxu0 %v12246_v46  ;;  %6005 = vmatprep.subr.mxu1 %v6004_v60  ;;  %v6476_v48 = vand.u32 4294901760, %v6475_v8  ;;  %v12267_v17 = vand.u32 4294901760, %v6848_v50  ;;  %v7321_v36 = vsel %vm2933_vm5, %v7318_v35, %v7320_v63  ;;  %v6483_v10 = vsub.f32 %v12251_v43, %v6482_v0 }
 0x37a   : > { %6011 = vmatpush1.msra.mxu1 %v6010_v24  ;;  %v12276_v14 = vpop.permute.xlu0 %8279  ;;  %v7326_v47 = vmul.f32 %v7321_v36, %v12889_v37  ;;  %v6965_v18 = vsub.f32 %v6845_v52, %v12279_v7  ;;  %v12351_v53 = vand.u32 4294901760, %v7804_v5  ;;  %v7808_v12 = vsel %vm454_vm1, %v12159_v28, 0  ;;  %v12893_v24 = vld [vmem:[#allocation11_spill] sm:$0xff] }
 0x37b   : > { %6046 = vmatmul.mubr.f32.vlgmr.msra.gmra.mxu1 %v12206_v20  ;;  %6160 = vmatprep.subr.mxu1 %v5922_v30  ;;  %v6477_v57 = vsub.f32 %v6475_v8, %v6476_v48  ;;  %v6959_v49 = vsub.f32 %v6848_v50, %v12267_v17  ;;  %v6484_v55 = vand.u32 4294901760, %v6483_v10  ;;  %v12366_v60 = vand.u32 4294901760, %v7808_v12 }
 0x37c   : > { %6277 = vmatmul.mubr.f32.vlgmr.msra.gmra.mxu0 %v12206_v20  ;;  %6162 = vmatpush1.msra.mxu1 %v12223_v9  ;;  %v7334_v56 = vsel %vm454_vm1, %v7326_v47, 0  ;;  %v7806_v28 = vsel %vm454_vm1, %v12157_v62, 0  ;;  %v8284_v50 = vsel %vm3894_vm6, %v12276_v14, 0.0  ;;  %v8278_v52 = vpop.permute.xlu1 %8277  ;;  %v12895_v62 = vld [vmem:[#allocation14_spill] sm:$0xff] }
 0x37d   : > { %6399 = vmatpush1.msra.mxu0 %v12240_v3  ;;  %6314 = vmatprep.subr.mxu1 %v5922_v30  ;;  %v6478_v21 = vand.u32 4294901760, %v6477_v57  ;;  %v7328_v30 = vsel %vm450_vm0, %v5858_v41, 0  ;;  %v12314_v6 = vand.u32 4294901760, %v7334_v56  ;;  %v12386_v10 = vand.u32 4294901760, %v7806_v28  ;;  %v5860_v41 = vld [vmem:[%s12805_s8 + $0x14] sm:$0xf] }
 0x37e   : > { %6558 = vmatprep.subr.mxu0 %v6475_v8  ;;  %6195 = vmatprep.mubr.f32.mxu1 %v12890_v45  ;;  %v12299_v34 = vpop.permute.xlu0 %8765  ;;  %v12308_v1 = vand.u32 4294901760, %v7328_v30  ;;  %v12371_v8 = vsub.f32 %v7804_v5, %v12351_v53 }
 0x37f   : > { %6432 = vmatprep.mubr.f32.mxu0 %v12890_v45  ;;  %6199 = vmatmul.mubr.f32.vlgmr.msra.gmra.mxu1 %v5961_v26  ;;  %v7325_v26 = vmul.f32 %v7324_v16, %v12888_v42  ;;  %v12337_v15 = vsub.f32 %v7334_v56, %v12314_v6  ;;  %v12396_v16 = vsub.f32 %v7808_v12, %v12366_v60 }
 0x380   : > { %6316 = vmatpush1.msra.mxu1 %v12223_v9  ;;  %6438 = vmatmul.mubr.f32.vlgmr.msra.gmra.mxu0 %v6437_v27  ;;  %v6960_v9 = vand.u32 4294901760, %v6959_v49  ;;  %v12321_v33 = vsub.f32 %v7328_v30, %v12308_v1  ;;  %v12896_v27 = vld [vmem:[#allocation16_spill] sm:$0xff]  ;;  %v7879_v47 = vand.u32 4294901760, %v12371_v8  ;;  %v8281_v30 = vsel %vm3894_vm6, %v8278_v52, %v12276_v14 }
 0x381   : > { %6561 = vmatpush1.msra.mxu0 %v12251_v43  ;;  %6479 = vmatprep.subr.mxu1 %v6478_v21  ;;  %v7331_v11 = vsel %vm454_vm1, %v7325_v26, 0  ;;  %v12898_v26 = vld [vmem:[#allocation15_spill] sm:$0xff] }
 0x382   : > { %6712 = vmatprep.subr.mxu0 %v6476_v48  ;;  %6349 = vmatprep.mubr.f32.mxu1 %v12890_v45  ;;  %v6961_v22 = vsub.f32 %v6959_v49, %v6960_v9  ;;  %v12323_v59 = vpop.permute.xlu0 %9251  ;;  %v12330_v38 = vand.u32 4294901760, %v7331_v11  ;;  %v12894_v48 = vld [vmem:[#allocation12_spill] sm:$0xff] }
 0x383   : > { %6594 = vmatprep.mubr.f32.mxu0 %v12890_v45  ;;  %6351 = vmatmul.mubr.f32.vlgmr.msra.gmra.mxu1 %v12206_v20  ;;  %v6966_v20 = vand.u32 4294901760, %v6965_v18 }
 0x384   : > { %6485 = vmatpush1.msra.mxu1 %v6484_v55  ;;  %6597 = vmatmul.mubr.f32.vlgmr.msra.gmra.mxu0 %v12231_v2  ;;  %v6962_v23 = vand.u32 4294901760, %v6961_v22  ;;  %v12343_v32 = vsub.f32 %v7331_v11, %v12330_v38  ;;  %v12410_v11 = vsub.f32 %v7806_v28, %v12386_v10  ;;  %v8285_v22 = vmul.f32 %v8281_v30, %v12892_v39 }
 0x385   : > { %6716 = vmatpush1.msra.mxu0 %v6482_v0  ;;  %6634 = vmatprep.subr.mxu1 %v12246_v46  ;;  %v6967_v58 = vsub.f32 %v6965_v18, %v6966_v20 }
 0x386   : > { %6881 = vmatprep.subr.mxu0 %v12267_v17  ;;  %6518 = vmatprep.mubr.f32.mxu1 %v12890_v45  ;;  %v7926_v12 = vand.u32 4294901760, %v12410_v11 }
 0x387   : > { %6749 = vmatprep.mubr.f32.mxu0 %v12890_v45  ;;  %6520 = vmatmul.mubr.f32.vlgmr.msra.gmra.mxu1 %v12221_v44  ;;  %v6968_v2 = vand.u32 4294901760, %v6967_v58  ;;  %v12901_v58 = vld [vmem:[#allocation17_spill] sm:$0xff] }
 0x388   : > { %6636 = vmatpush1.msra.mxu1 %v12240_v3  ;;  %6751 = vmatmul.mubr.f32.vlgmr.msra.gmra.mxu0 %v12221_v44 }
 0x389   : > { %6883 = vmatpush1.msra.mxu0 %v12279_v7  ;;  %6788 = vmatprep.subr.mxu1 %v12246_v46  ;;  %v7405_v46 = vand.u32 4294901760, %v12321_v33 }
 0x38a   : > { %7042 = vmatprep.subr.mxu0 %v6959_v49  ;;  %6669 = vmatprep.mubr.f32.mxu1 %v12890_v45  ;;  %v8286_v49 = vmul.f32 %v8284_v50, %v12891_v4 }
 0x38b   : > { %6916 = vmatprep.mubr.f32.mxu0 %v12890_v45  ;;  %6673 = vmatmul.mubr.f32.vlgmr.msra.gmra.mxu1 %v6435_v19  ;;  %v12346_v19 = vpop.permute.xlu0 %9733  ;;  %v7406_v43 = vsub.f32 %v12321_v33, %v7405_v46 }
 0x38c   : > { %6790 = vmatpush1.msra.mxu1 %v12240_v3  ;;  %6922 = vmatmul.mubr.f32.vlgmr.msra.gmra.mxu0 %v6921_v13  ;;  %v7446_v3 = vand.u32 4294901760, %v12337_v15  ;;  %v7920_v13 = vand.u32 4294901760, %v12396_v16  ;;  %v8294_v29 = vsel %vm454_vm1, %v8286_v49, 0 }
 0x38d   : > { %7045 = vmatpush1.msra.mxu0 %v6965_v18  ;;  %6963 = vmatprep.subr.mxu1 %v6962_v23  ;;  %v7407_v0 = vand.u32 4294901760, %v7406_v43  ;;  %v12897_v18 = vld [vmem:[#allocation13_spill] sm:$0xff] }
 0x38e   : > { %7196 = vmatprep.subr.mxu0 %v6960_v9  ;;  %6823 = vmatprep.mubr.f32.mxu1 %v12890_v45  ;;  %v7447_v35 = vsub.f32 %v12337_v15, %v7446_v3 }
 0x38f   : > { %7078 = vmatprep.mubr.f32.mxu0 %v12890_v45  ;;  %6825 = vmatmul.mubr.f32.vlgmr.msra.gmra.mxu1 %v12221_v44  ;;  %v7452_v44 = vand.u32 4294901760, %v12343_v32 }
 0x390   : > { %6969 = vmatpush1.msra.mxu1 %v6968_v2  ;;  %7081 = vmatmul.mubr.f32.vlgmr.msra.gmra.mxu0 %v12273_v31  ;;  %v8288_v31 = vsel %vm450_vm0, %v5860_v41, 0 }
 0x391   : > { %7200 = vmatpush1.msra.mxu0 %v6966_v20  ;;  %7118 = vmatprep.subr.mxu1 %v12267_v17  ;;  %v7453_v21 = vsub.f32 %v12343_v32, %v7452_v44 }
 0x392   : > { %7367 = vmatprep.subr.mxu0 %v12314_v6  ;;  %7002 = vmatprep.mubr.f32.mxu1 %v12890_v45 }
 0x393   : > { %7233 = vmatprep.mubr.f32.mxu0 %v12890_v45  ;;  %v943_v51 = vpop.permute.xlu0 %942  ;;  %7004 = vmatmul.mubr.f32.vlgmr.msra.gmra.mxu1 %v12262_v61  ;;  %v7454_v14 = vand.u32 4294901760, %v7453_v21 }
 0x394   : > { %v1022_v25 = vadd.f32 %v12893_v24, %v943_v51  ;;  %v1024_v63 = vadd.f32 %v12894_v48, %v943_v51  ;;  %7120 = vmatpush1.msra.mxu1 %v12279_v7  ;;  %7235 = vmatmul.mubr.f32.vlgmr.msra.gmra.mxu0 %v12262_v61  ;;  %v12435_v51 = vand.u32 4294901760, %v8294_v29  ;;  %v8770_v48 = vsel %vm4381_vm7, %v12299_v34, 0.0 }
 0x395   : > { %7369 = vmatpush1.msra.mxu0 %v12330_v38  ;;  %7272 = vmatprep.subr.mxu1 %v12267_v17  ;;  %v7448_v17 = vand.u32 4294901760, %v7447_v35  ;;  %v8291_v35 = vsel %vm454_vm1, %v8285_v22, 0  ;;  %v8772_v21 = vmul.f32 %v8770_v48, %v12889_v37 }
 0x396   : > { %v1104_v57 = vadd.f32 %v12895_v62, %v1022_v25  ;;  %v1106_v36 = vadd.f32 %v12896_v27, %v1024_v63  ;;  %7528 = vmatprep.subr.mxu0 %v12337_v15  ;;  %7153 = vmatprep.mubr.f32.mxu1 %v12890_v45  ;;  %v12902_v15 = vld [vmem:[#allocation19_spill] sm:$0xff]  ;;  %v8764_v63 = vpop.permute.xlu1 %8763  ;;  %v12455_v52 = vand.u32 4294901760, %v8291_v35 }
 0x397   : > { %7402 = vmatprep.mubr.f32.mxu0 %v12890_v45  ;;  %7157 = vmatmul.mubr.f32.vlgmr.msra.gmra.mxu1 %v6919_v54  ;;  %v12899_v54 = vld [vmem:[#allocation18_spill] sm:$0xff]  ;;  %v8767_v41 = vsel %vm4381_vm7, %v8764_v63, %v12299_v34  ;;  %v5863_v63 = vld [vmem:[%s12805_s8 + $0x20] sm:$0xf] }
 0x398   : > { %v1181_v55 = vadd.f32 %v12897_v18, %v1104_v57  ;;  %v1183_v9 = vadd.f32 %v12898_v26, %v1106_v36  ;;  %7274 = vmatpush1.msra.mxu1 %v12279_v7  ;;  %7408 = vmatmul.mubr.f32.vlgmr.msra.gmra.mxu0 %v7407_v0  ;;  %v7880_v7 = vsub.f32 %v12371_v8, %v7879_v47  ;;  %v5861_v0 = vld [vmem:[%s12805_s8 + $0x18] sm:$0xf] }
 0x399   : > { %7531 = vmatpush1.msra.mxu0 %v12343_v32  ;;  %7449 = vmatprep.subr.mxu1 %v7448_v17  ;;  %v12423_v32 = vand.u32 4294901760, %v8288_v31  ;;  %v7927_v57 = vsub.f32 %v12410_v11, %v7926_v12  ;;  %v8405_v36 = vsub.f32 %v8294_v29, %v12435_v51  ;;  %v8774_v17 = vsel %vm450_vm0, %v5861_v0, 0 }
 0x39a   : > { %v1257_v56 = vadd.f32 %v12899_v54, %v1181_v55  ;;  %v1259_v20 = vadd.f32 %v12900_v40, %v1183_v9  ;;  %7682 = vmatprep.subr.mxu0 %v7446_v3  ;;  %7307 = vmatprep.mubr.f32.mxu1 %v12890_v45  ;;  %v12904_v3 = vld [vmem:[#allocation22_spill] sm:$0xff]  ;;  %v7881_v24 = vand.u32 4294901760, %v7880_v7  ;;  %v8771_v34 = vmul.f32 %v8767_v41, %v12888_v42 }
 0x39b   : > { %7564 = vmatprep.mubr.f32.mxu0 %v12890_v45  ;;  %7309 = vmatmul.mubr.f32.vlgmr.msra.gmra.mxu1 %v12262_v61  ;;  %v12903_v61 = vld [vmem:[#allocation21_spill] sm:$0xff]  ;;  %v12446_v25 = vsub.f32 %v8288_v31, %v12423_v32  ;;  %v7928_v37 = vand.u32 4294901760, %v7927_v57 }
 0x39c   : > { %v1335_v23 = vadd.f32 %v12901_v58, %v1257_v56  ;;  %v1337_v5 = vadd.f32 %v12902_v15, %v1259_v20  ;;  %7455 = vmatpush1.msra.mxu1 %v7454_v14  ;;  %7567 = vmatmul.mubr.f32.vlgmr.msra.gmra.mxu0 %v12321_v33  ;;  %v12472_v33 = vsub.f32 %v8291_v35, %v12455_v52  ;;  %v8777_v18 = vsel %vm454_vm1, %v8771_v34, 0  ;;  %v5862_v56 = vld [vmem:[%s12805_s8 + $0x1c] sm:$0xf] }
 0x39d   : > { %7686 = vmatpush1.msra.mxu0 %v7452_v44  ;;  %7604 = vmatprep.subr.mxu1 %v12314_v6  ;;  %v7921_v44 = vsub.f32 %v12396_v16, %v7920_v13  ;;  %v8365_v49 = vand.u32 4294901760, %v12446_v25  ;;  %v12501_v31 = vand.u32 4294901760, %v8777_v18  ;;  %v9255_v14 = vsel %vm4868_vm8, %v12323_v59, 0.0 }
 0x39e   : > { %v12427_v2 = vadd.f32 %v12903_v61, %v1335_v23  ;;  %v12430_v43 = vadd.f32 %v12904_v3, %v1337_v5  ;;  %7841 = vmatprep.subr.mxu0 %v12366_v60  ;;  %7488 = vmatprep.mubr.f32.mxu1 %v12890_v45  ;;  %v8412_v42 = vand.u32 4294901760, %v12472_v33  ;;  %v9257_v22 = vsel %vm450_vm0, %v5862_v56, 0 }
 0x39f   : > { %7719 = vmatprep.mubr.f32.mxu0 %v12890_v45  ;;  %7490 = vmatmul.mubr.f32.vlgmr.msra.gmra.mxu1 %v12308_v1  ;;  %v8366_v30 = vsub.f32 %v12446_v25, %v8365_v49  ;;  %v9262_v58 = vsel %vm454_vm1, %v9255_v14, 0  ;;  %v12534_v5 = vand.u32 4294901760, %v9257_v22 }
 0x3a0   : > { %v1413_v28 = vsub.f32 0.0, %v12427_v2  ;;  %v1414_v50 = vsub.f32 0.0, %v12430_v43  ;;  %7606 = vmatpush1.msra.mxu1 %v12330_v38  ;;  %7721 = vmatmul.mubr.f32.vlgmr.msra.gmra.mxu0 %v12308_v1  ;;  %v8413_v54 = vsub.f32 %v12472_v33, %v8412_v42  ;;  %v12540_v61 = vand.u32 4294901760, %v9262_v58 }
 0x3a1   : > { %7843 = vmatpush1.msra.mxu0 %v12386_v10  ;;  %7758 = vmatprep.subr.mxu1 %v12314_v6  ;;  %v7922_v6 = vand.u32 4294901760, %v7921_v44  ;;  %v8367_v9 = vand.u32 4294901760, %v8366_v30  ;;  %v12549_v44 = vsub.f32 %v9257_v22, %v12534_v5  ;;  %v10241_v30 = vld [vmem:[%s12808_s11] sm:$0xff] }
 0x3a2   : > { %v1417_v62 = vmul.f32 1.442695, %v1414_v50  ;;  %8002 = vmatprep.subr.mxu0 %v12396_v16  ;;  %7639 = vmatprep.mubr.f32.mxu1 %v12890_v45  ;;  %v1415_v27 = vmul.f32 1.442695, %v1413_v28  ;;  %v8780_v16 = vsel %vm454_vm1, %v8772_v21, 0  ;;  %v8414_v7 = vand.u32 4294901760, %v8413_v54 }
 0x3a3   : > { %7876 = vmatprep.mubr.f32.mxu0 %v12890_v45  ;;  %7643 = vmatmul.mubr.f32.vlgmr.msra.gmra.mxu1 %v7405_v46  ;;  %v12478_v46 = vand.u32 4294901760, %v8774_v17  ;;  %v9738_v28 = vsel %vm5351_vm9, %v12346_v19, 0.0  ;;  %v9373_v0 = vsub.f32 %v9262_v58, %v12540_v61  ;;  %v10243_v54 = vsel %vm450_vm0, %v10241_v30, 0 }
 0x3a4   : > { %7760 = vmatpush1.msra.mxu1 %v12330_v38  ;;  %7882 = vmatmul.mubr.f32.vlgmr.msra.gmra.mxu0 %v7881_v24  ;;  %11370 = vpow2.f32 %v1417_v62  ;;  %v8406_v38 = vand.u32 4294901760, %v8405_v36  ;;  %v9740_v62 = vmul.f32 %v9738_v28, %v12891_v4 }
 0x3a5   : > { %8005 = vmatpush1.msra.mxu0 %v12410_v11  ;;  %7923 = vmatprep.subr.mxu1 %v7922_v6  ;;  %11372 = vpow2.f32 %v1415_v27  ;;  %v12495_v26 = vsub.f32 %v8774_v17, %v12478_v46  ;;  %v9250_v11 = vpop.permute.xlu1 %9249  ;;  %v9333_v27 = vand.u32 4294901760, %v12549_v44  ;;  %v9742_v6 = vsel %vm450_vm0, %v5863_v63, 0 }
 0x3a6   : > { %8156 = vmatprep.subr.mxu0 %v7920_v13  ;;  %7793 = vmatprep.mubr.f32.mxu1 %v12890_v45  ;;  %v8407_v55 = vsub.f32 %v8405_v36, %v8406_v38  ;;  %v9253_v23 = vsel %vm4868_vm8, %v9250_v11, %v12323_v59  ;;  %v12584_v41 = vand.u32 4294901760, %v9742_v6 }
 0x3a7   : > { %8038 = vmatprep.mubr.f32.mxu0 %v12890_v45  ;;  %7795 = vmatmul.mubr.f32.vlgmr.msra.gmra.mxu1 %v12308_v1  ;;  %v12489_v1 = vand.u32 4294901760, %v8780_v16  ;;  %v9259_v3 = vsel %vm454_vm1, %v9253_v23, 0  ;;  %v9334_v21 = vsub.f32 %v12549_v44, %v9333_v27 }
 0x3a8   : > { %7929 = vmatpush1.msra.mxu1 %v7928_v37  ;;  %8041 = vmatmul.mubr.f32.vlgmr.msra.gmra.mxu0 %v12371_v8  ;;  %v8408_v40 = vand.u32 4294901760, %v8407_v55  ;;  %v12555_v24 = vand.u32 4294901760, %v9259_v3  ;;  %v12597_v37 = vsub.f32 %v9742_v6, %v12584_v41 }
 0x3a9   : > { %8160 = vmatpush1.msra.mxu0 %v7926_v12  ;;  %8078 = vmatprep.subr.mxu1 %v12366_v60  ;;  %v12512_v20 = vsub.f32 %v8780_v16, %v12489_v1  ;;  %v9732_v50 = vpop.permute.xlu1 %9731 }
 0x3aa   : > { %8327 = vmatprep.subr.mxu0 %v12435_v51  ;;  %7962 = vmatprep.mubr.f32.mxu1 %v12890_v45  ;;  %v9735_v57 = vsel %vm5351_vm9, %v9732_v50, %v12346_v19  ;;  %v9374_v19 = vand.u32 4294901760, %v9373_v0 }
 0x3ab   : > { %8193 = vmatprep.mubr.f32.mxu0 %v12890_v45  ;;  %7964 = vmatmul.mubr.f32.vlgmr.msra.gmra.mxu1 %v12351_v53  ;;  %v8892_v13 = vand.u32 4294901760, %v12512_v20  ;;  %v9739_v4 = vmul.f32 %v9735_v57, %v12892_v39 }
 0x3ac   : > { %8080 = vmatpush1.msra.mxu1 %v12386_v10  ;;  %8195 = vmatmul.mubr.f32.vlgmr.msra.gmra.mxu0 %v12351_v53  ;;  %v9375_v17 = vsub.f32 %v9373_v0, %v9374_v19 }
 0x3ad   : > { %8329 = vmatpush1.msra.mxu0 %v12455_v52  ;;  %8232 = vmatprep.subr.mxu1 %v12366_v60  ;;  %v8851_v60 = vand.u32 4294901760, %v12495_v26  ;;  %v8893_v12 = vsub.f32 %v12512_v20, %v8892_v13 }
 0x3ae   : > { %8488 = vmatprep.subr.mxu0 %v8405_v36  ;;  %8113 = vmatprep.mubr.f32.mxu1 %v12890_v45  ;;  %v9379_v36 = vsub.f32 %v9259_v3, %v12555_v24 }
 0x3af   : > { %8362 = vmatprep.mubr.f32.mxu0 %v12890_v45  ;;  %8117 = vmatmul.mubr.f32.vlgmr.msra.gmra.mxu1 %v7879_v47  ;;  %v12521_v47 = vsub.f32 %v8777_v18, %v12501_v31 }
 0x3b0   : > { %8234 = vmatpush1.msra.mxu1 %v12386_v10  ;;  %8368 = vmatmul.mubr.f32.vlgmr.msra.gmra.mxu0 %v8367_v9  ;;  %v8852_v10 = vsub.f32 %v12495_v26, %v8851_v60  ;;  %v9380_v39 = vand.u32 4294901760, %v9379_v36 }
 0x3b1   : > { %8491 = vmatpush1.msra.mxu0 %v12472_v33  ;;  %8409 = vmatprep.subr.mxu1 %v8408_v40  ;;  %v11371_v8 = vpop.eup %11370  ;;  %v9335_v33 = vand.u32 4294901760, %v9334_v21 }
 0x3b2   : > { %8642 = vmatprep.subr.mxu0 %v8406_v38  ;;  %8267 = vmatprep.mubr.f32.mxu1 %v12890_v45  ;;  %v11373_v29 = vpop.eup %11372  ;;  %v1420_v15 = vadd.f32 1.0, %v11371_v8  ;;  %v8853_v35 = vand.u32 4294901760, %v8852_v10  ;;  %v9381_v16 = vsub.f32 %v9379_v36, %v9380_v39 }
 0x3b3   : > { %8524 = vmatprep.mubr.f32.mxu0 %v12890_v45  ;;  %8269 = vmatmul.mubr.f32.vlgmr.msra.gmra.mxu1 %v12351_v53  ;;  %v8898_v53 = vand.u32 4294901760, %v12521_v47  ;;  %v1419_v59 = vadd.f32 1.0, %v11373_v29 }
 0x3b4   : > { %8415 = vmatpush1.msra.mxu1 %v8414_v7  ;;  %8527 = vmatmul.mubr.f32.vlgmr.msra.gmra.mxu0 %v12446_v25  ;;  %11374 = vrcp.f32 %v1420_v15 }
 0x3b5   : > { %8646 = vmatpush1.msra.mxu0 %v8412_v42  ;;  %8564 = vmatprep.subr.mxu1 %v12435_v51  ;;  %v8899_v48 = vsub.f32 %v12521_v47, %v8898_v53  ;;  %11376 = vrcp.f32 %v1419_v59  ;;  %v9376_v42 = vand.u32 4294901760, %v9375_v17 }
 0x3b6   : > { %8813 = vmatprep.subr.mxu0 %v12489_v1  ;;  %8448 = vmatprep.mubr.f32.mxu1 %v12890_v45 }
 0x3b7   : > { %8679 = vmatprep.mubr.f32.mxu0 %v12890_v45  ;;  %8450 = vmatmul.mubr.f32.vlgmr.msra.gmra.mxu1 %v12423_v32  ;;  %v8900_v25 = vand.u32 4294901760, %v8899_v48 }
 0x3b8   : > { %8566 = vmatpush1.msra.mxu1 %v12455_v52  ;;  %8681 = vmatmul.mubr.f32.vlgmr.msra.gmra.mxu0 %v12423_v32 }
 0x3b9   : > { %8815 = vmatpush1.msra.mxu0 %v12501_v31  ;;  %8718 = vmatprep.subr.mxu1 %v12435_v51  ;;  %v8894_v51 = vand.u32 4294901760, %v8893_v12 }
 0x3ba   : > { %8974 = vmatprep.subr.mxu0 %v12512_v20  ;;  %8599 = vmatprep.mubr.f32.mxu1 %v12890_v45 }
 0x3bb   : > { %8848 = vmatprep.mubr.f32.mxu0 %v12890_v45  ;;  %8603 = vmatmul.mubr.f32.vlgmr.msra.gmra.mxu1 %v8365_v49  ;;  %v9745_v49 = vsel %vm454_vm1, %v9739_v4, 0 }
 0x3bc   : > { %8720 = vmatpush1.msra.mxu1 %v12455_v52  ;;  %8854 = vmatmul.mubr.f32.vlgmr.msra.gmra.mxu0 %v8853_v35  ;;  %v9748_v52 = vsel %vm454_vm1, %v9740_v62, 0  ;;  %v12601_v38 = vand.u32 4294901760, %v9745_v49 }
 0x3bd   : > { %8977 = vmatpush1.msra.mxu0 %v12521_v47  ;;  %8895 = vmatprep.subr.mxu1 %v8894_v51 }
 0x3be   : > { %9128 = vmatprep.subr.mxu0 %v8892_v13  ;;  %8753 = vmatprep.mubr.f32.mxu1 %v12890_v45  ;;  %v9865_v56 = vsub.f32 %v9745_v49, %v12601_v38 }
 0x3bf   : > { %9010 = vmatprep.mubr.f32.mxu0 %v12890_v45  ;;  %8755 = vmatmul.mubr.f32.vlgmr.msra.gmra.mxu1 %v12423_v32  ;;  %v12589_v32 = vand.u32 4294901760, %v9748_v52 }
 0x3c0   : > { %8901 = vmatpush1.msra.mxu1 %v8900_v25  ;;  %9013 = vmatmul.mubr.f32.vlgmr.msra.gmra.mxu0 %v12495_v26  ;;  %v9382_v26 = vand.u32 4294901760, %v9381_v16 }
 0x3c1   : > { %9132 = vmatpush1.msra.mxu0 %v8898_v53  ;;  %9050 = vmatprep.subr.mxu1 %v12489_v1  ;;  %v11375_v34 = vpop.eup %11374  ;;  %v9859_v18 = vsub.f32 %v9748_v52, %v12589_v32 }
 0x3c2   : > { %9295 = vmatprep.subr.mxu0 %v12540_v61  ;;  %8934 = vmatprep.mubr.f32.mxu1 %v12890_v45  ;;  %v11377_v55 = vpop.eup %11376  ;;  %v1426_v9 = vmul.f32 %v11375_v34, %v12430_v43 }
 0x3c3   : > { %9165 = vmatprep.mubr.f32.mxu0 %v12890_v45  ;;  %8936 = vmatmul.mubr.f32.vlgmr.msra.gmra.mxu1 %v12478_v46  ;;  %v1425_v40 = vmul.f32 %v11377_v55, %v12427_v2 }
 0x3c4   : > { %9052 = vmatpush1.msra.mxu1 %v12501_v31  ;;  %9167 = vmatmul.mubr.f32.vlgmr.msra.gmra.mxu0 %v12478_v46  ;;  %v10249_v20 = vsel %vm454_vm1, %v1426_v9, 0 }
 0x3c5   : > { %9297 = vmatpush1.msra.mxu0 %v12555_v24  ;;  %9204 = vmatprep.subr.mxu1 %v12489_v1  ;;  %v9819_v1 = vand.u32 4294901760, %v12597_v37  ;;  %v12632_v14 = vand.u32 4294901760, %v10249_v20  ;;  %v10246_v11 = vsel %vm454_vm1, %v1425_v40, 0 }
 0x3c6   : > { %9456 = vmatprep.subr.mxu0 %v9373_v0  ;;  %9085 = vmatprep.mubr.f32.mxu1 %v12890_v45  ;;  %v10283_v7 = vand.u32 4294901760, %v10246_v11 }
 0x3c7   : > { %9330 = vmatprep.mubr.f32.mxu0 %v12890_v45  ;;  %9089 = vmatmul.mubr.f32.vlgmr.msra.gmra.mxu1 %v8851_v60  ;;  %v9820_v43 = vsub.f32 %v12597_v37, %v9819_v1  ;;  %v12625_v60 = vand.u32 4294901760, %v10243_v54  ;;  %v10360_v13 = vsub.f32 %v10249_v20, %v12632_v14 }
 0x3c8   : > { %9206 = vmatpush1.msra.mxu1 %v12501_v31  ;;  %9336 = vmatmul.mubr.f32.vlgmr.msra.gmra.mxu0 %v9335_v33  ;;  %v9860_v31 = vand.u32 4294901760, %v9859_v18  ;;  %v10366_v23 = vsub.f32 %v10246_v11, %v10283_v7 }
 0x3c9   : > { %9459 = vmatpush1.msra.mxu0 %v9379_v36  ;;  %9377 = vmatprep.subr.mxu1 %v9376_v42  ;;  %v9821_v22 = vand.u32 4294901760, %v9820_v43  ;;  %v12638_v8 = vsub.f32 %v10243_v54, %v12625_v60  ;;  %v10361_v15 = vand.u32 4294901760, %v10360_v13 }
 0x3ca   : > { %9610 = vmatprep.subr.mxu0 %v9374_v19  ;;  %9239 = vmatprep.mubr.f32.mxu1 %v12890_v45  ;;  %v9861_v2 = vsub.f32 %v9859_v18, %v9860_v31 }
 0x3cb   : > { %9492 = vmatprep.mubr.f32.mxu0 %v12890_v45  ;;  %9241 = vmatmul.mubr.f32.vlgmr.msra.gmra.mxu1 %v12478_v46  ;;  %v9866_v46 = vand.u32 4294901760, %v9865_v56  ;;  %v10320_v29 = vand.u32 4294901760, %v12638_v8  ;;  %v10362_v3 = vsub.f32 %v10360_v13, %v10361_v15 }
 0x3cc   : > { %9383 = vmatpush1.msra.mxu1 %v9382_v26  ;;  %9495 = vmatmul.mubr.f32.vlgmr.msra.gmra.mxu0 %v12549_v44  ;;  %v9862_v10 = vand.u32 4294901760, %v9861_v2 }
 0x3cd   : > { %9614 = vmatpush1.msra.mxu0 %v9380_v39  ;;  %9532 = vmatprep.subr.mxu1 %v12540_v61  ;;  %v9867_v47 = vsub.f32 %v9865_v56, %v9866_v46  ;;  %v10321_v53 = vsub.f32 %v12638_v8, %v10320_v29  ;;  %v10363_v12 = vand.u32 4294901760, %v10362_v3 }
 0x3ce   : > { %9781 = vmatprep.subr.mxu0 %v12589_v32  ;;  %9416 = vmatprep.mubr.f32.mxu1 %v12890_v45 }
 0x3cf   : > { %9647 = vmatprep.mubr.f32.mxu0 %v12890_v45  ;;  %9418 = vmatmul.mubr.f32.vlgmr.msra.gmra.mxu1 %v12534_v5  ;;  %v9868_v58 = vand.u32 4294901760, %v9867_v47 }
 0x3d0   : > { %9534 = vmatpush1.msra.mxu1 %v12555_v24  ;;  %9649 = vmatmul.mubr.f32.vlgmr.msra.gmra.mxu0 %v12534_v5 }
 0x3d1   : > { %9783 = vmatpush1.msra.mxu0 %v12601_v38  ;;  %9686 = vmatprep.subr.mxu1 %v12540_v61  ;;  %v10367_v61 = vand.u32 4294901760, %v10366_v23 }
 0x3d2   : > { %9942 = vmatprep.subr.mxu0 %v9859_v18  ;;  %9567 = vmatprep.mubr.f32.mxu1 %v12890_v45 }
 0x3d3   : > { %9816 = vmatprep.mubr.f32.mxu0 %v12890_v45  ;;  %9571 = vmatmul.mubr.f32.vlgmr.msra.gmra.mxu1 %v9333_v27  ;;  %v10368_v59 = vsub.f32 %v10366_v23, %v10367_v61 }
 0x3d4   : > { %9688 = vmatpush1.msra.mxu1 %v12555_v24  ;;  %9822 = vmatmul.mubr.f32.vlgmr.msra.gmra.mxu0 %v9821_v22 }
 0x3d5   : > { %9945 = vmatpush1.msra.mxu0 %v9865_v56  ;;  %9863 = vmatprep.subr.mxu1 %v9862_v10  ;;  %v10369_v35 = vand.u32 4294901760, %v10368_v59 }
 0x3d6   : > { %10096 = vmatprep.subr.mxu0 %v9860_v31  ;;  %9721 = vmatprep.mubr.f32.mxu1 %v12890_v45 }
 0x3d7   : > { %9978 = vmatprep.mubr.f32.mxu0 %v12890_v45  ;;  %9723 = vmatmul.mubr.f32.vlgmr.msra.gmra.mxu1 %v12534_v5  ;;  %v10322_v5 = vand.u32 4294901760, %v10321_v53 }
 0x3d8   : > { %9869 = vmatpush1.msra.mxu1 %v9868_v58  ;;  %9981 = vmatmul.mubr.f32.vlgmr.msra.gmra.mxu0 %v12597_v37 }
 0x3d9   : > { %10100 = vmatpush1.msra.mxu0 %v9866_v46  ;;  %10018 = vmatprep.subr.mxu1 %v12589_v32 }
 0x3da   : > { %10282 = vmatprep.subr.mxu0 %v12632_v14  ;;  %9902 = vmatprep.mubr.f32.mxu1 %v12890_v45 }
 0x3db   : > { %10133 = vmatprep.mubr.f32.mxu0 %v12890_v45  ;;  %9904 = vmatmul.mubr.f32.vlgmr.msra.gmra.mxu1 %v12584_v41 }
 0x3dc   : > { %10020 = vmatpush1.msra.mxu1 %v12601_v38  ;;  %10135 = vmatmul.mubr.f32.vlgmr.msra.gmra.mxu0 %v12584_v41 }
 0x3dd   : > { %10284 = vmatpush1.msra.mxu0 %v10283_v7  ;;  %10172 = vmatprep.subr.mxu1 %v12589_v32 }
 0x3de   : > { %10443 = vmatprep.subr.mxu0 %v10360_v13  ;;  %10053 = vmatprep.mubr.f32.mxu1 %v12890_v45 }
 0x3df   : > { %10317 = vmatprep.mubr.f32.mxu0 %v12890_v45  ;;  %10057 = vmatmul.mubr.f32.vlgmr.msra.gmra.mxu1 %v9819_v1 }
 0x3e0   : > { %10174 = vmatpush1.msra.mxu1 %v12601_v38  ;;  %10323 = vmatmul.mubr.f32.vlgmr.msra.gmra.mxu0 %v10322_v5 }
 0x3e1   : > { %10446 = vmatpush1.msra.mxu0 %v10366_v23  ;;  %10364 = vmatprep.subr.mxu1 %v10363_v12 }
 0x3e2   : > { %10597 = vmatprep.subr.mxu0 %v10361_v15  ;;  %10207 = vmatprep.mubr.f32.mxu1 %v12890_v45 }
 0x3e3   : > { %10479 = vmatprep.mubr.f32.mxu0 %v12890_v45  ;;  %10209 = vmatmul.mubr.f32.vlgmr.msra.gmra.mxu1 %v12584_v41 }
 0x3e4   : > { %10370 = vmatpush1.msra.mxu1 %v10369_v35  ;;  %10482 = vmatmul.mubr.f32.vlgmr.msra.gmra.mxu0 %v12638_v8 }
 0x3e5   : > { %10601 = vmatpush1.msra.mxu0 %v10367_v61  ;;  %10519 = vmatprep.subr.mxu1 %v12632_v14 }
 0x3e6   : > { %10403 = vmatprep.mubr.f32.mxu1 %v12890_v45  ;;  %10634 = vmatprep.mubr.f32.mxu0 %v12890_v45 }
 0x3e7   : > { %10405 = vmatmul.mubr.f32.vlgmr.msra.gmra.mxu1 %v12625_v60 }
 0x3e8   : > { %10521 = vmatpush1.msra.mxu1 %v10283_v7  ;;  %10554 = vmatprep.mubr.f32.mxu1 %v12890_v45 }
 0x3e9   : > { %10673 = vmatprep.subr.mxu1 %v12632_v14  ;;  %10636 = vmatmul.mubr.f32.vlgmr.msra.gmra.mxu0 %v12625_v60 }
 0x3ea   : > { %10791 = vmatprep.mubr.f32.mxu0 %v12890_v45 }
 0x3eb   : > { %10558 = vmatmul.mubr.f32.vlgmr.msra.gmra.mxu1 %v10320_v29 }
 0x3ec   : > { %10675 = vmatpush1.msra.mxu1 %v10283_v7  ;;  %10708 = vmatprep.mubr.f32.mxu1 %v12890_v45 }
 0x3ef   : > { %10710 = vmatmul.mubr.f32.vlgmr.msra.gmra.mxu1 %v12625_v60 }
 0x3f0   : > { %10877 = vmatprep.mubr.f32.mxu1 %v12890_v45 }
 0x433   : > { %v5965_v44 = vpop.f32.mrf.mxu0 }
 0x435   : > { %v5967_v28 = vpop.f32.mrf.mxu0 }
 0x437   : > { %v6124_v50 = vpop.f32.mrf.mxu0 }
 0x439   : > { %v6126_v24 = vpop.f32.mrf.mxu0 }
 0x43b   : > { %v6047_v48 = vpop.f32.mrf.mxu1 }
 0x43c   : > { %v6048_v63 = vadd.f32 %v6047_v48, %v5965_v44  ;;  %v6278_v0 = vpop.f32.mrf.mxu0 }
 0x43d   : > { %v6049_v51 = vpop.f32.mrf.mxu1 }
 0x43e   : > { %v6125_v62 = vadd.f32 %v6124_v50, %v6048_v63  ;;  %v6050_v57 = vadd.f32 %v6049_v51, %v5967_v28  ;;  %v6280_v27 = vpop.f32.mrf.mxu0 }
 0x43f   : > { %v6200_v6 = vpop.f32.mrf.mxu1 }
 0x440   : > { %v6127_v36 = vadd.f32 %v6126_v24, %v6050_v57  ;;  %v6201_v25 = vadd.f32 %v6200_v6, %v6125_v62  ;;  %v6439_v4 = vpop.f32.mrf.mxu0 }
 0x441   : > { %v6202_v19 = vpop.f32.mrf.mxu1 }
 0x442   : > { %v6279_v52 = vadd.f32 %v6278_v0, %v6201_v25  ;;  %v6203_v21 = vadd.f32 %v6202_v19, %v6127_v36  ;;  %v6441_v41 = vpop.f32.mrf.mxu0 }
 0x443   : > { %v6352_v39 = vpop.f32.mrf.mxu1 }
 0x444   : > { %v6281_v32 = vadd.f32 %v6280_v27, %v6203_v21  ;;  %v6353_v49 = vadd.f32 %v6352_v39, %v6279_v52  ;;  %v6598_v17 = vpop.f32.mrf.mxu0 }
 0x445   : > { %v6354_v33 = vpop.f32.mrf.mxu1 }
 0x446   : > { %v6440_v37 = vadd.f32 %v6439_v4, %v6353_v49  ;;  %v6355_v34 = vadd.f32 %v6354_v33, %v6281_v32  ;;  %v6600_v38 = vpop.f32.mrf.mxu0 }
 0x447   : > { %v6521_v16 = vpop.f32.mrf.mxu1 }
 0x448   : > { %v6442_v30 = vadd.f32 %v6441_v41, %v6355_v34  ;;  %v6522_v42 = vadd.f32 %v6521_v16, %v6440_v37  ;;  %v6752_v18 = vpop.f32.mrf.mxu0 }
 0x449   : > { %v6523_v55 = vpop.f32.mrf.mxu1 }
 0x44a   : > { %v6599_v1 = vadd.f32 %v6598_v17, %v6522_v42  ;;  %v6524_v9 = vadd.f32 %v6523_v55, %v6442_v30  ;;  %v6754_v54 = vpop.f32.mrf.mxu0 }
 0x44b   : > { %v6674_v56 = vpop.f32.mrf.mxu1 }
 0x44c   : > { %v6601_v26 = vadd.f32 %v6600_v38, %v6524_v9  ;;  %v6675_v31 = vadd.f32 %v6674_v56, %v6599_v1  ;;  %v6923_v40 = vpop.f32.mrf.mxu0 }
 0x44d   : > { %v6676_v43 = vpop.f32.mrf.mxu1 }
 0x44e   : > { %v6753_v20 = vadd.f32 %v6752_v18, %v6675_v31  ;;  %v6677_v60 = vadd.f32 %v6676_v43, %v6601_v26  ;;  %v12682_v46 = vpop.f32.mrf.mxu0 }
 0x44f   : > { %v6826_v2 = vpop.f32.mrf.mxu1 }
 0x450   : > { %v6755_v14 = vadd.f32 %v6754_v54, %v6677_v60  ;;  %v6827_v11 = vadd.f32 %v6826_v2, %v6753_v20  ;;  %v7082_v22 = vpop.f32.mrf.mxu0 }
 0x451   : > { %v6828_v8 = vpop.f32.mrf.mxu1 }
 0x452   : > { %v12684_v47 = vadd.f32 %v6828_v8, %v6755_v14  ;;  %v12686_v7 = vpop.f32.mrf.mxu0 }
 0x453   : > { %v7005_v10 = vpop.f32.mrf.mxu1 }
 0x454   : > { %12905 = vst [vmem:[#allocation24_spill] sm:$0xff] %v12684_v47  ;;  %v7006_v13 = vadd.f32 %v7005_v10, %v6923_v40  ;;  %v7236_v29 = vpop.f32.mrf.mxu0 }
 0x455   : > { %v7007_v58 = vpop.f32.mrf.mxu1 }
 0x456   : > { %v7083_v23 = vadd.f32 %v7082_v22, %v7006_v13  ;;  %v12688_v15 = vpop.f32.mrf.mxu0  ;;  %v7008_v22 = vadd.f32 %v7007_v58, %v12682_v46 }
 0x457   : > { %v7158_v53 = vpop.f32.mrf.mxu1 }
 0x458   : > { %v7159_v61 = vadd.f32 %v7158_v53, %v7083_v23  ;;  %v7409_v3 = vpop.f32.mrf.mxu0 }
 0x459   : > { %v12690_v5 = vpop.f32.mrf.mxu1 }
 0x45a   : > { %v7237_v59 = vadd.f32 %v7236_v29, %v7159_v61  ;;  %v7411_v12 = vpop.f32.mrf.mxu0 }
 0x45b   : > { %v7310_v35 = vpop.f32.mrf.mxu1 }
 0x45c   : > { %v7311_v44 = vadd.f32 %v7310_v35, %v7237_v59  ;;  %v7568_v28 = vpop.f32.mrf.mxu0  ;;  %v7085_v59 = vadd.f32 %v12686_v7, %v7008_v22 }
 0x45d   : > { %v12692_v50 = vpop.f32.mrf.mxu1 }
 0x45e   : > { %v12694_v24 = vadd.f32 %v7311_v44, %v6827_v11  ;;  %v7570_v48 = vpop.f32.mrf.mxu0 }
 0x45f   : > { %v7491_v63 = vpop.f32.mrf.mxu1 }
 0x460   : > { %12906 = vst [vmem:[#allocation25_spill] sm:$0xff] %v12694_v24  ;;  %v12696_v0 = vpop.f32.mrf.mxu0  ;;  %v7492_v8 = vadd.f32 %v7491_v63, %v7409_v3  ;;  %v7161_v3 = vadd.f32 %v12690_v5, %v7085_v59 }
 0x461   : > { %v7493_v51 = vpop.f32.mrf.mxu1 }
 0x462   : > { %v12698_v62 = vpop.f32.mrf.mxu0  ;;  %v7494_v29 = vadd.f32 %v7493_v51, %v7411_v12  ;;  %v7569_v35 = vadd.f32 %v7568_v28, %v7492_v8 }
 0x463   : > { %v7644_v57 = vpop.f32.mrf.mxu1 }
 0x464   : > { %v7883_v27 = vpop.f32.mrf.mxu0  ;;  %v7645_v12 = vadd.f32 %v7644_v57, %v7569_v35 }
 0x465   : > { %v7646_v6 = vpop.f32.mrf.mxu1 }
 0x466   : > { %v7885_v36 = vpop.f32.mrf.mxu0 }
 0x467   : > { %v12700_v25 = vpop.f32.mrf.mxu1 }
 0x468   : > { %v8042_v4 = vpop.f32.mrf.mxu0 }
 0x469   : > { %v12702_v19 = vpop.f32.mrf.mxu1 }
 0x46a   : > { %v8044_v52 = vpop.f32.mrf.mxu0 }
 0x46b   : > { %v7965_v21 = vpop.f32.mrf.mxu1 }
 0x46c   : > { %v12704_v41 = vpop.f32.mrf.mxu0  ;;  %v7966_v23 = vadd.f32 %v7965_v21, %v7883_v27 }
 0x46d   : > { %v7967_v39 = vpop.f32.mrf.mxu1 }
 0x46e   : > { %v12706_v32 = vpop.f32.mrf.mxu0  ;;  %v7968_v44 = vadd.f32 %v7967_v39, %v7885_v36  ;;  %v8043_v24 = vadd.f32 %v8042_v4, %v7966_v23 }
 0x46f   : > { %v8118_v49 = vpop.f32.mrf.mxu1 }
 0x470   : > { %v8369_v17 = vpop.f32.mrf.mxu0  ;;  %v8045_v63 = vadd.f32 %v8044_v52, %v7968_v44  ;;  %v8119_v39 = vadd.f32 %v8118_v49, %v8043_v24 }
 0x471   : > { %v8120_v33 = vpop.f32.mrf.mxu1 }
 0x472   : > { %v8371_v37 = vpop.f32.mrf.mxu0 }
 0x473   : > { %v12708_v34 = vpop.f32.mrf.mxu1 }
 0x474   : > { %v8528_v38 = vpop.f32.mrf.mxu0 }
 0x475   : > { %v12710_v16 = vpop.f32.mrf.mxu1 }
 0x476   : > { %12907 = vst [vmem:[#allocation27_spill] sm:$0xff] %v12710_v16  ;;  %v8530_v30 = vpop.f32.mrf.mxu0  ;;  %v7571_v16 = vadd.f32 %v7570_v48, %v7494_v29 }
 0x477   : > { %v8451_v42 = vpop.f32.mrf.mxu1 }
 0x478   : > { %v12712_v18 = vpop.f32.mrf.mxu0  ;;  %v8452_v45 = vadd.f32 %v8451_v42, %v8369_v17  ;;  %v7647_v21 = vadd.f32 %v7646_v6, %v7571_v16  ;;  %v8197_v6 = vadd.f32 %v12704_v41, %v8119_v39 }
 0x479   : > { %v8453_v55 = vpop.f32.mrf.mxu1 }
 0x47a   : > { %v12714_v1 = vpop.f32.mrf.mxu0  ;;  %v8529_v51 = vadd.f32 %v8528_v38, %v8452_v45  ;;  %v8271_v41 = vadd.f32 %v12708_v34, %v8197_v6 }
 0x47b   : > { %v8604_v9 = vpop.f32.mrf.mxu1 }
 0x47c   : > { %v8855_v54 = vpop.f32.mrf.mxu0  ;;  %v8605_v5 = vadd.f32 %v8604_v9, %v8529_v51 }
 0x47d   : > { %v8606_v56 = vpop.f32.mrf.mxu1  ;;  %v12913_v29 = vld [vmem:[#allocation27_spill] sm:$0xff] }
 0x47e   : > { %v8857_v26 = vpop.f32.mrf.mxu0 }
 0x47f   : > { %v12716_v31 = vpop.f32.mrf.mxu1 }
 0x480   : > { %12908 = vst [vmem:[#allocation30_spill] sm:$0xff] %v12716_v31  ;;  %v9014_v40 = vpop.f32.mrf.mxu0 }
 0x481   : > { %v12718_v43 = vpop.f32.mrf.mxu1 }
 0x482   : > { %12909 = vst [vmem:[#allocation23_spill] sm:$0xff] %v12718_v43  ;;  %v9016_v20 = vpop.f32.mrf.mxu0 }
 0x483   : > { %v8937_v60 = vpop.f32.mrf.mxu1 }
 0x484   : > { %v12720_v2 = vpop.f32.mrf.mxu0  ;;  %v8938_v46 = vadd.f32 %v8937_v60, %v8855_v54  ;;  %v7723_v54 = vadd.f32 %v12696_v0, %v7645_v12  ;;  %v8121_v60 = vadd.f32 %v8120_v33, %v8045_v63  ;;  %v8683_v33 = vadd.f32 %v12712_v18, %v8605_v5 }
 0x485   : > { %v8939_v14 = vpop.f32.mrf.mxu1 }
 0x486   : > { %v12722_v11 = vpop.f32.mrf.mxu0  ;;  %v8940_v7 = vadd.f32 %v8939_v14, %v8857_v26  ;;  %v9015_v48 = vadd.f32 %v9014_v40, %v8938_v46  ;;  %v7725_v26 = vadd.f32 %v12698_v62, %v7647_v21  ;;  %v8199_v0 = vadd.f32 %v12706_v32, %v8121_v60 }
 0x487   : > { %12910 = vst [vmem:[#allocation26_spill] sm:$0xff] %v12722_v11  ;;  %v9090_v10 = vpop.f32.mrf.mxu1  ;;  %v8454_v11 = vadd.f32 %v8453_v55, %v8371_v37  ;;  %v7239_v55 = vadd.f32 %v12688_v15, %v7161_v3  ;;  %v7797_v15 = vadd.f32 %v12700_v25, %v7723_v54  ;;  %v12914_v23 = vld [vmem:[#allocation30_spill] sm:$0xff] }
 0x488   : > { %v9337_v13 = vpop.f32.mrf.mxu0  ;;  %v9017_v52 = vadd.f32 %v9016_v20, %v8940_v7  ;;  %v9091_v16 = vadd.f32 %v9090_v10, %v9015_v48  ;;  %v7799_v62 = vadd.f32 %v12702_v19, %v7725_v26  ;;  %v12911_v10 = vld [vmem:[#allocation24_spill] sm:$0xff]  ;;  %v8273_v18 = vadd.f32 %v12913_v29, %v8199_v0 }
 0x489   : > { %v9092_v53 = vpop.f32.mrf.mxu1  ;;  %v8531_v17 = vadd.f32 %v8530_v30, %v8454_v11  ;;  %v7313_v14 = vadd.f32 %v12692_v50, %v7239_v55 }
 0x48a   : > { %v9339_v61 = vpop.f32.mrf.mxu0  ;;  %v9169_v8 = vadd.f32 %v12720_v2, %v9091_v16 }
 0x48b   : > { %v12726_v43 = vpop.f32.mrf.mxu1  ;;  %v8607_v24 = vadd.f32 %v8606_v56, %v8531_v17  ;;  %v7316_v25 = vadd.f32 %v7313_v14, %v12911_v10 }
 0x48c   : > { %v9496_v31 = vpop.f32.mrf.mxu0  ;;  %v9243_v12 = vadd.f32 %v12726_v43, %v9169_v8 }
 0x48d   : > { %v12728_v47 = vpop.f32.mrf.mxu1  ;;  %v8685_v56 = vadd.f32 %v12714_v1, %v8607_v24  ;;  %v7802_v46 = vadd.f32 %v7799_v62, %v7316_v25  ;;  %v10240_v62 = vld [vmem:[%s12807_s10] sm:$0xff] }
 0x48e   : > { %v9498_v58 = vpop.f32.mrf.mxu0  ;;  %v12915_v35 = vld [vmem:[#allocation26_spill] sm:$0xff] }
 0x48f   : > { %v9419_v27 = vpop.f32.mrf.mxu1  ;;  %v8276_v7 = vadd.f32 %v8273_v18, %v7802_v46 }
 0x490   : > { %v9420_v28 = vadd.f32 %v9419_v27, %v9337_v13  ;;  %v9650_v36 = vpop.f32.mrf.mxu0  ;;  %v12912_v13 = vld [vmem:[#allocation25_spill] sm:$0xff] }
 0x491   : > { %v9421_v42 = vpop.f32.mrf.mxu1  ;;  %v7801_v32 = vadd.f32 %v7797_v15, %v12912_v13 }
 0x492   : > { %v9422_v4 = vadd.f32 %v9421_v42, %v9339_v61  ;;  %v9652_v37 = vpop.f32.mrf.mxu0  ;;  %v9497_v45 = vadd.f32 %v9496_v31, %v9420_v28  ;;  %v9093_v31 = vadd.f32 %v9092_v53, %v9017_v52  ;;  %v8757_v53 = vadd.f32 %v12914_v23, %v8683_v33 }
 0x493   : > { %v9572_v57 = vpop.f32.mrf.mxu1  ;;  %v8275_v1 = vadd.f32 %v8271_v41, %v7801_v32  ;;  %v12917_v32 = vld [vmem:[#allocation5_spill] sm:$0xff] }
 0x494   : > { %v9823_v38 = vpop.f32.mrf.mxu0  ;;  %v9499_v30 = vadd.f32 %v9498_v58, %v9422_v4  ;;  %v9573_v20 = vadd.f32 %v9572_v57, %v9497_v45  ;;  %v9171_v19 = vadd.f32 %v12915_v35, %v9093_v31  ;;  %v12916_v58 = vld [vmem:[#allocation23_spill] sm:$0xff] }
 0x495   : > { %v9574_v49 = vpop.f32.mrf.mxu1  ;;  %v8759_v3 = vadd.f32 %v12916_v58, %v8685_v56  ;;  %v8761_v28 = vadd.f32 %v8757_v53, %v8275_v1  ;;  %v10717_v56 = vsel %vm450_vm0, %v10240_v62, 0  ;;  %v12918_v53 = vld [vmem:[#allocation6_spill] sm:$0xff] }
 0x496   : > { %v9825_v40 = vpop.f32.mrf.mxu0  ;;  %v9575_v50 = vadd.f32 %v9574_v49, %v9499_v30  ;;  %v9651_v44 = vadd.f32 %v9650_v36, %v9573_v20  ;;  %v9245_v17 = vadd.f32 %v12728_v47, %v9171_v19  ;;  %v10220_v47 = vpop.permute.xlu1 %10219 }
 0x497   : > { %v9724_v9 = vpop.f32.mrf.mxu1  ;;  %v8762_v4 = vadd.f32 %v8759_v3, %v8276_v7  ;;  %v9247_v54 = vadd.f32 %v9243_v12, %v8761_v28 }
 0x498   : > { %v9982_v11 = vpop.f32.mrf.mxu0  ;;  %v9653_v63 = vadd.f32 %v9652_v37, %v9575_v50  ;;  %v9725_v42 = vadd.f32 %v9724_v9, %v9651_v44 }
 0x499   : > { %v9726_v22 = vpop.f32.mrf.mxu1  ;;  %v9248_v37 = vadd.f32 %v9245_v17, %v8762_v4 }
 0x49a   : > { %v9984_v59 = vpop.f32.mrf.mxu0  ;;  %v9727_v60 = vadd.f32 %v9726_v22, %v9653_v63  ;;  %v9729_v45 = vadd.f32 %v9725_v42, %v9247_v54  ;;  %v10792_v22 = vand.u32 4294901760, %v10717_v56 }
 0x49b   : > { %v9905_v61 = vpop.f32.mrf.mxu1 }
 0x49c   : > { %v9906_v34 = vadd.f32 %v9905_v61, %v9823_v38  ;;  %v10136_v39 = vpop.f32.mrf.mxu0  ;;  %v9730_v24 = vadd.f32 %v9727_v60, %v9248_v37  ;;  %v10793_v8 = vsub.f32 %v10717_v56, %v10792_v22 }
 0x49d   : > { %v9907_v2 = vpop.f32.mrf.mxu1 }
 0x49e   : > { %v9983_v51 = vadd.f32 %v9982_v11, %v9906_v34  ;;  %v9908_v27 = vadd.f32 %v9907_v2, %v9825_v40  ;;  %v10138_v52 = vpop.f32.mrf.mxu0  ;;  %v10794_v10 = vand.u32 4294901760, %v10793_v8  ;;  %v12919_v2 = vmov 0.0  }
 0x49f   : > { %v10058_v21 = vpop.f32.mrf.mxu1 }
 0x4a0   : > { %v9985_v48 = vadd.f32 %v9984_v59, %v9908_v27  ;;  %v10059_v36 = vadd.f32 %v10058_v21, %v9983_v51  ;;  %v10795_v23 = vsub.f32 %v10793_v8, %v10794_v10  ;;  %v10324_v7 = vpop.f32.mrf.mxu0 }
 0x4a1   : > { %v10060_v55 = vpop.f32.mrf.mxu1 }
 0x4a2   : > { %v10137_v5 = vadd.f32 %v10136_v39, %v10059_v36  ;;  %v10061_v57 = vadd.f32 %v10060_v55, %v9985_v48  ;;  %v10796_v34 = vand.u32 4294901760, %v10795_v23  ;;  %v10326_v28 = vpop.f32.mrf.mxu0 }
 0x4a3   : > { %v10210_v43 = vpop.f32.mrf.mxu1 }
 0x4a4   : > { %v10139_v38 = vadd.f32 %v10138_v52, %v10061_v57  ;;  %v10211_v26 = vadd.f32 %v10210_v43, %v10137_v5  ;;  %v10483_v39 = vpop.f32.mrf.mxu0 }
 0x4a5   : > { %v10212_v6 = vpop.f32.mrf.mxu1 }
 0x4a6   : > { %v10215_v49 = vadd.f32 %v10211_v26, %v9729_v45  ;;  %v10213_v16 = vadd.f32 %v10212_v6, %v10139_v38  ;;  %v10485_v48 = vpop.f32.mrf.mxu0 }
 0x4a7   : > { %v10406_v21 = vpop.f32.mrf.mxu1 }
 0x4a8   : > { %v10222_v30 = vadd.f32 %v10220_v47, %v10215_v49  ;;  %v10216_v40 = vadd.f32 %v10213_v16, %v9730_v24  ;;  %v10407_v42 = vadd.f32 %v10406_v21, %v10324_v7 }
 0x4a9   : > { %v10408_v17 = vpop.f32.mrf.mxu1  ;;  %v10637_v54 = vpop.f32.mrf.mxu0 }
 0x4aa   : > { %v10224_v14 = vsub.f32 0.0, %v10222_v30  ;;  %v10223_v15 = vadd.f32 %v10220_v47, %v10216_v40  ;;  %v10409_v36 = vadd.f32 %v10408_v17, %v10326_v28  ;;  %v10484_v55 = vadd.f32 %v10483_v39, %v10407_v42 }
 0x4ab   : > { %v10559_v4 = vpop.f32.mrf.mxu1  ;;  %v10639_v52 = vpop.f32.mrf.mxu0 }
 0x4ac   : > { %v10226_v0 = vmul.f32 1.442695, %v10224_v14  ;;  %v10225_v33 = vsub.f32 0.0, %v10223_v15  ;;  %v10486_v60 = vadd.f32 %v10485_v48, %v10409_v36  ;;  %v10560_v57 = vadd.f32 %v10559_v4, %v10484_v55 }
 0x4ad   : > { %v10561_v5 = vpop.f32.mrf.mxu1 }
 0x4ae   : > { %11378 = vpow2.f32 %v10226_v0  ;;  %v10228_v9 = vmul.f32 1.442695, %v10225_v33  ;;  %v10562_v43 = vadd.f32 %v10561_v5, %v10486_v60  ;;  %v10638_v45 = vadd.f32 %v10637_v54, %v10560_v57 }
 0x4af   : > { %v10711_v37 = vpop.f32.mrf.mxu1 }
 0x4b0   : > { %11380 = vpow2.f32 %v10228_v9  ;;  %v10640_v26 = vadd.f32 %v10639_v52, %v10562_v43  ;;  %v10712_v49 = vadd.f32 %v10711_v37, %v10638_v45 }
 0x4b1   : > { %v10713_v6 = vpop.f32.mrf.mxu1 }
 0x4b2   : > { %v10714_v47 = vadd.f32 %v10713_v6, %v10640_v26 }
 0x4bb   : > { %v11379_v31 = vpop.eup %11378 }
 0x4bc   : > { %v10230_v20 = vadd.f32 1.0, %v11379_v31 }
 0x4bd   : > { %v11381_v11 = vpop.eup %11380 }
 0x4be   : > { %11382 = vrcp.f32 %v10230_v20  ;;  %v10231_v41 = vadd.f32 1.0, %v11381_v11 }
 0x4c0   : > { %11384 = vrcp.f32 %v10231_v41 }
 0x4cb   : > { %v11383_v50 = vpop.eup %11382 }
 0x4cc   : > { %v10236_v25 = vmul.f32 %v11383_v50, %v10222_v30 }
 0x4cd   : > { %v11385_v13 = vpop.eup %11384 }
 0x4ce   : > { %v10238_v29 = vadd.f32 %v10236_v25, %v12917_v32  ;;  %v10237_v18 = vmul.f32 %v11385_v13, %v10223_v15  ;;  %v11194_v32 = vpop.permute.xlu0 %11193 }
 0x4d0   : > { %v10239_v61 = vadd.f32 %v10237_v18, %v12918_v53  ;;  %v10720_v59 = vsel %vm454_vm1, %v10238_v29, 0 }
 0x4d1   : > { %v10757_v35 = vand.u32 4294901760, %v10720_v59 }
 0x4d2   : > { %v10723_v19 = vsel %vm454_vm1, %v10239_v61, 0 }
 0x4d3   : > { %v10755_v44 = vand.u32 4294901760, %v10723_v19  ;;  %v10840_v46 = vsub.f32 %v10720_v59, %v10757_v35 }
 0x4d5   : > { %10756 = vmatprep.subr.mxu0 %v10755_v44  ;;  %v10834_v1 = vsub.f32 %v10723_v19, %v10755_v44  ;;  %v10841_v58 = vand.u32 4294901760, %v10840_v46 }
 0x4d6   : > { %10758 = vmatpush1.msra.mxu0 %v10757_v35 }
 0x4d7   : > { %10797 = vmatmul.mubr.f32.vlgmr.msra.gmra.mxu0 %v10796_v34  ;;  %10917 = vmatprep.subr.mxu0 %v10834_v1  ;;  %v10835_v3 = vand.u32 4294901760, %v10834_v1  ;;  %v10842_v12 = vsub.f32 %v10840_v46, %v10841_v58 }
 0x4d8   : > { %10920 = vmatpush1.msra.mxu0 %v10840_v46  ;;  %10953 = vmatprep.mubr.f32.mxu0 %v12919_v2 }
 0x4d9   : > { %11071 = vmatprep.subr.mxu0 %v10835_v3  ;;  %v10836_v63 = vsub.f32 %v10834_v1, %v10835_v3  ;;  %v10843_v27 = vand.u32 4294901760, %v10842_v12 }
 0x4db   : > { %10956 = vmatmul.mubr.f32.vlgmr.msra.gmra.mxu0 %v10793_v8  ;;  %v10837_v51 = vand.u32 4294901760, %v10836_v63 }
 0x4dc   : > { %11075 = vmatpush1.msra.mxu0 %v10841_v58  ;;  %11108 = vmatprep.mubr.f32.mxu0 %v12919_v2 }
 0x4dd   : > { %10838 = vmatprep.subr.mxu1 %v10837_v51 }
 0x4de   : > { %10844 = vmatpush1.msra.mxu1 %v10843_v27 }
 0x4df   : > { %10879 = vmatmul.mubr.f32.vlgmr.msra.gmra.mxu1 %v10792_v22  ;;  %10993 = vmatprep.subr.mxu1 %v10755_v44 }
 0x4e0   : > { %10995 = vmatpush1.msra.mxu1 %v10757_v35  ;;  %11028 = vmatprep.mubr.f32.mxu1 %v12919_v2 }
 0x4e1   : > { %11147 = vmatprep.subr.mxu1 %v10755_v44  ;;  %11110 = vmatmul.mubr.f32.vlgmr.msra.gmra.mxu0 %v10792_v22 }
 0x4e3   : > { %11032 = vmatmul.mubr.f32.vlgmr.msra.gmra.mxu1 %v10794_v10 }
 0x4e4   : > { %11149 = vmatpush1.msra.mxu1 %v10757_v35  ;;  %11182 = vmatprep.mubr.f32.mxu1 %v12919_v2 }
 0x4e7   : > { %11184 = vmatmul.mubr.f32.vlgmr.msra.gmra.mxu1 %v10792_v22 }
 0x597   : > { %v10798_v38 = vpop.f32.mrf.mxu0 }
 0x598   : > { %v10799_v30 = vadd.f32 %v10798_v38, %v10712_v49 }
 0x599   : > { %v10800_v24 = vpop.f32.mrf.mxu0 }
 0x59a   : > { %v10801_v15 = vadd.f32 %v10800_v24, %v10714_v47 }
 0x59b   : > { %v10957_v16 = vpop.f32.mrf.mxu0 }
 0x59d   : > { %v10959_v14 = vpop.f32.mrf.mxu0 }
 0x59f   : > { %v10880_v40 = vpop.f32.mrf.mxu1 }
 0x5a0   : > { %v10881_v0 = vadd.f32 %v10880_v40, %v10799_v30 }
 0x5a1   : > { %v10882_v33 = vpop.f32.mrf.mxu1  ;;  %v11111_v11 = vpop.f32.mrf.mxu0 }
 0x5a2   : > { %v10883_v9 = vadd.f32 %v10882_v33, %v10801_v15  ;;  %v10958_v31 = vadd.f32 %v10957_v16, %v10881_v0 }
 0x5a3   : > { %v11033_v20 = vpop.f32.mrf.mxu1  ;;  %v11113_v50 = vpop.f32.mrf.mxu0 }
 0x5a4   : > { %v10960_v62 = vadd.f32 %v10959_v14, %v10883_v9  ;;  %v11034_v41 = vadd.f32 %v11033_v20, %v10958_v31 }
 0x5a5   : > { %v11035_v56 = vpop.f32.mrf.mxu1 }
 0x5a6   : > { %v11036_v22 = vadd.f32 %v11035_v56, %v10960_v62  ;;  %v11112_v8 = vadd.f32 %v11111_v11, %v11034_v41 }
 0x5a7   : > { %v11185_v10 = vpop.f32.mrf.mxu1 }
 0x5a8   : > { %v11114_v25 = vadd.f32 %v11113_v50, %v11036_v22  ;;  %v11186_v13 = vadd.f32 %v11185_v10, %v11112_v8 }
 0x5a9   : > { %v11187_v29 = vpop.f32.mrf.mxu1 }
 0x5aa   : > { %v11196_v18 = vadd.f32 %v11194_v32, %v11186_v13  ;;  %v11188_v23 = vadd.f32 %v11187_v29, %v11114_v25 }
 0x5ac   : > { %v11198_v53 = vsub.f32 0.0, %v11196_v18  ;;  %v11197_v61 = vadd.f32 %v11194_v32, %v11188_v23 }
 0x5ae   : > { %v11200_v59 = vmul.f32 1.442695, %v11198_v53  ;;  %v11199_v35 = vsub.f32 0.0, %v11197_v61 }
 0x5b0   : > { %11386 = vpow2.f32 %v11200_v59  ;;  %v11202_v19 = vmul.f32 1.442695, %v11199_v35 }
 0x5b2   : > { %11388 = vpow2.f32 %v11202_v19 }
 0x5bd   : > { %v11387_v44 = vpop.eup %11386 }
 0x5be   : > { %v11204_v34 = vadd.f32 1.0, %v11387_v44 }
 0x5bf   : > { %v11389_v46 = vpop.eup %11388 }
 0x5c0   : > { %11390 = vrcp.f32 %v11204_v34  ;;  %v11205_v1 = vadd.f32 1.0, %v11389_v46 }
 0x5c2   : > { %11392 = vrcp.f32 %v11205_v1 }
 0x5cd   : > { %v11391_v58 = vpop.eup %11390 }
 0x5ce   : > { %v11210_v3 = vmul.f32 %v11391_v58, %v11196_v18 }
 0x5cf   : > { %v11393_v2 = vpop.eup %11392 }
 0x5d0   : > { %v11211_v12 = vmul.f32 %v11393_v2, %v11197_v61  ;;  %11212 = vst [vmem:[%s433_s22] sm:$0xff] %v11210_v3 }
 0x5d2   : > { %11213 = vst [vmem:[%s433_s22 + $0x8] sm:$0xff] %v11211_v12 }
 0x5d3   : > { %11407 = shalt.err (!%p11404_p3)
}
 0x5d4   : > { %s11408_s3 = scalar_lea.hbm %s11227_s16, 256  ;;  %s11412_s22 = scalar_lea.hbm %s12810_s13, 512 }
 0x5d5   : > { %p11409_p4 = scmp.ne.s32.totalorder %s11227_s16, %s11408_s3  ;;  %p11413_p9 = scmp.lt.s32.totalorder %s11227_s16, %s12810_s13 }
 0x5d6   : > { %p11414_p10 = scmp.lt.s32.totalorder %s11412_s22, %s11408_s3 }
 0x5d7   : > { %p11410_p7 = pnand %p11409_p4, %p11575_p5 }
 0x5d8   : > { %p11415_p11 = por %p11414_p10, %p11413_p9 }
 0x5d9   : > { %p11411_p8 = pneg %p11410_p7 }
 0x5db   : > { %p11416_p12 = pnand %p11415_p11, %p11411_p8 }
 0x5dd   : > { %11419 = shalt.err (!%p11416_p12)
}
 0x5de   : > { %11302 = dma.vmem_to_hbm [thread:$0]  (%p11575_p5), %s11230_s15, 256, %s11227_s16, %s11215_s30  }
 0x5df PF: > { %p11308_p13 = scmp.ge.s32.totalorder %s11454_s28, 2  ;;  %s11241_s1 = sand.u32 1, %s11442_s25  }
 0x5e0   : > { %s11242_s2 = scalar_lea.sflag [#allocation3], %s11241_s1 }
 0x5e1   : > { %p11305_p0 = pnand %p11308_p13, %p11579_p6 }
 0x5e3   : > { %p11306_p1 = pneg %p11305_p0 }
 0x5e5   : > { %11437 = dma.done.wait (%p11306_p1), %s11242_s2, 256  }
 0x5e6   : > { %11439 = vsyncadd (%p11306_p1), %s11242_s2, 4294967040  ;;  %p23_p2 = scmp.ge.s32.totalorder %s11562_s14, 4   ;;  %s12920_s25 = smov %s11446_s26 }
 0x5e7   : > { %s12921_s26 = smov %s11450_s27  ;;  %s12922_s27 = smov %s11573_s17 }
 0x5e8   : > { %s12923_s28 = smov %s11562_s14  ;;  %25 = sbr.rel (!%p23_p2) target bundleno = 8 (0x8), region = 107 }
 0x5ed   :  { %11247 = vsyncpa [#allocation3], 1 }
 0x5ee   :  { %11249 = vsyncpa [#allocation3 + $0x1], 1 }

</bundles_post_ra>
